<compile_context>
chip_gen: v7x
topology: tpu7x:2x2x1
jax: 0.10.0
libtpu: 0.0.40
codegen_flags: <defaults>
</compile_context>

<pallas_src>
import jax
import jax.numpy as jnp
from jax import lax
from jax.experimental import pallas as pl
from jax.experimental.pallas import tpu as pltpu

# Model dims implied by the module
C_IN, C1, C2 = 335, 256, 32
C_PAD = 384                       # 3 * 128: lane/MXU-K aligned channel pad
H_IN, H1, H2 = 27, 27, 25         # conv1 keeps H (pad (1,0)), conv2 drops 2
H_PAD = H_IN + 2                  # conv1 zero padding folded into the layout
KH = 3
FC1_IN, FC1_OUT, N_OUT = C2 * H2, 256, 4
TB_MAX = 128                      # samples per grid step (<=128 for v7x VMEM)


def net_kernel(x_ref, w1_ref, b1_ref, w2_ref, b2_ref,
               wf_ref, bf_ref, wo_ref, bo_ref, o_ref, h1_ref, h2_ref):
    tb = o_ref.shape[0]

    # ---- conv1 + relu: (29*TB, 384)bf16 -> (27*TB, 256) ----
    # Row index = h*TB + sample, so tap kh is the contiguous slice starting at
    # row kh*TB (the h=0 / h=28 rows of x are the conv zero padding).
    acc1 = jnp.dot(x_ref[pl.ds(0, H1 * tb), :], w1_ref[0],
                   preferred_element_type=jnp.float32)
    for kh in range(1, KH):
        acc1 = acc1 + jnp.dot(x_ref[pl.ds(kh * tb, H1 * tb), :], w1_ref[kh],
                              preferred_element_type=jnp.float32)
    h1_ref[...] = jnp.maximum(acc1 + b1_ref[...], 0.0).astype(h1_ref.dtype)

    # ---- conv2 + relu: (27*TB, 256)bf16 -> (25*TB, 32), no padding ----
    acc2 = jnp.dot(h1_ref[pl.ds(0, H2 * tb), :], w2_ref[0],
                   preferred_element_type=jnp.float32)
    for kh in range(1, KH):
        acc2 = acc2 + jnp.dot(h1_ref[pl.ds(kh * tb, H2 * tb), :], w2_ref[kh],
                              preferred_element_type=jnp.float32)
    h2_ref[...] = jnp.maximum(acc2 + b2_ref[...], 0.0).astype(h2_ref.dtype)

    # ---- fc1 + relu as sum over h of (TB,32)@(32,256) ----
    # wf_ref[h, c, :] corresponds to PyTorch fc1 input feature c*25 + h
    # (NCHW flatten order), so summing the per-h dots reproduces fc1 exactly
    # without the 25-way lane concatenation.
    facc = jnp.dot(h2_ref[pl.ds(0, tb), :], wf_ref[0],
                   preferred_element_type=jnp.float32)
    for h in range(1, H2):
        facc = facc + jnp.dot(h2_ref[pl.ds(h * tb, tb), :], wf_ref[h],
                              preferred_element_type=jnp.float32)
    f = jnp.maximum(facc + bf_ref[...], 0.0)                    # (TB, 256) f32

    # ---- out + softmax (dim=1) ----
    logits = (jnp.dot(f.astype(wo_ref.dtype), wo_ref[...],
                      preferred_element_type=jnp.float32)
              + bo_ref[...])                                    # (TB, 4)
    m = jnp.max(logits, axis=-1, keepdims=True)
    e = jnp.exp(logits - m)
    denom = jnp.sum(e, axis=-1, keepdims=True)
    o_ref[...] = e * pl.reciprocal(denom, approx=True)


@jax.jit
def net_forward(x_nchw, params):
    w1, b1, w2, b2, wf, bf, wo, bo = params
    B = x_nchw.shape[0]

    # TB: multiple of 16 (bf16 sublane packing), at most 128 (v7x VMEM), and
    # chosen from ceil(B/2) so large batches always give >= 2 grid steps
    # (keeps both v7x TensorCores busy via the "parallel" grid axis).
    half = -(-B // 2)
    tb = min(TB_MAX, ((half + 15) // 16) * 16)
    nt = -(-B // tb)                            # grid length
    bp = nt * tb                                # padded batch

    # --- input relayout (wrapper glue, one fused pass, bf16 output) ---------
    # NCHW (B,335,27,1) -> channels-last, H zero-padded to 29, C padded to 384,
    # batch padded to NT*TB, then h-major per tile: row = (tile*29+h)*TB + s.
    x_hc = jnp.transpose(x_nchw[:, :, :, 0], (0, 2, 1)).astype(jnp.bfloat16)
    x_p = jnp.pad(x_hc, ((0, bp - B), (1, 1), (0, C_PAD - C_IN)))  # (BP,29,384)
    x_p = x_p.reshape(nt, tb, H_PAD, C_PAD).transpose(0, 2, 1, 3)  # (NT,29,TB,384)
    x_p = x_p.reshape(nt * H_PAD * tb, C_PAD)                      # (NT*29*TB,384)

    # --- kernel-layout weights (glue only; compute stays in the kernel) -----
    w1_k = jnp.pad(jnp.transpose(w1[:, :, :, 0], (2, 1, 0)),
                   ((0, 0), (0, C_PAD - C_IN), (0, 0))).astype(jnp.bfloat16)
    w2_k = jnp.transpose(w2[:, :, :, 0], (2, 1, 0)).astype(jnp.bfloat16)
    wf_k = (wf.reshape(FC1_OUT, C2, H2)                 # (256,32,25)
              .transpose(2, 1, 0)                       # (25,32,256): [h,c,out]
              .astype(jnp.bfloat16))
    wo_k = wo.T.astype(jnp.bfloat16)                    # (256,4)
    b1_k = b1.reshape(1, C1)
    b2_k = b2.reshape(1, C2)
    bf_k = bf.reshape(1, FC1_OUT)
    bo_k = bo.reshape(1, N_OUT)

    out = pl.pallas_call(
        net_kernel,
        out_shape=jax.ShapeDtypeStruct((bp, N_OUT), jnp.float32),
        grid=(nt,),
        in_specs=[
            pl.BlockSpec((H_PAD * tb, C_PAD), lambda b: (b, 0)),       # x slab (bf16)
            pl.BlockSpec((KH, C_PAD, C1), lambda b: (0, 0, 0)),        # conv1 W
            pl.BlockSpec((1, C1), lambda b: (0, 0)),                   # conv1 b (f32)
            pl.BlockSpec((KH, C1, C2), lambda b: (0, 0, 0)),           # conv2 W
            pl.BlockSpec((1, C2), lambda b: (0, 0)),                   # conv2 b (f32)
            pl.BlockSpec((H2, C2, FC1_OUT), lambda b: (0, 0, 0)),      # fc1 W [h,c,o]
            pl.BlockSpec((1, FC1_OUT), lambda b: (0, 0)),              # fc1 b (f32)
            pl.BlockSpec((FC1_OUT, N_OUT), lambda b: (0, 0)),          # out W
            pl.BlockSpec((1, N_OUT), lambda b: (0, 0)),                # out b (f32)
        ],
        out_specs=pl.BlockSpec((tb, N_OUT), lambda b: (b, 0)),
        scratch_shapes=[pltpu.VMEM((H1 * tb, C1), jnp.bfloat16),       # conv1 act
                        pltpu.VMEM((H2 * tb, C2), jnp.bfloat16)],      # conv2 act
        compiler_params=pltpu.CompilerParams(
            dimension_semantics=("parallel",),
            # ~8 MiB double-buffered inputs + ~2.5 MiB scratch + f32 acc
            # temporaries at TB=128; 40 MiB leaves headroom on v7x (64 MiB).
            vmem_limit_bytes=40 * 1024 * 1024),
    )(x_p, w1_k, b1_k, w2_k, b2_k, wf_k, bf_k, wo_k, bo_k)

    return out[:B]                                                     # (B, 4)


def reference(x, params):
    """Pure-JAX NCHW f32 reference mirroring the PyTorch forward."""
    w1, b1, w2, b2, wf, bf, wo, bo = params
    y = lax.conv_general_dilated(x, w1, (1, 1), ((1, 1), (0, 0)),
                                 dimension_numbers=('NCHW', 'OIHW', 'NCHW'))
    y = jax.nn.relu(y + b1[None, :, None, None])
    y = lax.conv_general_dilated(y, w2, (1, 1), ((0, 0), (0, 0)),
                                 dimension_numbers=('NCHW', 'OIHW', 'NCHW'))
    y = jax.nn.relu(y + b2[None, :, None, None])
    y = y.reshape(-1, FC1_IN)
    y = jax.nn.relu(y @ wf.T + bf)
    return jax.nn.softmax(y @ wo.T + bo, axis=1)


if __name__ == "__main__":
    key = jax.random.PRNGKey(0)
    ks = jax.random.split(key, 9)
    B = 2
    x = jax.random.normal(ks[0], (B, C_IN, H_IN, 1), jnp.float32)
    params = (
        0.05 * jax.random.normal(ks[1], (C1, C_IN, KH, 1), jnp.float32),  # conv1.weight
        0.05 * jax.random.normal(ks[2], (C1,), jnp.float32),              # conv1.bias
        0.05 * jax.random.normal(ks[3], (C2, C1, KH, 1), jnp.float32),    # conv2.weight
        0.05 * jax.random.normal(ks[4], (C2,), jnp.float32),              # conv2.bias
        0.05 * jax.random.normal(ks[5], (FC1_OUT, FC1_IN), jnp.float32),  # fc1.weight
        0.05 * jax.random.normal(ks[6], (FC1_OUT,), jnp.float32),         # fc1.bias
        0.05 * jax.random.normal(ks[7], (N_OUT, FC1_OUT), jnp.float32),   # out.weight
        0.05 * jax.random.normal(ks[8], (N_OUT,), jnp.float32),           # out.bias
    )

    out = jax.block_until_ready(net_forward(x, params))
    ref = jax.block_until_ready(reference(x, params))

    assert out.shape == (B, N_OUT)
    # bf16 matmuls + approx reciprocal: tolerance loosened vs the f32 kernel.
    if not jnp.allclose(out, ref, atol=2e-2, rtol=2e-2):
        raise AssertionError("Pallas kernel does not match reference")
    print("KERNEL_OK")
</pallas_src>

<mosaic_0001>
module attributes {stable_mosaic.version = 11 : i64} {
  func.func @net_kernel(%arg0: i32, %arg1: memref<464x384xbf16, #tpu.memory_space<vmem>>, %arg2: memref<3x384x256xbf16, #tpu.memory_space<vmem>>, %arg3: memref<1x256xf32, #tpu.memory_space<vmem>>, %arg4: memref<3x256x32xbf16, #tpu.memory_space<vmem>>, %arg5: memref<1x32xf32, #tpu.memory_space<vmem>>, %arg6: memref<25x32x256xbf16, #tpu.memory_space<vmem>>, %arg7: memref<1x256xf32, #tpu.memory_space<vmem>>, %arg8: memref<256x4xbf16, #tpu.memory_space<vmem>>, %arg9: memref<1x4xf32, #tpu.memory_space<vmem>>, %arg10: memref<16x4xf32, #tpu.memory_space<vmem>>, %arg11: memref<432x256xbf16, #tpu.memory_space<vmem>>, %arg12: memref<400x32xbf16, #tpu.memory_space<vmem>>) attributes {dimension_semantics = [#tpu.dimension_semantics<parallel>], iteration_bounds = array<i64: 1>, scalar_prefetch = 0 : i64, scratch_operands = 2 : i64, tpu.core_type = #tpu.core_type<tc>, window_params = [{transform_indices = @transform_0, window_bounds = array<i64: 464, 384>}, {pipeline_mode = #tpu.pipeline_mode<synchronous>, transform_indices = @transform_1, window_bounds = array<i64: 3, 384, 256>}, {pipeline_mode = #tpu.pipeline_mode<synchronous>, transform_indices = @transform_2, window_bounds = array<i64: 1, 256>}, {pipeline_mode = #tpu.pipeline_mode<synchronous>, transform_indices = @transform_3, window_bounds = array<i64: 3, 256, 32>}, {pipeline_mode = #tpu.pipeline_mode<synchronous>, transform_indices = @transform_4, window_bounds = array<i64: 1, 32>}, {pipeline_mode = #tpu.pipeline_mode<synchronous>, transform_indices = @transform_5, window_bounds = array<i64: 25, 32, 256>}, {pipeline_mode = #tpu.pipeline_mode<synchronous>, transform_indices = @transform_6, window_bounds = array<i64: 1, 256>}, {pipeline_mode = #tpu.pipeline_mode<synchronous>, transform_indices = @transform_7, window_bounds = array<i64: 256, 4>}, {pipeline_mode = #tpu.pipeline_mode<synchronous>, transform_indices = @transform_8, window_bounds = array<i64: 1, 4>}, {transform_indices = @transform_9, window_bounds = array<i64: 16, 4>}]} {
    %c0 = arith.constant 0 : index
    %c0_0 = arith.constant 0 : index
    %0 = vector.load %arg1[%c0, %c0_0] : memref<464x384xbf16, #tpu.memory_space<vmem>>, vector<432x384xbf16>
    %c0_1 = arith.constant 0 : index
    %c0_2 = arith.constant 0 : index
    %c0_3 = arith.constant 0 : index
    %1 = vector.load %arg2[%c0_1, %c0_2, %c0_3] : memref<3x384x256xbf16, #tpu.memory_space<vmem>>, vector<1x384x256xbf16>
    %2 = vector.shape_cast %1 : vector<1x384x256xbf16> to vector<384x256xbf16>
    %cst = arith.constant dense<0.000000e+00> : vector<432x256xf32>
    %3 = tpu.matmul %0, %2, %cst {dimension_numbers = #tpu.dot_dimension_numbers<[1], [0], [0], [1], [0, 0, 1, 1], [], []>} : vector<432x384xbf16>, vector<384x256xbf16>, vector<432x256xf32> -> vector<432x256xf32>
    %c16 = arith.constant 16 : index
    %c0_4 = arith.constant 0 : index
    %4 = vector.load %arg1[%c16, %c0_4] : memref<464x384xbf16, #tpu.memory_space<vmem>>, vector<432x384xbf16>
    %c1 = arith.constant 1 : index
    %c0_5 = arith.constant 0 : index
    %c0_6 = arith.constant 0 : index
    %5 = vector.load %arg2[%c1, %c0_5, %c0_6] : memref<3x384x256xbf16, #tpu.memory_space<vmem>>, vector<1x384x256xbf16>
    %6 = vector.shape_cast %5 : vector<1x384x256xbf16> to vector<384x256xbf16>
    %cst_7 = arith.constant dense<0.000000e+00> : vector<432x256xf32>
    %7 = tpu.matmul %4, %6, %cst_7 {dimension_numbers = #tpu.dot_dimension_numbers<[1], [0], [0], [1], [0, 0, 1, 1], [], []>} : vector<432x384xbf16>, vector<384x256xbf16>, vector<432x256xf32> -> vector<432x256xf32>
    %8 = arith.addf %3, %7 : vector<432x256xf32>
    %c32 = arith.constant 32 : index
    %c0_8 = arith.constant 0 : index
    %9 = vector.load %arg1[%c32, %c0_8] : memref<464x384xbf16, #tpu.memory_space<vmem>>, vector<432x384xbf16>
    %c2 = arith.constant 2 : index
    %c0_9 = arith.constant 0 : index
    %c0_10 = arith.constant 0 : index
    %10 = vector.load %arg2[%c2, %c0_9, %c0_10] : memref<3x384x256xbf16, #tpu.memory_space<vmem>>, vector<1x384x256xbf16>
    %11 = vector.shape_cast %10 : vector<1x384x256xbf16> to vector<384x256xbf16>
    %cst_11 = arith.constant dense<0.000000e+00> : vector<432x256xf32>
    %12 = tpu.matmul %9, %11, %cst_11 {dimension_numbers = #tpu.dot_dimension_numbers<[1], [0], [0], [1], [0, 0, 1, 1], [], []>} : vector<432x384xbf16>, vector<384x256xbf16>, vector<432x256xf32> -> vector<432x256xf32>
    %13 = arith.addf %8, %12 : vector<432x256xf32>
    %c0_12 = arith.constant 0 : index
    %c0_13 = arith.constant 0 : index
    %14 = vector.load %arg3[%c0_12, %c0_13] : memref<1x256xf32, #tpu.memory_space<vmem>>, vector<1x256xf32>
    %15 = vector.broadcast %14 : vector<1x256xf32> to vector<432x256xf32>
    %16 = arith.addf %13, %15 : vector<432x256xf32>
    %cst_14 = arith.constant 0.000000e+00 : f32
    %17 = vector.broadcast %cst_14 : f32 to vector<432x256xf32>
    %18 = arith.maximumf %16, %17 : vector<432x256xf32>
    %19 = arith.truncf %18 : vector<432x256xf32> to vector<432x256xbf16>
    %c0_15 = arith.constant 0 : index
    %c0_16 = arith.constant 0 : index
    %20 = vector.load %arg11[%c0_15, %c0_16] : memref<432x256xbf16, #tpu.memory_space<vmem>>, vector<432x256xbf16>
    tpu.vector_store %arg11[%c0_15, %c0_16], %19 {strides = array<i32>} : memref<432x256xbf16, #tpu.memory_space<vmem>>, vector<432x256xbf16>,
    %c0_17 = arith.constant 0 : index
    %c0_18 = arith.constant 0 : index
    %21 = vector.load %arg11[%c0_17, %c0_18] : memref<432x256xbf16, #tpu.memory_space<vmem>>, vector<400x256xbf16>
    %c0_19 = arith.constant 0 : index
    %c0_20 = arith.constant 0 : index
    %c0_21 = arith.constant 0 : index
    %22 = vector.load %arg4[%c0_19, %c0_20, %c0_21] : memref<3x256x32xbf16, #tpu.memory_space<vmem>>, vector<1x256x32xbf16>
    %23 = vector.shape_cast %22 : vector<1x256x32xbf16> to vector<256x32xbf16>
    %cst_22 = arith.constant dense<0.000000e+00> : vector<400x32xf32>
    %24 = tpu.matmul %21, %23, %cst_22 {dimension_numbers = #tpu.dot_dimension_numbers<[1], [0], [0], [1], [0, 0, 1, 1], [], []>} : vector<400x256xbf16>, vector<256x32xbf16>, vector<400x32xf32> -> vector<400x32xf32>
    %c16_23 = arith.constant 16 : index
    %c0_24 = arith.constant 0 : index
    %25 = vector.load %arg11[%c16_23, %c0_24] : memref<432x256xbf16, #tpu.memory_space<vmem>>, vector<400x256xbf16>
    %c1_25 = arith.constant 1 : index
    %c0_26 = arith.constant 0 : index
    %c0_27 = arith.constant 0 : index
    %26 = vector.load %arg4[%c1_25, %c0_26, %c0_27] : memref<3x256x32xbf16, #tpu.memory_space<vmem>>, vector<1x256x32xbf16>
    %27 = vector.shape_cast %26 : vector<1x256x32xbf16> to vector<256x32xbf16>
    %cst_28 = arith.constant dense<0.000000e+00> : vector<400x32xf32>
    %28 = tpu.matmul %25, %27, %cst_28 {dimension_numbers = #tpu.dot_dimension_numbers<[1], [0], [0], [1], [0, 0, 1, 1], [], []>} : vector<400x256xbf16>, vector<256x32xbf16>, vector<400x32xf32> -> vector<400x32xf32>
    %29 = arith.addf %24, %28 : vector<400x32xf32>
    %c32_29 = arith.constant 32 : index
    %c0_30 = arith.constant 0 : index
    %30 = vector.load %arg11[%c32_29, %c0_30] : memref<432x256xbf16, #tpu.memory_space<vmem>>, vector<400x256xbf16>
    %c2_31 = arith.constant 2 : index
    %c0_32 = arith.constant 0 : index
    %c0_33 = arith.constant 0 : index
    %31 = vector.load %arg4[%c2_31, %c0_32, %c0_33] : memref<3x256x32xbf16, #tpu.memory_space<vmem>>, vector<1x256x32xbf16>
    %32 = vector.shape_cast %31 : vector<1x256x32xbf16> to vector<256x32xbf16>
    %cst_34 = arith.constant dense<0.000000e+00> : vector<400x32xf32>
    %33 = tpu.matmul %30, %32, %cst_34 {dimension_numbers = #tpu.dot_dimension_numbers<[1], [0], [0], [1], [0, 0, 1, 1], [], []>} : vector<400x256xbf16>, vector<256x32xbf16>, vector<400x32xf32> -> vector<400x32xf32>
    %34 = arith.addf %29, %33 : vector<400x32xf32>
    %c0_35 = arith.constant 0 : index
    %c0_36 = arith.constant 0 : index
    %35 = vector.load %arg5[%c0_35, %c0_36] : memref<1x32xf32, #tpu.memory_space<vmem>>, vector<1x32xf32>
    %36 = vector.broadcast %35 : vector<1x32xf32> to vector<400x32xf32>
    %37 = arith.addf %34, %36 : vector<400x32xf32>
    %cst_37 = arith.constant 0.000000e+00 : f32
    %38 = vector.broadcast %cst_37 : f32 to vector<400x32xf32>
    %39 = arith.maximumf %37, %38 : vector<400x32xf32>
    %40 = arith.truncf %39 : vector<400x32xf32> to vector<400x32xbf16>
    %c0_38 = arith.constant 0 : index
    %c0_39 = arith.constant 0 : index
    %41 = vector.load %arg12[%c0_38, %c0_39] : memref<400x32xbf16, #tpu.memory_space<vmem>>, vector<400x32xbf16>
    tpu.vector_store %arg12[%c0_38, %c0_39], %40 {strides = array<i32>} : memref<400x32xbf16, #tpu.memory_space<vmem>>, vector<400x32xbf16>,
    %c0_40 = arith.constant 0 : index
    %c0_41 = arith.constant 0 : index
    %42 = vector.load %arg12[%c0_40, %c0_41] : memref<400x32xbf16, #tpu.memory_space<vmem>>, vector<16x32xbf16>
    %c0_42 = arith.constant 0 : index
    %c0_43 = arith.constant 0 : index
    %c0_44 = arith.constant 0 : index
    %43 = vector.load %arg6[%c0_42, %c0_43, %c0_44] : memref<25x32x256xbf16, #tpu.memory_space<vmem>>, vector<1x32x256xbf16>
    %44 = vector.shape_cast %43 : vector<1x32x256xbf16> to vector<32x256xbf16>
    %cst_45 = arith.constant dense<0.000000e+00> : vector<16x256xf32>
    %45 = tpu.matmul %42, %44, %cst_45 {dimension_numbers = #tpu.dot_dimension_numbers<[1], [0], [0], [1], [0, 0, 1, 1], [], []>} : vector<16x32xbf16>, vector<32x256xbf16>, vector<16x256xf32> -> vector<16x256xf32>
    %c16_46 = arith.constant 16 : index
    %c0_47 = arith.constant 0 : index
    %46 = vector.load %arg12[%c16_46, %c0_47] : memref<400x32xbf16, #tpu.memory_space<vmem>>, vector<16x32xbf16>
    %c1_48 = arith.constant 1 : index
    %c0_49 = arith.constant 0 : index
    %c0_50 = arith.constant 0 : index
    %47 = vector.load %arg6[%c1_48, %c0_49, %c0_50] : memref<25x32x256xbf16, #tpu.memory_space<vmem>>, vector<1x32x256xbf16>
    %48 = vector.shape_cast %47 : vector<1x32x256xbf16> to vector<32x256xbf16>
    %cst_51 = arith.constant dense<0.000000e+00> : vector<16x256xf32>
    %49 = tpu.matmul %46, %48, %cst_51 {dimension_numbers = #tpu.dot_dimension_numbers<[1], [0], [0], [1], [0, 0, 1, 1], [], []>} : vector<16x32xbf16>, vector<32x256xbf16>, vector<16x256xf32> -> vector<16x256xf32>
    %50 = arith.addf %45, %49 : vector<16x256xf32>
    %c32_52 = arith.constant 32 : index
    %c0_53 = arith.constant 0 : index
    %51 = vector.load %arg12[%c32_52, %c0_53] : memref<400x32xbf16, #tpu.memory_space<vmem>>, vector<16x32xbf16>
    %c2_54 = arith.constant 2 : index
    %c0_55 = arith.constant 0 : index
    %c0_56 = arith.constant 0 : index
    %52 = vector.load %arg6[%c2_54, %c0_55, %c0_56] : memref<25x32x256xbf16, #tpu.memory_space<vmem>>, vector<1x32x256xbf16>
    %53 = vector.shape_cast %52 : vector<1x32x256xbf16> to vector<32x256xbf16>
    %cst_57 = arith.constant dense<0.000000e+00> : vector<16x256xf32>
    %54 = tpu.matmul %51, %53, %cst_57 {dimension_numbers = #tpu.dot_dimension_numbers<[1], [0], [0], [1], [0, 0, 1, 1], [], []>} : vector<16x32xbf16>, vector<32x256xbf16>, vector<16x256xf32> -> vector<16x256xf32>
    %55 = arith.addf %50, %54 : vector<16x256xf32>
    %c48 = arith.constant 48 : index
    %c0_58 = arith.constant 0 : index
    %56 = vector.load %arg12[%c48, %c0_58] : memref<400x32xbf16, #tpu.memory_space<vmem>>, vector<16x32xbf16>
    %c3 = arith.constant 3 : index
    %c0_59 = arith.constant 0 : index
    %c0_60 = arith.constant 0 : index
    %57 = vector.load %arg6[%c3, %c0_59, %c0_60] : memref<25x32x256xbf16, #tpu.memory_space<vmem>>, vector<1x32x256xbf16>
    %58 = vector.shape_cast %57 : vector<1x32x256xbf16> to vector<32x256xbf16>
    %cst_61 = arith.constant dense<0.000000e+00> : vector<16x256xf32>
    %59 = tpu.matmul %56, %58, %cst_61 {dimension_numbers = #tpu.dot_dimension_numbers<[1], [0], [0], [1], [0, 0, 1, 1], [], []>} : vector<16x32xbf16>, vector<32x256xbf16>, vector<16x256xf32> -> vector<16x256xf32>
    %60 = arith.addf %55, %59 : vector<16x256xf32>
    %c64 = arith.constant 64 : index
    %c0_62 = arith.constant 0 : index
    %61 = vector.load %arg12[%c64, %c0_62] : memref<400x32xbf16, #tpu.memory_space<vmem>>, vector<16x32xbf16>
    %c4 = arith.constant 4 : index
    %c0_63 = arith.constant 0 : index
    %c0_64 = arith.constant 0 : index
    %62 = vector.load %arg6[%c4, %c0_63, %c0_64] : memref<25x32x256xbf16, #tpu.memory_space<vmem>>, vector<1x32x256xbf16>
    %63 = vector.shape_cast %62 : vector<1x32x256xbf16> to vector<32x256xbf16>
    %cst_65 = arith.constant dense<0.000000e+00> : vector<16x256xf32>
    %64 = tpu.matmul %61, %63, %cst_65 {dimension_numbers = #tpu.dot_dimension_numbers<[1], [0], [0], [1], [0, 0, 1, 1], [], []>} : vector<16x32xbf16>, vector<32x256xbf16>, vector<16x256xf32> -> vector<16x256xf32>
    %65 = arith.addf %60, %64 : vector<16x256xf32>
    %c80 = arith.constant 80 : index
    %c0_66 = arith.constant 0 : index
    %66 = vector.load %arg12[%c80, %c0_66] : memref<400x32xbf16, #tpu.memory_space<vmem>>, vector<16x32xbf16>
    %c5 = arith.constant 5 : index
    %c0_67 = arith.constant 0 : index
    %c0_68 = arith.constant 0 : index
    %67 = vector.load %arg6[%c5, %c0_67, %c0_68] : memref<25x32x256xbf16, #tpu.memory_space<vmem>>, vector<1x32x256xbf16>
    %68 = vector.shape_cast %67 : vector<1x32x256xbf16> to vector<32x256xbf16>
    %cst_69 = arith.constant dense<0.000000e+00> : vector<16x256xf32>
    %69 = tpu.matmul %66, %68, %cst_69 {dimension_numbers = #tpu.dot_dimension_numbers<[1], [0], [0], [1], [0, 0, 1, 1], [], []>} : vector<16x32xbf16>, vector<32x256xbf16>, vector<16x256xf32> -> vector<16x256xf32>
    %70 = arith.addf %65, %69 : vector<16x256xf32>
    %c96 = arith.constant 96 : index
    %c0_70 = arith.constant 0 : index
    %71 = vector.load %arg12[%c96, %c0_70] : memref<400x32xbf16, #tpu.memory_space<vmem>>, vector<16x32xbf16>
    %c6 = arith.constant 6 : index
    %c0_71 = arith.constant 0 : index
    %c0_72 = arith.constant 0 : index
    %72 = vector.load %arg6[%c6, %c0_71, %c0_72] : memref<25x32x256xbf16, #tpu.memory_space<vmem>>, vector<1x32x256xbf16>
    %73 = vector.shape_cast %72 : vector<1x32x256xbf16> to vector<32x256xbf16>
    %cst_73 = arith.constant dense<0.000000e+00> : vector<16x256xf32>
    %74 = tpu.matmul %71, %73, %cst_73 {dimension_numbers = #tpu.dot_dimension_numbers<[1], [0], [0], [1], [0, 0, 1, 1], [], []>} : vector<16x32xbf16>, vector<32x256xbf16>, vector<16x256xf32> -> vector<16x256xf32>
    %75 = arith.addf %70, %74 : vector<16x256xf32>
    %c112 = arith.constant 112 : index
    %c0_74 = arith.constant 0 : index
    %76 = vector.load %arg12[%c112, %c0_74] : memref<400x32xbf16, #tpu.memory_space<vmem>>, vector<16x32xbf16>
    %c7 = arith.constant 7 : index
    %c0_75 = arith.constant 0 : index
    %c0_76 = arith.constant 0 : index
    %77 = vector.load %arg6[%c7, %c0_75, %c0_76] : memref<25x32x256xbf16, #tpu.memory_space<vmem>>, vector<1x32x256xbf16>
    %78 = vector.shape_cast %77 : vector<1x32x256xbf16> to vector<32x256xbf16>
    %cst_77 = arith.constant dense<0.000000e+00> : vector<16x256xf32>
    %79 = tpu.matmul %76, %78, %cst_77 {dimension_numbers = #tpu.dot_dimension_numbers<[1], [0], [0], [1], [0, 0, 1, 1], [], []>} : vector<16x32xbf16>, vector<32x256xbf16>, vector<16x256xf32> -> vector<16x256xf32>
    %80 = arith.addf %75, %79 : vector<16x256xf32>
    %c128 = arith.constant 128 : index
    %c0_78 = arith.constant 0 : index
    %81 = vector.load %arg12[%c128, %c0_78] : memref<400x32xbf16, #tpu.memory_space<vmem>>, vector<16x32xbf16>
    %c8 = arith.constant 8 : index
    %c0_79 = arith.constant 0 : index
    %c0_80 = arith.constant 0 : index
    %82 = vector.load %arg6[%c8, %c0_79, %c0_80] : memref<25x32x256xbf16, #tpu.memory_space<vmem>>, vector<1x32x256xbf16>
    %83 = vector.shape_cast %82 : vector<1x32x256xbf16> to vector<32x256xbf16>
    %cst_81 = arith.constant dense<0.000000e+00> : vector<16x256xf32>
    %84 = tpu.matmul %81, %83, %cst_81 {dimension_numbers = #tpu.dot_dimension_numbers<[1], [0], [0], [1], [0, 0, 1, 1], [], []>} : vector<16x32xbf16>, vector<32x256xbf16>, vector<16x256xf32> -> vector<16x256xf32>
    %85 = arith.addf %80, %84 : vector<16x256xf32>
    %c144 = arith.constant 144 : index
    %c0_82 = arith.constant 0 : index
    %86 = vector.load %arg12[%c144, %c0_82] : memref<400x32xbf16, #tpu.memory_space<vmem>>, vector<16x32xbf16>
    %c9 = arith.constant 9 : index
    %c0_83 = arith.constant 0 : index
    %c0_84 = arith.constant 0 : index
    %87 = vector.load %arg6[%c9, %c0_83, %c0_84] : memref<25x32x256xbf16, #tpu.memory_space<vmem>>, vector<1x32x256xbf16>
    %88 = vector.shape_cast %87 : vector<1x32x256xbf16> to vector<32x256xbf16>
    %cst_85 = arith.constant dense<0.000000e+00> : vector<16x256xf32>
    %89 = tpu.matmul %86, %88, %cst_85 {dimension_numbers = #tpu.dot_dimension_numbers<[1], [0], [0], [1], [0, 0, 1, 1], [], []>} : vector<16x32xbf16>, vector<32x256xbf16>, vector<16x256xf32> -> vector<16x256xf32>
    %90 = arith.addf %85, %89 : vector<16x256xf32>
    %c160 = arith.constant 160 : index
    %c0_86 = arith.constant 0 : index
    %91 = vector.load %arg12[%c160, %c0_86] : memref<400x32xbf16, #tpu.memory_space<vmem>>, vector<16x32xbf16>
    %c10 = arith.constant 10 : index
    %c0_87 = arith.constant 0 : index
    %c0_88 = arith.constant 0 : index
    %92 = vector.load %arg6[%c10, %c0_87, %c0_88] : memref<25x32x256xbf16, #tpu.memory_space<vmem>>, vector<1x32x256xbf16>
    %93 = vector.shape_cast %92 : vector<1x32x256xbf16> to vector<32x256xbf16>
    %cst_89 = arith.constant dense<0.000000e+00> : vector<16x256xf32>
    %94 = tpu.matmul %91, %93, %cst_89 {dimension_numbers = #tpu.dot_dimension_numbers<[1], [0], [0], [1], [0, 0, 1, 1], [], []>} : vector<16x32xbf16>, vector<32x256xbf16>, vector<16x256xf32> -> vector<16x256xf32>
    %95 = arith.addf %90, %94 : vector<16x256xf32>
    %c176 = arith.constant 176 : index
    %c0_90 = arith.constant 0 : index
    %96 = vector.load %arg12[%c176, %c0_90] : memref<400x32xbf16, #tpu.memory_space<vmem>>, vector<16x32xbf16>
    %c11 = arith.constant 11 : index
    %c0_91 = arith.constant 0 : index
    %c0_92 = arith.constant 0 : index
    %97 = vector.load %arg6[%c11, %c0_91, %c0_92] : memref<25x32x256xbf16, #tpu.memory_space<vmem>>, vector<1x32x256xbf16>
    %98 = vector.shape_cast %97 : vector<1x32x256xbf16> to vector<32x256xbf16>
    %cst_93 = arith.constant dense<0.000000e+00> : vector<16x256xf32>
    %99 = tpu.matmul %96, %98, %cst_93 {dimension_numbers = #tpu.dot_dimension_numbers<[1], [0], [0], [1], [0, 0, 1, 1], [], []>} : vector<16x32xbf16>, vector<32x256xbf16>, vector<16x256xf32> -> vector<16x256xf32>
    %100 = arith.addf %95, %99 : vector<16x256xf32>
    %c192 = arith.constant 192 : index
    %c0_94 = arith.constant 0 : index
    %101 = vector.load %arg12[%c192, %c0_94] : memref<400x32xbf16, #tpu.memory_space<vmem>>, vector<16x32xbf16>
    %c12 = arith.constant 12 : index
    %c0_95 = arith.constant 0 : index
    %c0_96 = arith.constant 0 : index
    %102 = vector.load %arg6[%c12, %c0_95, %c0_96] : memref<25x32x256xbf16, #tpu.memory_space<vmem>>, vector<1x32x256xbf16>
    %103 = vector.shape_cast %102 : vector<1x32x256xbf16> to vector<32x256xbf16>
    %cst_97 = arith.constant dense<0.000000e+00> : vector<16x256xf32>
    %104 = tpu.matmul %101, %103, %cst_97 {dimension_numbers = #tpu.dot_dimension_numbers<[1], [0], [0], [1], [0, 0, 1, 1], [], []>} : vector<16x32xbf16>, vector<32x256xbf16>, vector<16x256xf32> -> vector<16x256xf32>
    %105 = arith.addf %100, %104 : vector<16x256xf32>
    %c208 = arith.constant 208 : index
    %c0_98 = arith.constant 0 : index
    %106 = vector.load %arg12[%c208, %c0_98] : memref<400x32xbf16, #tpu.memory_space<vmem>>, vector<16x32xbf16>
    %c13 = arith.constant 13 : index
    %c0_99 = arith.constant 0 : index
    %c0_100 = arith.constant 0 : index
    %107 = vector.load %arg6[%c13, %c0_99, %c0_100] : memref<25x32x256xbf16, #tpu.memory_space<vmem>>, vector<1x32x256xbf16>
    %108 = vector.shape_cast %107 : vector<1x32x256xbf16> to vector<32x256xbf16>
    %cst_101 = arith.constant dense<0.000000e+00> : vector<16x256xf32>
    %109 = tpu.matmul %106, %108, %cst_101 {dimension_numbers = #tpu.dot_dimension_numbers<[1], [0], [0], [1], [0, 0, 1, 1], [], []>} : vector<16x32xbf16>, vector<32x256xbf16>, vector<16x256xf32> -> vector<16x256xf32>
    %110 = arith.addf %105, %109 : vector<16x256xf32>
    %c224 = arith.constant 224 : index
    %c0_102 = arith.constant 0 : index
    %111 = vector.load %arg12[%c224, %c0_102] : memref<400x32xbf16, #tpu.memory_space<vmem>>, vector<16x32xbf16>
    %c14 = arith.constant 14 : index
    %c0_103 = arith.constant 0 : index
    %c0_104 = arith.constant 0 : index
    %112 = vector.load %arg6[%c14, %c0_103, %c0_104] : memref<25x32x256xbf16, #tpu.memory_space<vmem>>, vector<1x32x256xbf16>
    %113 = vector.shape_cast %112 : vector<1x32x256xbf16> to vector<32x256xbf16>
    %cst_105 = arith.constant dense<0.000000e+00> : vector<16x256xf32>
    %114 = tpu.matmul %111, %113, %cst_105 {dimension_numbers = #tpu.dot_dimension_numbers<[1], [0], [0], [1], [0, 0, 1, 1], [], []>} : vector<16x32xbf16>, vector<32x256xbf16>, vector<16x256xf32> -> vector<16x256xf32>
    %115 = arith.addf %110, %114 : vector<16x256xf32>
    %c240 = arith.constant 240 : index
    %c0_106 = arith.constant 0 : index
    %116 = vector.load %arg12[%c240, %c0_106] : memref<400x32xbf16, #tpu.memory_space<vmem>>, vector<16x32xbf16>
    %c15 = arith.constant 15 : index
    %c0_107 = arith.constant 0 : index
    %c0_108 = arith.constant 0 : index
    %117 = vector.load %arg6[%c15, %c0_107, %c0_108] : memref<25x32x256xbf16, #tpu.memory_space<vmem>>, vector<1x32x256xbf16>
    %118 = vector.shape_cast %117 : vector<1x32x256xbf16> to vector<32x256xbf16>
    %cst_109 = arith.constant dense<0.000000e+00> : vector<16x256xf32>
    %119 = tpu.matmul %116, %118, %cst_109 {dimension_numbers = #tpu.dot_dimension_numbers<[1], [0], [0], [1], [0, 0, 1, 1], [], []>} : vector<16x32xbf16>, vector<32x256xbf16>, vector<16x256xf32> -> vector<16x256xf32>
    %120 = arith.addf %115, %119 : vector<16x256xf32>
    %c256 = arith.constant 256 : index
    %c0_110 = arith.constant 0 : index
    %121 = vector.load %arg12[%c256, %c0_110] : memref<400x32xbf16, #tpu.memory_space<vmem>>, vector<16x32xbf16>
    %c16_111 = arith.constant 16 : index
    %c0_112 = arith.constant 0 : index
    %c0_113 = arith.constant 0 : index
    %122 = vector.load %arg6[%c16_111, %c0_112, %c0_113] : memref<25x32x256xbf16, #tpu.memory_space<vmem>>, vector<1x32x256xbf16>
    %123 = vector.shape_cast %122 : vector<1x32x256xbf16> to vector<32x256xbf16>
    %cst_114 = arith.constant dense<0.000000e+00> : vector<16x256xf32>
    %124 = tpu.matmul %121, %123, %cst_114 {dimension_numbers = #tpu.dot_dimension_numbers<[1], [0], [0], [1], [0, 0, 1, 1], [], []>} : vector<16x32xbf16>, vector<32x256xbf16>, vector<16x256xf32> -> vector<16x256xf32>
    %125 = arith.addf %120, %124 : vector<16x256xf32>
    %c272 = arith.constant 272 : index
    %c0_115 = arith.constant 0 : index
    %126 = vector.load %arg12[%c272, %c0_115] : memref<400x32xbf16, #tpu.memory_space<vmem>>, vector<16x32xbf16>
    %c17 = arith.constant 17 : index
    %c0_116 = arith.constant 0 : index
    %c0_117 = arith.constant 0 : index
    %127 = vector.load %arg6[%c17, %c0_116, %c0_117] : memref<25x32x256xbf16, #tpu.memory_space<vmem>>, vector<1x32x256xbf16>
    %128 = vector.shape_cast %127 : vector<1x32x256xbf16> to vector<32x256xbf16>
    %cst_118 = arith.constant dense<0.000000e+00> : vector<16x256xf32>
    %129 = tpu.matmul %126, %128, %cst_118 {dimension_numbers = #tpu.dot_dimension_numbers<[1], [0], [0], [1], [0, 0, 1, 1], [], []>} : vector<16x32xbf16>, vector<32x256xbf16>, vector<16x256xf32> -> vector<16x256xf32>
    %130 = arith.addf %125, %129 : vector<16x256xf32>
    %c288 = arith.constant 288 : index
    %c0_119 = arith.constant 0 : index
    %131 = vector.load %arg12[%c288, %c0_119] : memref<400x32xbf16, #tpu.memory_space<vmem>>, vector<16x32xbf16>
    %c18 = arith.constant 18 : index
    %c0_120 = arith.constant 0 : index
    %c0_121 = arith.constant 0 : index
    %132 = vector.load %arg6[%c18, %c0_120, %c0_121] : memref<25x32x256xbf16, #tpu.memory_space<vmem>>, vector<1x32x256xbf16>
    %133 = vector.shape_cast %132 : vector<1x32x256xbf16> to vector<32x256xbf16>
    %cst_122 = arith.constant dense<0.000000e+00> : vector<16x256xf32>
    %134 = tpu.matmul %131, %133, %cst_122 {dimension_numbers = #tpu.dot_dimension_numbers<[1], [0], [0], [1], [0, 0, 1, 1], [], []>} : vector<16x32xbf16>, vector<32x256xbf16>, vector<16x256xf32> -> vector<16x256xf32>
    %135 = arith.addf %130, %134 : vector<16x256xf32>
    %c304 = arith.constant 304 : index
    %c0_123 = arith.constant 0 : index
    %136 = vector.load %arg12[%c304, %c0_123] : memref<400x32xbf16, #tpu.memory_space<vmem>>, vector<16x32xbf16>
    %c19 = arith.constant 19 : index
    %c0_124 = arith.constant 0 : index
    %c0_125 = arith.constant 0 : index
    %137 = vector.load %arg6[%c19, %c0_124, %c0_125] : memref<25x32x256xbf16, #tpu.memory_space<vmem>>, vector<1x32x256xbf16>
    %138 = vector.shape_cast %137 : vector<1x32x256xbf16> to vector<32x256xbf16>
    %cst_126 = arith.constant dense<0.000000e+00> : vector<16x256xf32>
    %139 = tpu.matmul %136, %138, %cst_126 {dimension_numbers = #tpu.dot_dimension_numbers<[1], [0], [0], [1], [0, 0, 1, 1], [], []>} : vector<16x32xbf16>, vector<32x256xbf16>, vector<16x256xf32> -> vector<16x256xf32>
    %140 = arith.addf %135, %139 : vector<16x256xf32>
    %c320 = arith.constant 320 : index
    %c0_127 = arith.constant 0 : index
    %141 = vector.load %arg12[%c320, %c0_127] : memref<400x32xbf16, #tpu.memory_space<vmem>>, vector<16x32xbf16>
    %c20 = arith.constant 20 : index
    %c0_128 = arith.constant 0 : index
    %c0_129 = arith.constant 0 : index
    %142 = vector.load %arg6[%c20, %c0_128, %c0_129] : memref<25x32x256xbf16, #tpu.memory_space<vmem>>, vector<1x32x256xbf16>
    %143 = vector.shape_cast %142 : vector<1x32x256xbf16> to vector<32x256xbf16>
    %cst_130 = arith.constant dense<0.000000e+00> : vector<16x256xf32>
    %144 = tpu.matmul %141, %143, %cst_130 {dimension_numbers = #tpu.dot_dimension_numbers<[1], [0], [0], [1], [0, 0, 1, 1], [], []>} : vector<16x32xbf16>, vector<32x256xbf16>, vector<16x256xf32> -> vector<16x256xf32>
    %145 = arith.addf %140, %144 : vector<16x256xf32>
    %c336 = arith.constant 336 : index
    %c0_131 = arith.constant 0 : index
    %146 = vector.load %arg12[%c336, %c0_131] : memref<400x32xbf16, #tpu.memory_space<vmem>>, vector<16x32xbf16>
    %c21 = arith.constant 21 : index
    %c0_132 = arith.constant 0 : index
    %c0_133 = arith.constant 0 : index
    %147 = vector.load %arg6[%c21, %c0_132, %c0_133] : memref<25x32x256xbf16, #tpu.memory_space<vmem>>, vector<1x32x256xbf16>
    %148 = vector.shape_cast %147 : vector<1x32x256xbf16> to vector<32x256xbf16>
    %cst_134 = arith.constant dense<0.000000e+00> : vector<16x256xf32>
    %149 = tpu.matmul %146, %148, %cst_134 {dimension_numbers = #tpu.dot_dimension_numbers<[1], [0], [0], [1], [0, 0, 1, 1], [], []>} : vector<16x32xbf16>, vector<32x256xbf16>, vector<16x256xf32> -> vector<16x256xf32>
    %150 = arith.addf %145, %149 : vector<16x256xf32>
    %c352 = arith.constant 352 : index
    %c0_135 = arith.constant 0 : index
    %151 = vector.load %arg12[%c352, %c0_135] : memref<400x32xbf16, #tpu.memory_space<vmem>>, vector<16x32xbf16>
    %c22 = arith.constant 22 : index
    %c0_136 = arith.constant 0 : index
    %c0_137 = arith.constant 0 : index
    %152 = vector.load %arg6[%c22, %c0_136, %c0_137] : memref<25x32x256xbf16, #tpu.memory_space<vmem>>, vector<1x32x256xbf16>
    %153 = vector.shape_cast %152 : vector<1x32x256xbf16> to vector<32x256xbf16>
    %cst_138 = arith.constant dense<0.000000e+00> : vector<16x256xf32>
    %154 = tpu.matmul %151, %153, %cst_138 {dimension_numbers = #tpu.dot_dimension_numbers<[1], [0], [0], [1], [0, 0, 1, 1], [], []>} : vector<16x32xbf16>, vector<32x256xbf16>, vector<16x256xf32> -> vector<16x256xf32>
    %155 = arith.addf %150, %154 : vector<16x256xf32>
    %c368 = arith.constant 368 : index
    %c0_139 = arith.constant 0 : index
    %156 = vector.load %arg12[%c368, %c0_139] : memref<400x32xbf16, #tpu.memory_space<vmem>>, vector<16x32xbf16>
    %c23 = arith.constant 23 : index
    %c0_140 = arith.constant 0 : index
    %c0_141 = arith.constant 0 : index
    %157 = vector.load %arg6[%c23, %c0_140, %c0_141] : memref<25x32x256xbf16, #tpu.memory_space<vmem>>, vector<1x32x256xbf16>
    %158 = vector.shape_cast %157 : vector<1x32x256xbf16> to vector<32x256xbf16>
    %cst_142 = arith.constant dense<0.000000e+00> : vector<16x256xf32>
    %159 = tpu.matmul %156, %158, %cst_142 {dimension_numbers = #tpu.dot_dimension_numbers<[1], [0], [0], [1], [0, 0, 1, 1], [], []>} : vector<16x32xbf16>, vector<32x256xbf16>, vector<16x256xf32> -> vector<16x256xf32>
    %160 = arith.addf %155, %159 : vector<16x256xf32>
    %c384 = arith.constant 384 : index
    %c0_143 = arith.constant 0 : index
    %161 = vector.load %arg12[%c384, %c0_143] : memref<400x32xbf16, #tpu.memory_space<vmem>>, vector<16x32xbf16>
    %c24 = arith.constant 24 : index
    %c0_144 = arith.constant 0 : index
    %c0_145 = arith.constant 0 : index
    %162 = vector.load %arg6[%c24, %c0_144, %c0_145] : memref<25x32x256xbf16, #tpu.memory_space<vmem>>, vector<1x32x256xbf16>
    %163 = vector.shape_cast %162 : vector<1x32x256xbf16> to vector<32x256xbf16>
    %cst_146 = arith.constant dense<0.000000e+00> : vector<16x256xf32>
    %164 = tpu.matmul %161, %163, %cst_146 {dimension_numbers = #tpu.dot_dimension_numbers<[1], [0], [0], [1], [0, 0, 1, 1], [], []>} : vector<16x32xbf16>, vector<32x256xbf16>, vector<16x256xf32> -> vector<16x256xf32>
    %165 = arith.addf %160, %164 : vector<16x256xf32>
    %c0_147 = arith.constant 0 : index
    %c0_148 = arith.constant 0 : index
    %166 = vector.load %arg7[%c0_147, %c0_148] : memref<1x256xf32, #tpu.memory_space<vmem>>, vector<1x256xf32>
    %167 = vector.broadcast %166 : vector<1x256xf32> to vector<16x256xf32>
    %168 = arith.addf %165, %167 : vector<16x256xf32>
    %cst_149 = arith.constant 0.000000e+00 : f32
    %169 = vector.broadcast %cst_149 : f32 to vector<16x256xf32>
    %170 = arith.maximumf %168, %169 : vector<16x256xf32>
    %171 = arith.truncf %170 : vector<16x256xf32> to vector<16x256xbf16>
    %c0_150 = arith.constant 0 : index
    %c0_151 = arith.constant 0 : index
    %172 = vector.load %arg8[%c0_150, %c0_151] : memref<256x4xbf16, #tpu.memory_space<vmem>>, vector<256x4xbf16>
    %cst_152 = arith.constant dense<0.000000e+00> : vector<16x4xf32>
    %173 = tpu.matmul %171, %172, %cst_152 {dimension_numbers = #tpu.dot_dimension_numbers<[1], [0], [0], [1], [0, 0, 1, 1], [], []>} : vector<16x256xbf16>, vector<256x4xbf16>, vector<16x4xf32> -> vector<16x4xf32>
    %c0_153 = arith.constant 0 : index
    %c0_154 = arith.constant 0 : index
    %174 = vector.load %arg9[%c0_153, %c0_154] : memref<1x4xf32, #tpu.memory_space<vmem>>, vector<1x4xf32>
    %175 = vector.broadcast %174 : vector<1x4xf32> to vector<16x4xf32>
    %176 = arith.addf %173, %175 : vector<16x4xf32>
    %cst_155 = arith.constant dense<0xFF800000> : vector<16xf32>
    %177 = vector.multi_reduction <maximumf>, %176, %cst_155 [1] : vector<16x4xf32> to vector<16xf32>
    %178 = vector.shape_cast %177 : vector<16xf32> to vector<16x1xf32>
    %179 = vector.broadcast %178 : vector<16x1xf32> to vector<16x4xf32>
    %180 = arith.subf %176, %179 : vector<16x4xf32>
    %181 = math.exp %180 : vector<16x4xf32>
    %cst_156 = arith.constant dense<0.000000e+00> : vector<16xf32>
    %182 = vector.multi_reduction <add>, %181, %cst_156 [1] : vector<16x4xf32> to vector<16xf32>
    %183 = vector.shape_cast %182 : vector<16xf32> to vector<16x1xf32>
    %184 = tpu.reciprocal %183 {approx = true} : vector<16x1xf32> -> vector<16x1xf32>
    %185 = vector.broadcast %184 : vector<16x1xf32> to vector<16x4xf32>
    %186 = arith.mulf %181, %185 : vector<16x4xf32>
    %c0_157 = arith.constant 0 : index
    %c0_158 = arith.constant 0 : index
    %187 = vector.load %arg10[%c0_157, %c0_158] : memref<16x4xf32, #tpu.memory_space<vmem>>, vector<16x4xf32>
    tpu.vector_store %arg10[%c0_157, %c0_158], %186 {strides = array<i32>} : memref<16x4xf32, #tpu.memory_space<vmem>>, vector<16x4xf32>,
    return
  }
  func.func @transform_0(%arg0: i32) -> (i32, i32) {
    %c0_i32 = arith.constant 0 : i32
    %c0_i32_0 = arith.constant 0 : i32
    return %arg0, %c0_i32 : i32, i32
  }
  func.func @transform_1(%arg0: i32) -> (i32, i32, i32) {
    %c0_i32 = arith.constant 0 : i32
    %c0_i32_0 = arith.constant 0 : i32
    %c0_i32_1 = arith.constant 0 : i32
    %c0_i32_2 = arith.constant 0 : i32
    return %c0_i32, %c0_i32_0, %c0_i32_1 : i32, i32, i32
  }
  func.func @transform_2(%arg0: i32) -> (i32, i32) {
    %c0_i32 = arith.constant 0 : i32
    %c0_i32_0 = arith.constant 0 : i32
    %c0_i32_1 = arith.constant 0 : i32
    return %c0_i32, %c0_i32_0 : i32, i32
  }
  func.func @transform_3(%arg0: i32) -> (i32, i32, i32) {
    %c0_i32 = arith.constant 0 : i32
    %c0_i32_0 = arith.constant 0 : i32
    %c0_i32_1 = arith.constant 0 : i32
    %c0_i32_2 = arith.constant 0 : i32
    return %c0_i32, %c0_i32_0, %c0_i32_1 : i32, i32, i32
  }
  func.func @transform_4(%arg0: i32) -> (i32, i32) {
    %c0_i32 = arith.constant 0 : i32
    %c0_i32_0 = arith.constant 0 : i32
    %c0_i32_1 = arith.constant 0 : i32
    return %c0_i32, %c0_i32_0 : i32, i32
  }
  func.func @transform_5(%arg0: i32) -> (i32, i32, i32) {
    %c0_i32 = arith.constant 0 : i32
    %c0_i32_0 = arith.constant 0 : i32
    %c0_i32_1 = arith.constant 0 : i32
    %c0_i32_2 = arith.constant 0 : i32
    return %c0_i32, %c0_i32_0, %c0_i32_1 : i32, i32, i32
  }
  func.func @transform_6(%arg0: i32) -> (i32, i32) {
    %c0_i32 = arith.constant 0 : i32
    %c0_i32_0 = arith.constant 0 : i32
    %c0_i32_1 = arith.constant 0 : i32
    return %c0_i32, %c0_i32_0 : i32, i32
  }
  func.func @transform_7(%arg0: i32) -> (i32, i32) {
    %c0_i32 = arith.constant 0 : i32
    %c0_i32_0 = arith.constant 0 : i32
    %c0_i32_1 = arith.constant 0 : i32
    return %c0_i32, %c0_i32_0 : i32, i32
  }
  func.func @transform_8(%arg0: i32) -> (i32, i32) {
    %c0_i32 = arith.constant 0 : i32
    %c0_i32_0 = arith.constant 0 : i32
    %c0_i32_1 = arith.constant 0 : i32
    return %c0_i32, %c0_i32_0 : i32, i32
  }
  func.func @transform_9(%arg0: i32) -> (i32, i32) {
    %c0_i32 = arith.constant 0 : i32
    %c0_i32_0 = arith.constant 0 : i32
    return %arg0, %c0_i32 : i32, i32
  }
}

</mosaic_0001>

<bundles_post_ra>
// kernel: net_forward.1
= control target key start
LH: loop header
LB: loop body
LE: loop exit
PB: predicated region body
PF: predicated region fallthrough
CT: control target
= control target key end

     0   :  { %v12745_v1 = vmov 0   ;;  %vm5630_vm0 = vcmask 261120   ;;  %vm7745_vm1 = vcmask 31744   ;;  %s12735_s1 = inlined_call_operand.vmem [shape: bf16[3,384,256], index: 1, kind: input, shape index: {}]   ;;  %s12736_s0 = inlined_call_operand.vmem [shape: bf16[464,384], index: 0, kind: input, shape index: {}]   ;;  %s12737_s3 = inlined_call_operand.vmem [shape: bf16[3,256,32], index: 3, kind: input, shape index: {}]   ;;  %s12738_s2 = inlined_call_operand.vmem [shape: f32[1,256], index: 2, kind: input, shape index: {}]   ;;  %s12739_s5 = inlined_call_operand.vmem [shape: bf16[25,32,256], index: 5, kind: input, shape index: {}]   ;;  %s12740_s4 = inlined_call_operand.vmem [shape: f32[1,32], index: 4, kind: input, shape index: {}]   ;;  %s12741_s7 = inlined_call_operand.vmem [shape: bf16[256,4], index: 7, kind: input, shape index: {}]   ;;  %s12742_s6 = inlined_call_operand.vmem [shape: f32[1,256], index: 6, kind: input, shape index: {}]   ;;  %s12743_s8 = inlined_call_operand.vmem [shape: f32[1,4], index: 8, kind: input, shape index: {}]   ;;  %s12744_s9 = inlined_call_operand.vmem [shape: f32[16,4], index: 9, kind: output, shape index: {}]  }
   0x1   :  { %v9189_v0 = vld [vmem:[%s12735_s1 + $0x284] ss:$8 sps:$4 sm:$0xff]   ;;  %1249 = vmatprep.mubr.bf16.mxu0 %v12745_v1  ;;  %v9191_v2 = vld [vmem:[%s12735_s1 + $0x280] ss:$8 sps:$4 sm:$0xff]   ;;  %v9192_v3 = vld [vmem:[%s12735_s1 + $0x294] ss:$8 sps:$4 sm:$0xff]  }
   0x2   :  { %1217 = vmatprep.subr.bf16.mxu0 %v9189_v0  ;;  %v9194_v4 = vld [vmem:[%s12735_s1 + $0x290] ss:$8 sps:$4 sm:$0xff]   ;;  %v9195_v5 = vld [vmem:[%s12735_s1 + $0x2a4] ss:$8 sps:$4 sm:$0xff]   ;;  %v9197_v6 = vld [vmem:[%s12735_s1 + $0x2a0] ss:$8 sps:$4 sm:$0xff]  }
   0x3   :  { %1218 = vmatpush1.bf16.msra.mxu0 %v9191_v2  ;;  %v9198_v7 = vld [vmem:[%s12735_s1 + $0x2b4] ss:$8 sps:$4 sm:$0xff]   ;;  %v9200_v8 = vld [vmem:[%s12735_s1 + $0x2b0] ss:$8 sps:$4 sm:$0xff]   ;;  %v9201_v9 = vld [vmem:[%s12735_s1 + $0x2c4] ss:$8 sps:$4 sm:$0xff]  }
   0x4   :  { %1219 = vmatprep.subr.bf16.mxu0 %v9192_v3  ;;  %v9203_v10 = vld [vmem:[%s12735_s1 + $0x2c0] ss:$8 sps:$4 sm:$0xff]   ;;  %v9204_v11 = vld [vmem:[%s12735_s1 + $0x2d4] ss:$8 sps:$4 sm:$0xff]   ;;  %v9206_v12 = vld [vmem:[%s12735_s1 + $0x2d0] ss:$8 sps:$4 sm:$0xff]  }
   0x5   :  { %v9207_v13 = vld [vmem:[%s12735_s1 + $0x2e4] ss:$8 sps:$4 sm:$0xff]   ;;  %v9209_v14 = vld [vmem:[%s12735_s1 + $0x2e0] ss:$8 sps:$4 sm:$0xff]   ;;  %v9210_v15 = vld [vmem:[%s12735_s1 + $0x2f4] ss:$8 sps:$4 sm:$0xff]  }
   0x6   :  { %v9212_v16 = vld [vmem:[%s12735_s1 + $0x2f0] ss:$8 sps:$4 sm:$0xff]   ;;  %v9216_v17 = vld [vmem:[%s12735_s1 + $0x4] ss:$8 sps:$4 sm:$0xff]   ;;  %v9214_v19 = vld [vmem:[%s12735_s1] ss:$8 sps:$4 sm:$0xff]  }
   0x7   :  { %1220 = vmatpush1.bf16.msra.mxu0 %v9194_v4  ;;  %v9213_v18 = vld [vmem:[%s12736_s0 + $0x20] ss:$12 sps:$4 sm:$0xff]   ;;  %v9220_v20 = vld [vmem:[%s12735_s1 + $0x14] ss:$8 sps:$4 sm:$0xff]   ;;  %v9218_v21 = vld [vmem:[%s12735_s1 + $0x10] ss:$8 sps:$4 sm:$0xff]  }
   0x8   :  { %1221 = vmatprep.subr.bf16.mxu0 %v9195_v5  ;;  %v9225_v22 = vld [vmem:[%s12735_s1 + $0x24] ss:$8 sps:$4 sm:$0xff]   ;;  %v9223_v24 = vld [vmem:[%s12735_s1 + $0x20] ss:$8 sps:$4 sm:$0xff]   ;;  %v9230_v25 = vld [vmem:[%s12735_s1 + $0x34] ss:$8 sps:$4 sm:$0xff]  }
   0x9   :  { %v9217_v23 = vld [vmem:[%s12736_s0 + $0x38] ss:$12 sps:$4 sm:$0xff]   ;;  %v9221_v27 = vld [vmem:[%s12736_s0 + $0x50] ss:$12 sps:$4 sm:$0xff]   ;;  %v9232_v29 = vld [vmem:[%s12735_s1 + $0x40] ss:$8 sps:$4 sm:$0xff]  }
   0xa   :  { %v9228_v26 = vld [vmem:[%s12735_s1 + $0x30] ss:$8 sps:$4 sm:$0xff]   ;;  %v9234_v28 = vld [vmem:[%s12735_s1 + $0x44] ss:$8 sps:$4 sm:$0xff]   ;;  %v9239_v30 = vld [vmem:[%s12735_s1 + $0x54] ss:$8 sps:$4 sm:$0xff]  }
   0xb   :  { %1222 = vmatpush1.bf16.msra.mxu0 %v9197_v6  ;;  %v9237_v31 = vld [vmem:[%s12735_s1 + $0x50] ss:$8 sps:$4 sm:$0xff]   ;;  %v9244_v32 = vld [vmem:[%s12735_s1 + $0x64] ss:$8 sps:$4 sm:$0xff]   ;;  %v9222_v33 = vld [vmem:[%s12736_s0 + $0x68] ss:$12 sps:$4 sm:$0xff]  }
   0xc   :  { %1223 = vmatprep.subr.bf16.mxu0 %v9198_v7  ;;  %v9242_v34 = vld [vmem:[%s12735_s1 + $0x60] ss:$8 sps:$4 sm:$0xff]   ;;  %v9248_v35 = vld [vmem:[%s12735_s1 + $0x74] ss:$8 sps:$4 sm:$0xff]   ;;  %v9246_v36 = vld [vmem:[%s12735_s1 + $0x70] ss:$8 sps:$4 sm:$0xff]  }
   0xd   :  { %v9253_v37 = vld [vmem:[%s12735_s1 + $0x84] ss:$8 sps:$4 sm:$0xff]   ;;  %v9251_v39 = vld [vmem:[%s12735_s1 + $0x80] ss:$8 sps:$4 sm:$0xff]   ;;  %v9258_v40 = vld [vmem:[%s12735_s1 + $0x94] ss:$8 sps:$4 sm:$0xff]  }
   0xe   :  { %v9943_v38 = vld [vmem:[%s12736_s0 + $0x80] ss:$12 sps:$4 sm:$0xff]   ;;  %v9256_v41 = vld [vmem:[%s12735_s1 + $0x90] ss:$8 sps:$4 sm:$0xff]   ;;  %v9267_v45 = vld [vmem:[%s12735_s1 + $0xb4] ss:$8 sps:$4 sm:$0xff]  }
   0xf   :  { %1224 = vmatpush1.bf16.msra.mxu0 %v9200_v8  ;;  %v9262_v42 = vld [vmem:[%s12735_s1 + $0xa4] ss:$8 sps:$4 sm:$0xff]   ;;  %v9260_v44 = vld [vmem:[%s12735_s1 + $0xa0] ss:$8 sps:$4 sm:$0xff]   ;;  %v9265_v46 = vld [vmem:[%s12735_s1 + $0xb0] ss:$8 sps:$4 sm:$0xff]  }
  0x10   :  { %1225 = vmatprep.subr.bf16.mxu0 %v9201_v9  ;;  %v9962_v43 = vld [vmem:[%s12736_s0 + $0x98] ss:$12 sps:$4 sm:$0xff]   ;;  %v9981_v48 = vld [vmem:[%s12736_s0 + $0xb0] ss:$12 sps:$4 sm:$0xff]   ;;  %v9270_v49 = vld [vmem:[%s12735_s1 + $0xc0] ss:$8 sps:$4 sm:$0xff]  }
  0x11   :  { %v9272_v47 = vld [vmem:[%s12735_s1 + $0xc4] ss:$8 sps:$4 sm:$0xff]   ;;  %v9277_v50 = vld [vmem:[%s12735_s1 + $0xd4] ss:$8 sps:$4 sm:$0xff]   ;;  %v9275_v51 = vld [vmem:[%s12735_s1 + $0xd0] ss:$8 sps:$4 sm:$0xff]  }
  0x12   :  { %v9997_v52 = vld [vmem:[%s12736_s0 + $0xc8] ss:$12 sps:$4 sm:$0xff]   ;;  %v9281_v54 = vld [vmem:[%s12735_s1 + $0xe4] ss:$8 sps:$4 sm:$0xff]   ;;  %v9284_v57 = vld [vmem:[%s12735_s1 + $0xf0] ss:$8 sps:$4 sm:$0xff]  }
  0x13   :  { %1226 = vmatpush1.bf16.msra.mxu0 %v9203_v10  ;;  %v9279_v53 = vld [vmem:[%s12735_s1 + $0xe0] ss:$8 sps:$4 sm:$0xff]   ;;  %v10017_v56 = vld [vmem:[%s12736_s0 + $0xf8] ss:$12 sps:$4 sm:$0xff]   ;;  %v9286_v58 = vld [vmem:[%s12735_s1 + $0xf4] ss:$8 sps:$4 sm:$0xff]  }
  0x14   :  { %1227 = vmatprep.subr.bf16.mxu0 %v9204_v11  ;;  %v10010_v55 = vld [vmem:[%s12736_s0 + $0xe0] ss:$12 sps:$4 sm:$0xff]   ;;  %v10030_v59 = vld [vmem:[%s12736_s0 + $0x110] ss:$12 sps:$4 sm:$0xff]   ;;  %v10037_v60 = vld [vmem:[%s12736_s0 + $0x128] ss:$12 sps:$4 sm:$0xff]  }
  0x15   :  { %v9293_v61 = vld [vmem:[%s12735_s1 + $0x104] ss:$8 sps:$4 sm:$0xff]   ;;  %v9294_v62 = vld [vmem:[%s12736_s0 + $0x1c] ss:$12 sps:$4 sm:$0xff]  }
  0x16   :  { %v10050_v63 = vld [vmem:[%s12736_s0 + $0x140] ss:$12 sps:$4 sm:$0xff]   ;;  %946 = vmatprep.mubr.bf16.mxu1 %v9294_v62  ;;  %v10057_v0 = vld [vmem:[%s12736_s0 + $0x158] ss:$12 sps:$4 sm:$0xff]   ;;  %v10064_v2 = vld [vmem:[%s12736_s0 + $0x170] ss:$12 sps:$4 sm:$0xff]  }
  0x17   :  { %1228 = vmatpush1.bf16.msra.mxu0 %v9206_v12  ;;  %v10071_v3 = vld [vmem:[%s12736_s0 + $0x188] ss:$12 sps:$4 sm:$0xff]   ;;  %v10078_v4 = vld [vmem:[%s12736_s0 + $0x1a0] ss:$12 sps:$4 sm:$0xff]   ;;  %v10085_v5 = vld [vmem:[%s12736_s0 + $0x1b8] ss:$12 sps:$4 sm:$0xff]  }
  0x18   :  { %1229 = vmatprep.subr.bf16.mxu0 %v9207_v13  ;;  %v10092_v6 = vld [vmem:[%s12736_s0 + $0x1d0] ss:$12 sps:$4 sm:$0xff]   ;;  %v10099_v7 = vld [vmem:[%s12736_s0 + $0x1e8] ss:$12 sps:$4 sm:$0xff]   ;;  %v10106_v8 = vld [vmem:[%s12736_s0 + $0x200] ss:$12 sps:$4 sm:$0xff]  }
  0x19   :  { %v10113_v9 = vld [vmem:[%s12736_s0 + $0x218] ss:$12 sps:$4 sm:$0xff]   ;;  %v10120_v10 = vld [vmem:[%s12736_s0 + $0x230] ss:$12 sps:$4 sm:$0xff]   ;;  %v10127_v11 = vld [vmem:[%s12736_s0 + $0x248] ss:$12 sps:$4 sm:$0xff]  }
  0x1a   :  { %v10134_v12 = vld [vmem:[%s12736_s0 + $0x260] ss:$12 sps:$4 sm:$0xff]   ;;  %v10141_v13 = vld [vmem:[%s12736_s0 + $0x278] ss:$12 sps:$4 sm:$0xff]  }
  0x1b   :  { %1230 = vmatpush1.bf16.msra.mxu0 %v9209_v14  ;;  %v9287_v14 = vld [vmem:[%s12736_s0 + $0x290] ss:$12 sps:$4 sm:$0xff]  }
  0x1c   :  { %1231 = vmatprep.subr.bf16.mxu0 %v9210_v15  ;;  %v9290_v15 = vld [vmem:[%s12736_s0 + $0x4] ss:$12 sps:$4 sm:$0xff]  }
  0x1f   :  { %1232 = vmatpush1.bf16.msra.mxu0 %v9212_v16  ;;  %v9288_v16 = vld [vmem:[%s12736_s0] ss:$12 sps:$4 sm:$0xff]  }
  0x20   :  { %1776 = vmatprep.subr.bf16.mxu0 %v9216_v17  ;;  %v9291_v17 = vld [vmem:[%s12735_s1 + $0x100] ss:$8 sps:$4 sm:$0xff]  }
  0x22   :  { %1250 = vmatmul.mubr.bf16.vlgmr.msra.gmra.mrb[0].mxu0 %v9213_v18  ;;  %v9305_v18 = vld [vmem:[%s12735_s1 + $0x114] ss:$8 sps:$4 sm:$0xff]  }
  0x23   :  { %1777 = vmatpush1.bf16.msra.mxu0 %v9214_v19  ;;  %1259 = vmatprep.mubr.bf16.mxu0 %v12745_v1  ;;  %v9303_v19 = vld [vmem:[%s12735_s1 + $0x110] ss:$8 sps:$4 sm:$0xff]  }
  0x24   :  { %1778 = vmatprep.subr.bf16.mxu0 %v9220_v20  ;;  %v9317_v20 = vld [vmem:[%s12735_s1 + $0x124] ss:$8 sps:$4 sm:$0xff]  }
  0x27   :  { %1779 = vmatpush1.bf16.msra.mxu0 %v9218_v21  ;;  %v10169_v21 = vld [vmem:[%s12736_s0 + $0x18] ss:$12 sps:$4 sm:$0xff]  }
  0x28   :  { %1780 = vmatprep.subr.bf16.mxu0 %v9225_v22  ;;  %v10174_v22 = vld [vmem:[%s12736_s0 + $0x34] ss:$12 sps:$4 sm:$0xff]  }
  0x2a   :  { %1260 = vmatmul.mubr.bf16.gmra.mrb[4].mxu0 %v9217_v23  ;;  %v9315_v23 = vld [vmem:[%s12735_s1 + $0x120] ss:$8 sps:$4 sm:$0xff]  }
  0x2b   :  { %1269 = vmatprep.mubr.bf16.mxu0 %v12745_v1  ;;  %1781 = vmatpush1.bf16.msra.mxu0 %v9223_v24  ;;  %v9332_v24 = vld [vmem:[%s12735_s1 + $0x134] ss:$8 sps:$4 sm:$0xff]  }
  0x2c   :  { %1782 = vmatprep.subr.bf16.mxu0 %v9230_v25  ;;  %v9330_v25 = vld [vmem:[%s12735_s1 + $0x130] ss:$8 sps:$4 sm:$0xff]  }
  0x2f   :  { %1783 = vmatpush1.bf16.msra.mxu0 %v9228_v26  ;;  %v9344_v26 = vld [vmem:[%s12735_s1 + $0x144] ss:$8 sps:$4 sm:$0xff]  }
  0x30   :  { %1784 = vmatprep.subr.bf16.mxu0 %v9234_v28  ;;  %v10198_v28 = vld [vmem:[%s12736_s0 + $0x4c] ss:$12 sps:$4 sm:$0xff]  }
  0x32   :  { %1270 = vmatmul.mubr.bf16.gmra.mrb[8].mxu0 %v9221_v27  ;;  %v10193_v27 = vld [vmem:[%s12736_s0 + $0x30] ss:$12 sps:$4 sm:$0xff]  }
  0x33   :  { %1279 = vmatprep.mubr.bf16.mxu0 %v12745_v1  ;;  %1785 = vmatpush1.bf16.msra.mxu0 %v9232_v29  ;;  %v9342_v29 = vld [vmem:[%s12735_s1 + $0x140] ss:$8 sps:$4 sm:$0xff]  }
  0x34   :  { %1786 = vmatprep.subr.bf16.mxu0 %v9239_v30  ;;  %v9358_v30 = vld [vmem:[%s12735_s1 + $0x154] ss:$8 sps:$4 sm:$0xff]  }
  0x37   :  { %1787 = vmatpush1.bf16.msra.mxu0 %v9237_v31  ;;  %v9356_v31 = vld [vmem:[%s12735_s1 + $0x150] ss:$8 sps:$4 sm:$0xff]  }
  0x38   :  { %1788 = vmatprep.subr.bf16.mxu0 %v9244_v32  ;;  %v10214_v32 = vld [vmem:[%s12736_s0 + $0x48] ss:$12 sps:$4 sm:$0xff]  }
  0x3a   :  { %1280 = vmatmul.mubr.bf16.gmra.mrb[12].mxu0 %v9222_v33  ;;  %v10219_v33 = vld [vmem:[%s12736_s0 + $0x64] ss:$12 sps:$4 sm:$0xff]  }
  0x3b   :  { %1289 = vmatprep.mubr.bf16.mxu0 %v12745_v1  ;;  %1789 = vmatpush1.bf16.msra.mxu0 %v9242_v34  ;;  %v10226_v34 = vld [vmem:[%s12736_s0 + $0x60] ss:$12 sps:$4 sm:$0xff]  }
  0x3c   :  { %1790 = vmatprep.subr.bf16.mxu0 %v9248_v35  ;;  %v10231_v35 = vld [vmem:[%s12736_s0 + $0x7c] ss:$12 sps:$4 sm:$0xff]  }
  0x3f   :  { %1791 = vmatpush1.bf16.msra.mxu0 %v9246_v36  ;;  %v9369_v36 = vld [vmem:[%s12735_s1 + $0x160] ss:$8 sps:$4 sm:$0xff]  }
  0x40   :  { %1792 = vmatprep.subr.bf16.mxu0 %v9253_v37  ;;  %v9371_v37 = vld [vmem:[%s12735_s1 + $0x164] ss:$8 sps:$4 sm:$0xff]  }
  0x42   :  { %1290 = vmatmul.mubr.bf16.gmra.mrb[16].mxu0 %v9943_v38 }
  0x43   :  { %1299 = vmatprep.mubr.bf16.mxu0 %v12745_v1  ;;  %1793 = vmatpush1.bf16.msra.mxu0 %v9251_v39  ;;  %v10244_v39 = vld [vmem:[%s12736_s0 + $0x78] ss:$12 sps:$4 sm:$0xff]  }
  0x44   :  { %1794 = vmatprep.subr.bf16.mxu0 %v9258_v40  ;;  %v10249_v40 = vld [vmem:[%s12736_s0 + $0x94] ss:$12 sps:$4 sm:$0xff]  }
  0x47   :  { %1795 = vmatpush1.bf16.msra.mxu0 %v9256_v41  ;;  %v10256_v41 = vld [vmem:[%s12736_s0 + $0x90] ss:$12 sps:$4 sm:$0xff]  }
  0x48   :  { %1796 = vmatprep.subr.bf16.mxu0 %v9262_v42  ;;  %v10261_v42 = vld [vmem:[%s12736_s0 + $0xac] ss:$12 sps:$4 sm:$0xff]  }
  0x4a   :  { %1300 = vmatmul.mubr.bf16.gmra.mrb[20].mxu0 %v9962_v43 }
  0x4b   :  { %1309 = vmatprep.mubr.bf16.mxu0 %v12745_v1  ;;  %1797 = vmatpush1.bf16.msra.mxu0 %v9260_v44  ;;  %v10268_v44 = vld [vmem:[%s12736_s0 + $0xa8] ss:$12 sps:$4 sm:$0xff]  }
  0x4c   :  { %1798 = vmatprep.subr.bf16.mxu0 %v9267_v45  ;;  %v10273_v45 = vld [vmem:[%s12736_s0 + $0xc4] ss:$12 sps:$4 sm:$0xff]  }
  0x4f   :  { %1799 = vmatpush1.bf16.msra.mxu0 %v9265_v46  ;;  %v9381_v46 = vld [vmem:[%s12735_s1 + $0x170] ss:$8 sps:$4 sm:$0xff]  }
  0x50   :  { %1800 = vmatprep.subr.bf16.mxu0 %v9272_v47  ;;  %v9383_v47 = vld [vmem:[%s12735_s1 + $0x174] ss:$8 sps:$4 sm:$0xff]  }
  0x52   :  { %1310 = vmatmul.mubr.bf16.gmra.mrb[24].mxu0 %v9981_v48 }
  0x53   :  { %1319 = vmatprep.mubr.bf16.mxu0 %v12745_v1  ;;  %1801 = vmatpush1.bf16.msra.mxu0 %v9270_v49  ;;  %v10286_v49 = vld [vmem:[%s12736_s0 + $0xc0] ss:$12 sps:$4 sm:$0xff]  }
  0x54   :  { %1802 = vmatprep.subr.bf16.mxu0 %v9277_v50  ;;  %v10291_v50 = vld [vmem:[%s12736_s0 + $0xdc] ss:$12 sps:$4 sm:$0xff]  }
  0x57   :  { %1803 = vmatpush1.bf16.msra.mxu0 %v9275_v51  ;;  %v10298_v51 = vld [vmem:[%s12736_s0 + $0xd8] ss:$12 sps:$4 sm:$0xff]  }
  0x58   :  { %1804 = vmatprep.subr.bf16.mxu0 %v9281_v54  ;;  %v10310_v54 = vld [vmem:[%s12736_s0 + $0xf0] ss:$12 sps:$4 sm:$0xff]  }
  0x5a   :  { %1320 = vmatmul.mubr.bf16.gmra.mrb[28].mxu0 %v9997_v52 }
  0x5b   :  { %1329 = vmatprep.mubr.bf16.mxu0 %v12745_v1  ;;  %1805 = vmatpush1.bf16.msra.mxu0 %v9279_v53  ;;  %v10303_v53 = vld [vmem:[%s12736_s0 + $0xf4] ss:$12 sps:$4 sm:$0xff]  }
  0x5c   :  { %1806 = vmatprep.subr.bf16.mxu0 %v9286_v58  ;;  %v10322_v58 = vld [vmem:[%s12736_s0 + $0x108] ss:$12 sps:$4 sm:$0xff]  }
  0x5f   :  { %1807 = vmatpush1.bf16.msra.mxu0 %v9284_v57  ;;  %v10315_v57 = vld [vmem:[%s12736_s0 + $0x10c] ss:$12 sps:$4 sm:$0xff]  }
  0x60   :  { %2079 = vmatprep.subr.bf16.mxu0 %v9293_v61  ;;  %v10327_v61 = vld [vmem:[%s12736_s0 + $0x124] ss:$12 sps:$4 sm:$0xff]  }
  0x62   :  { %1330 = vmatmul.mubr.bf16.gmra.mrb[32].mxu0 %v10010_v55 }
  0x63   :  { %1339 = vmatprep.mubr.bf16.mxu0 %v12745_v1 }
  0x6a   :  { %1340 = vmatmul.mubr.bf16.gmra.mrb[36].mxu0 %v10017_v56 }
  0x6b   :  { %1349 = vmatprep.mubr.bf16.mxu0 %v12745_v1 }
  0x72   :  { %1350 = vmatmul.mubr.bf16.gmra.mrb[40].mxu0 %v10030_v59 }
  0x73   :  { %1359 = vmatprep.mubr.bf16.mxu0 %v12745_v1 }
  0x7a   :  { %1360 = vmatmul.mubr.bf16.gmra.mrb[44].mxu0 %v10037_v60 }
  0x7b   :  { %1369 = vmatprep.mubr.bf16.mxu0 %v12745_v1 }
  0x82   :  { %1370 = vmatmul.mubr.bf16.gmra.mrb[48].mxu0 %v10050_v63 }
  0x83   :  { %1379 = vmatprep.mubr.bf16.mxu0 %v12745_v1 }
  0x8a   :  { %1380 = vmatmul.mubr.bf16.gmra.mrb[52].mxu0 %v10057_v0 }
  0x8b   :  { %1389 = vmatprep.mubr.bf16.mxu0 %v12745_v1 }
  0x92   :  { %1390 = vmatmul.mubr.bf16.gmra.mrb[56].mxu0 %v10064_v2 }
  0x93   :  { %1399 = vmatprep.mubr.bf16.mxu0 %v12745_v1 }
  0x9a   :  { %1400 = vmatmul.mubr.bf16.gmra.mrb[60].mxu0 %v10071_v3 }
  0x9b   :  { %1409 = vmatprep.mubr.bf16.mxu0 %v12745_v1 }
  0xa2   :  { %1410 = vmatmul.mubr.bf16.gmra.mrb[64].mxu0 %v10078_v4 }
  0xa3   :  { %1419 = vmatprep.mubr.bf16.mxu0 %v12745_v1 }
  0xaa   :  { %1420 = vmatmul.mubr.bf16.gmra.mrb[68].mxu0 %v10085_v5 }
  0xab   :  { %1429 = vmatprep.mubr.bf16.mxu0 %v12745_v1 }
  0xb2   :  { %1430 = vmatmul.mubr.bf16.gmra.mrb[72].mxu0 %v10092_v6 }
  0xb3   :  { %1439 = vmatprep.mubr.bf16.mxu0 %v12745_v1 }
  0xba   :  { %1440 = vmatmul.mubr.bf16.gmra.mrb[76].mxu0 %v10099_v7 }
  0xbb   :  { %1449 = vmatprep.mubr.bf16.mxu0 %v12745_v1 }
  0xc2   :  { %1450 = vmatmul.mubr.bf16.gmra.mrb[80].mxu0 %v10106_v8 }
  0xc3   :  { %1459 = vmatprep.mubr.bf16.mxu0 %v12745_v1 }
  0xca   :  { %1460 = vmatmul.mubr.bf16.gmra.mrb[84].mxu0 %v10113_v9 }
  0xcb   :  { %1469 = vmatprep.mubr.bf16.mxu0 %v12745_v1 }
  0xd2   :  { %1470 = vmatmul.mubr.bf16.gmra.mrb[88].mxu0 %v10120_v10 }
  0xd3   :  { %1479 = vmatprep.mubr.bf16.mxu0 %v12745_v1 }
  0xda   :  { %1480 = vmatmul.mubr.bf16.gmra.mrb[92].mxu0 %v10127_v11 }
  0xdb   :  { %1489 = vmatprep.mubr.bf16.mxu0 %v12745_v1 }
  0xe2   :  { %1490 = vmatmul.mubr.bf16.gmra.mrb[96].mxu0 %v10134_v12 }
  0xe3   :  { %1499 = vmatprep.mubr.bf16.mxu0 %v12745_v1 }
  0xea   :  { %1500 = vmatmul.mubr.bf16.gmra.mrb[100].mxu0 %v10141_v13 }
  0xeb   :  { %1509 = vmatprep.mubr.bf16.mxu0 %v12745_v1  ;;  %v10450_v1 = vld [vmem:[%s12736_s0 + $0x214] ss:$12 sps:$4 sm:$0xff]  }
  0xec   :  { %12844 = vst [vmem:[#allocation10_spill] sm:$0xff] %v10450_v1 }
  0xf2   :  { %1510 = vmatmul.mubr.bf16.gmra.mrb[104].mxu0 %v9287_v14  ;;  %v10337_v14 = vld [vmem:[%s12736_s0 + $0x120] ss:$12 sps:$4 sm:$0xff]  }
  0xf3   :  { %1808 = vmatprep.mubr.bf16.mxu0 %v9290_v15  ;;  %v10342_v15 = vld [vmem:[%s12736_s0 + $0x13c] ss:$12 sps:$4 sm:$0xff]  }
  0xfa   :  { %1809 = vmatmul.mubr.bf16.vlgmr.msra.gmra.mrb[0].mxu0 %v9288_v16  ;;  %v10349_v16 = vld [vmem:[%s12736_s0 + $0x138] ss:$12 sps:$4 sm:$0xff]  }
  0xfb   :  { %2080 = vmatpush1.bf16.msra.mxu0 %v9291_v17  ;;  %1818 = vmatprep.mubr.bf16.mxu0 %v9294_v62  ;;  %v9396_v62 = vld [vmem:[%s12735_s1 + $0x304] ss:$8 sps:$4 sm:$0xff]   ;;  %v10354_v17 = vld [vmem:[%s12736_s0 + $0x154] ss:$12 sps:$4 sm:$0xff]  }
  0xfc   :  { %2081 = vmatprep.subr.bf16.mxu0 %v9305_v18  ;;  %v10361_v18 = vld [vmem:[%s12736_s0 + $0x150] ss:$12 sps:$4 sm:$0xff]  }
  0xff   :  { %2082 = vmatpush1.bf16.msra.mxu0 %v9303_v19  ;;  %v10366_v19 = vld [vmem:[%s12736_s0 + $0x16c] ss:$12 sps:$4 sm:$0xff]  }
 0x100   :  { %2083 = vmatprep.subr.bf16.mxu0 %v9317_v20  ;;  %v10373_v20 = vld [vmem:[%s12736_s0 + $0x168] ss:$12 sps:$4 sm:$0xff]  }
 0x102   :  { %1819 = vmatmul.mubr.bf16.gmra.mrb[4].mxu0 %v10169_v21 }
 0x103   :  { %1828 = vmatprep.mubr.bf16.mxu0 %v10174_v22  ;;  %2084 = vmatpush1.bf16.msra.mxu0 %v9315_v23  ;;  %v10378_v23 = vld [vmem:[%s12736_s0 + $0x184] ss:$12 sps:$4 sm:$0xff]  }
 0x104   :  { %2085 = vmatprep.subr.bf16.mxu0 %v9332_v24  ;;  %v10385_v24 = vld [vmem:[%s12736_s0 + $0x180] ss:$12 sps:$4 sm:$0xff]  }
 0x107   :  { %2086 = vmatpush1.bf16.msra.mxu0 %v9330_v25  ;;  %v10390_v25 = vld [vmem:[%s12736_s0 + $0x19c] ss:$12 sps:$4 sm:$0xff]  }
 0x108   :  { %2087 = vmatprep.subr.bf16.mxu0 %v9344_v26  ;;  %v10397_v26 = vld [vmem:[%s12736_s0 + $0x198] ss:$12 sps:$4 sm:$0xff]  }
 0x10a   :  { %1829 = vmatmul.mubr.bf16.gmra.mrb[8].mxu0 %v10193_v27 }
 0x10b   :  { %1838 = vmatprep.mubr.bf16.mxu0 %v10198_v28  ;;  %2088 = vmatpush1.bf16.msra.mxu0 %v9342_v29  ;;  %v10402_v29 = vld [vmem:[%s12736_s0 + $0x1b4] ss:$12 sps:$4 sm:$0xff]  }
 0x10c   :  { %2089 = vmatprep.subr.bf16.mxu0 %v9358_v30  ;;  %v10409_v30 = vld [vmem:[%s12736_s0 + $0x1b0] ss:$12 sps:$4 sm:$0xff]  }
 0x10f   :  { %2090 = vmatpush1.bf16.msra.mxu0 %v9356_v31  ;;  %v10414_v31 = vld [vmem:[%s12736_s0 + $0x1cc] ss:$12 sps:$4 sm:$0xff]  }
 0x110   :  { %2091 = vmatprep.subr.bf16.mxu0 %v9371_v37  ;;  %12838 = vst [vmem:[#allocation4_spill] sm:$0xff] %v10414_v31  ;;  %v10426_v37 = vld [vmem:[%s12736_s0 + $0x1e4] ss:$12 sps:$4 sm:$0xff]  }
 0x111   :  { %12840 = vst [vmem:[#allocation6_spill] sm:$0xff] %v10426_v37 }
 0x112   :  { %1839 = vmatmul.mubr.bf16.gmra.mrb[12].mxu0 %v10214_v32 }
 0x113   :  { %1848 = vmatprep.mubr.bf16.mxu0 %v10219_v33  ;;  %2092 = vmatpush1.bf16.msra.mxu0 %v9369_v36  ;;  %v10421_v36 = vld [vmem:[%s12736_s0 + $0x1c8] ss:$12 sps:$4 sm:$0xff]  }
 0x114   :  { %2093 = vmatprep.subr.bf16.mxu0 %v9383_v47  ;;  %12839 = vst [vmem:[#allocation5_spill] sm:$0xff] %v10421_v36  ;;  %v10438_v47 = vld [vmem:[%s12736_s0 + $0x1fc] ss:$12 sps:$4 sm:$0xff]  }
 0x115   :  { %12842 = vst [vmem:[#allocation8_spill] sm:$0xff] %v10438_v47 }
 0x117   :  { %2094 = vmatpush1.bf16.msra.mxu0 %v9381_v46  ;;  %v10433_v46 = vld [vmem:[%s12736_s0 + $0x1e0] ss:$12 sps:$4 sm:$0xff]  }
 0x118   :  { %3211 = vmatprep.subr.bf16.mxu0 %v9396_v62  ;;  %12841 = vst [vmem:[#allocation7_spill] sm:$0xff] %v10433_v46  ;;  %v10445_v62 = vld [vmem:[%s12736_s0 + $0x1f8] ss:$12 sps:$4 sm:$0xff]  }
 0x119   :  { %12843 = vst [vmem:[#allocation9_spill] sm:$0xff] %v10445_v62 }
 0x11a   :  { %1849 = vmatmul.mubr.bf16.gmra.mrb[16].mxu0 %v10226_v34 }
 0x11b   :  { %1858 = vmatprep.mubr.bf16.mxu0 %v10231_v35 }
 0x122   :  { %1859 = vmatmul.mubr.bf16.gmra.mrb[20].mxu0 %v10244_v39 }
 0x123   :  { %1868 = vmatprep.mubr.bf16.mxu0 %v10249_v40 }
 0x12a   :  { %1869 = vmatmul.mubr.bf16.gmra.mrb[24].mxu0 %v10256_v41 }
 0x12b   :  { %1878 = vmatprep.mubr.bf16.mxu0 %v10261_v42 }
 0x132   :  { %1879 = vmatmul.mubr.bf16.gmra.mrb[28].mxu0 %v10268_v44 }
 0x133   :  { %1888 = vmatprep.mubr.bf16.mxu0 %v10273_v45 }
 0x13a   :  { %1889 = vmatmul.mubr.bf16.gmra.mrb[32].mxu0 %v10286_v49 }
 0x13b   :  { %1898 = vmatprep.mubr.bf16.mxu0 %v10291_v50 }
 0x142   :  { %1899 = vmatmul.mubr.bf16.gmra.mrb[36].mxu0 %v10298_v51 }
 0x143   :  { %1908 = vmatprep.mubr.bf16.mxu0 %v10303_v53 }
 0x14a   :  { %1909 = vmatmul.mubr.bf16.gmra.mrb[40].mxu0 %v10310_v54 }
 0x14b   :  { %1918 = vmatprep.mubr.bf16.mxu0 %v10315_v57 }
 0x152   :  { %1919 = vmatmul.mubr.bf16.gmra.mrb[44].mxu0 %v10322_v58 }
 0x153   :  { %1928 = vmatprep.mubr.bf16.mxu0 %v10327_v61 }
 0x15a   :  { %1929 = vmatmul.mubr.bf16.gmra.mrb[48].mxu0 %v10337_v14 }
 0x15b   :  { %1938 = vmatprep.mubr.bf16.mxu0 %v10342_v15 }
 0x162   :  { %1939 = vmatmul.mubr.bf16.gmra.mrb[52].mxu0 %v10349_v16 }
 0x163   :  { %1948 = vmatprep.mubr.bf16.mxu0 %v10354_v17 }
 0x16a   :  { %1949 = vmatmul.mubr.bf16.gmra.mrb[56].mxu0 %v10361_v18 }
 0x16b   :  { %1958 = vmatprep.mubr.bf16.mxu0 %v10366_v19 }
 0x172   :  { %1959 = vmatmul.mubr.bf16.gmra.mrb[60].mxu0 %v10373_v20 }
 0x173   :  { %1968 = vmatprep.mubr.bf16.mxu0 %v10378_v23 }
 0x17a   :  { %1969 = vmatmul.mubr.bf16.gmra.mrb[64].mxu0 %v10385_v24 }
 0x17b   :  { %1978 = vmatprep.mubr.bf16.mxu0 %v10390_v25 }
 0x182   :  { %1979 = vmatmul.mubr.bf16.gmra.mrb[68].mxu0 %v10397_v26 }
 0x183   :  { %1988 = vmatprep.mubr.bf16.mxu0 %v10402_v29 }
 0x18a   :  { %1989 = vmatmul.mubr.bf16.gmra.mrb[72].mxu0 %v10409_v30 }
 0x18b   :  { %1998 = vmatprep.mubr.bf16.mxu0 %v10414_v31  ;;  %v9400_v31 = vld [vmem:[%s12735_s1 + $0x320] ss:$8 sps:$4 sm:$0xff]  }
 0x192   :  { %1999 = vmatmul.mubr.bf16.gmra.mrb[76].mxu0 %v10421_v36  ;;  %v9394_v36 = vld [vmem:[%s12735_s1 + $0x300] ss:$8 sps:$4 sm:$0xff]  }
 0x193   :  { %2008 = vmatprep.mubr.bf16.mxu0 %v10426_v37  ;;  %v9393_v37 = vld [vmem:[%s12736_s0 + $0x8] ss:$12 sps:$4 sm:$0xff]  }
 0x19a   :  { %2009 = vmatmul.mubr.bf16.gmra.mrb[80].mxu0 %v10433_v46  ;;  %v10457_v46 = vld [vmem:[%s12736_s0 + $0x210] ss:$12 sps:$4 sm:$0xff]  }
 0x19b   :  { %2018 = vmatprep.mubr.bf16.mxu0 %v10438_v47  ;;  %12845 = vst [vmem:[#allocation11_spill] sm:$0xff] %v10457_v46  ;;  %v10462_v47 = vld [vmem:[%s12736_s0 + $0x22c] ss:$12 sps:$4 sm:$0xff]  }
 0x19c   :  { %12846 = vst [vmem:[#allocation12_spill] sm:$0xff] %v10462_v47 }
 0x1a2   :  { %2019 = vmatmul.mubr.bf16.gmra.mrb[84].mxu0 %v10445_v62  ;;  %v10469_v62 = vld [vmem:[%s12736_s0 + $0x228] ss:$12 sps:$4 sm:$0xff]  }
 0x1a3   :  { %2028 = vmatprep.mubr.bf16.mxu0 %v10450_v1  ;;  %12847 = vst [vmem:[#allocation13_spill] sm:$0xff] %v10469_v62  ;;  %v10474_v1 = vld [vmem:[%s12736_s0 + $0x244] ss:$12 sps:$4 sm:$0xff]  }
 0x1a4   :  { %12848 = vst [vmem:[#allocation14_spill] sm:$0xff] %v10474_v1 }
 0x1aa   :  { %2029 = vmatmul.mubr.bf16.gmra.mrb[88].mxu0 %v10457_v46  ;;  %v10481_v46 = vld [vmem:[%s12736_s0 + $0x240] ss:$12 sps:$4 sm:$0xff]  }
 0x1ab   :  { %2038 = vmatprep.mubr.bf16.mxu0 %v10462_v47  ;;  %12849 = vst [vmem:[#allocation15_spill] sm:$0xff] %v10481_v46  ;;  %v10486_v47 = vld [vmem:[%s12736_s0 + $0x25c] ss:$12 sps:$4 sm:$0xff]  }
 0x1ac   :  { %12850 = vst [vmem:[#allocation16_spill] sm:$0xff] %v10486_v47 }
 0x1b2   :  { %2039 = vmatmul.mubr.bf16.gmra.mrb[92].mxu0 %v10469_v62  ;;  %v10493_v62 = vld [vmem:[%s12736_s0 + $0x258] ss:$12 sps:$4 sm:$0xff]  }
 0x1b3   :  { %2048 = vmatprep.mubr.bf16.mxu0 %v10474_v1  ;;  %12851 = vst [vmem:[#allocation17_spill] sm:$0xff] %v10493_v62  ;;  %v10498_v1 = vld [vmem:[%s12736_s0 + $0x274] ss:$12 sps:$4 sm:$0xff]  }
 0x1b4   :  { %12852 = vst [vmem:[#allocation18_spill] sm:$0xff] %v10498_v1 }
 0x1ba   :  { %2049 = vmatmul.mubr.bf16.gmra.mrb[96].mxu0 %v10481_v46  ;;  %v10505_v46 = vld [vmem:[%s12736_s0 + $0x270] ss:$12 sps:$4 sm:$0xff]  }
 0x1bb   :  { %2058 = vmatprep.mubr.bf16.mxu0 %v10486_v47  ;;  %12853 = vst [vmem:[#allocation19_spill] sm:$0xff] %v10505_v46  ;;  %v12854_v47 = vmov 0  }
 0x1c2   :  { %2059 = vmatmul.mubr.bf16.gmra.mrb[100].mxu0 %v10493_v62  ;;  %v9402_v62 = vld [vmem:[%s12735_s1 + $0x324] ss:$8 sps:$4 sm:$0xff]  }
 0x1c3   :  { %2068 = vmatprep.mubr.bf16.mxu0 %v10498_v1  ;;  %v9399_v1 = vld [vmem:[%s12735_s1 + $0x314] ss:$8 sps:$4 sm:$0xff]  }
 0x1ca   :  { %2069 = vmatmul.mubr.bf16.gmra.mrb[104].mxu0 %v10505_v46  ;;  %v9397_v46 = vld [vmem:[%s12735_s1 + $0x310] ss:$8 sps:$4 sm:$0xff]  }
 0x1cb   :  { %2111 = vmatprep.mubr.bf16.mxu0 %v12854_v47 }
 0x1d2   :  { %2112 = vmatmul.mubr.bf16.vlgmr.msra.gmra.mrb[0].mxu0 %v9393_v37  ;;  %v9769_v37 = vld [vmem:[%s12736_s0 + $0x20] ss:$12 sps:$4 sm:$0xff]  }
 0x1d3   :  { %3212 = vmatpush1.bf16.msra.mxu0 %v9394_v36  ;;  %2121 = vmatprep.mubr.bf16.mxu0 %v12854_v47  ;;  %v9405_v36 = vld [vmem:[%s12735_s1 + $0x334] ss:$8 sps:$4 sm:$0xff]  }
 0x1d4   :  { %3213 = vmatprep.subr.bf16.mxu0 %v9399_v1  ;;  %v9403_v1 = vld [vmem:[%s12735_s1 + $0x330] ss:$8 sps:$4 sm:$0xff]  }
 0x1d7   :  { %3214 = vmatpush1.bf16.msra.mxu0 %v9397_v46  ;;  %v9408_v46 = vld [vmem:[%s12735_s1 + $0x344] ss:$8 sps:$4 sm:$0xff]  }
 0x1d8   :  { %3215 = vmatprep.subr.bf16.mxu0 %v9402_v62  ;;  %v9406_v62 = vld [vmem:[%s12735_s1 + $0x340] ss:$8 sps:$4 sm:$0xff]  }
 0x1da   :  { %2122 = vmatmul.mubr.bf16.gmra.mrb[4].mxu0 %v9769_v37  ;;  %v9411_v37 = vld [vmem:[%s12735_s1 + $0x354] ss:$8 sps:$4 sm:$0xff]  }
 0x1db   :  { %2131 = vmatprep.mubr.bf16.mxu0 %v12854_v47  ;;  %3216 = vmatpush1.bf16.msra.mxu0 %v9400_v31  ;;  %v9770_v31 = vld [vmem:[%s12736_s0 + $0x38] ss:$12 sps:$4 sm:$0xff]  }
 0x1dc   :  { %3217 = vmatprep.subr.bf16.mxu0 %v9405_v36  ;;  %v9409_v36 = vld [vmem:[%s12735_s1 + $0x350] ss:$8 sps:$4 sm:$0xff]  }
 0x1df   :  { %3218 = vmatpush1.bf16.msra.mxu0 %v9403_v1  ;;  %v9414_v1 = vld [vmem:[%s12735_s1 + $0x364] ss:$8 sps:$4 sm:$0xff]  }
 0x1e0   :  { %3219 = vmatprep.subr.bf16.mxu0 %v9408_v46  ;;  %v9412_v46 = vld [vmem:[%s12735_s1 + $0x360] ss:$8 sps:$4 sm:$0xff]  }
 0x1e2   :  { %2132 = vmatmul.mubr.bf16.gmra.mrb[8].mxu0 %v9770_v31  ;;  %v9417_v31 = vld [vmem:[%s12735_s1 + $0x374] ss:$8 sps:$4 sm:$0xff]  }
 0x1e3   :  { %2141 = vmatprep.mubr.bf16.mxu0 %v12854_v47  ;;  %3220 = vmatpush1.bf16.msra.mxu0 %v9406_v62  ;;  %v9771_v62 = vld [vmem:[%s12736_s0 + $0x50] ss:$12 sps:$4 sm:$0xff]  }
 0x1e4   :  { %3221 = vmatprep.subr.bf16.mxu0 %v9411_v37  ;;  %v9415_v37 = vld [vmem:[%s12735_s1 + $0x370] ss:$8 sps:$4 sm:$0xff]  }
 0x1e7   :  { %3222 = vmatpush1.bf16.msra.mxu0 %v9409_v36  ;;  %v9420_v36 = vld [vmem:[%s12735_s1 + $0x384] ss:$8 sps:$4 sm:$0xff]  }
 0x1e8   :  { %3223 = vmatprep.subr.bf16.mxu0 %v9414_v1  ;;  %v9418_v1 = vld [vmem:[%s12735_s1 + $0x380] ss:$8 sps:$4 sm:$0xff]  }
 0x1ea   :  { %2142 = vmatmul.mubr.bf16.gmra.mrb[12].mxu0 %v9771_v62  ;;  %v9423_v62 = vld [vmem:[%s12735_s1 + $0x394] ss:$8 sps:$4 sm:$0xff]  }
 0x1eb   :  { %2151 = vmatprep.mubr.bf16.mxu0 %v12854_v47  ;;  %3224 = vmatpush1.bf16.msra.mxu0 %v9412_v46  ;;  %v9772_v46 = vld [vmem:[%s12736_s0 + $0x68] ss:$12 sps:$4 sm:$0xff]  }
 0x1ec   :  { %3225 = vmatprep.subr.bf16.mxu0 %v9417_v31  ;;  %v9421_v31 = vld [vmem:[%s12735_s1 + $0x390] ss:$8 sps:$4 sm:$0xff]  }
 0x1ef   :  { %3226 = vmatpush1.bf16.msra.mxu0 %v9415_v37  ;;  %v9426_v37 = vld [vmem:[%s12735_s1 + $0x3a4] ss:$8 sps:$4 sm:$0xff]  }
 0x1f0   :  { %3227 = vmatprep.subr.bf16.mxu0 %v9420_v36  ;;  %v9424_v36 = vld [vmem:[%s12735_s1 + $0x3a0] ss:$8 sps:$4 sm:$0xff]  }
 0x1f2   :  { %2152 = vmatmul.mubr.bf16.gmra.mrb[16].mxu0 %v9772_v46  ;;  %v9429_v46 = vld [vmem:[%s12735_s1 + $0x3b4] ss:$8 sps:$4 sm:$0xff]  }
 0x1f3   :  { %2161 = vmatprep.mubr.bf16.mxu0 %v12854_v47  ;;  %3228 = vmatpush1.bf16.msra.mxu0 %v9418_v1  ;;  %v9427_v1 = vld [vmem:[%s12735_s1 + $0x3b0] ss:$8 sps:$4 sm:$0xff]  }
 0x1f4   :  { %3229 = vmatprep.subr.bf16.mxu0 %v9423_v62  ;;  %v9432_v62 = vld [vmem:[%s12735_s1 + $0x3c4] ss:$8 sps:$4 sm:$0xff]  }
 0x1f7   :  { %3230 = vmatpush1.bf16.msra.mxu0 %v9421_v31  ;;  %v9430_v31 = vld [vmem:[%s12735_s1 + $0x3c0] ss:$8 sps:$4 sm:$0xff]  }
 0x1f8   :  { %3231 = vmatprep.subr.bf16.mxu0 %v9426_v37  ;;  %v9433_v37 = vld [vmem:[%s12735_s1 + $0x3d0] ss:$8 sps:$4 sm:$0xff]  }
 0x1fa   :  { %2162 = vmatmul.mubr.bf16.gmra.mrb[20].mxu0 %v9943_v38  ;;  %v9435_v38 = vld [vmem:[%s12735_s1 + $0x3d4] ss:$8 sps:$4 sm:$0xff]  }
 0x1fb   :  { %2171 = vmatprep.mubr.bf16.mxu0 %v12854_v47  ;;  %3232 = vmatpush1.bf16.msra.mxu0 %v9424_v36  ;;  %v9436_v36 = vld [vmem:[%s12735_s1 + $0x3e0] ss:$8 sps:$4 sm:$0xff]  }
 0x1fc   :  { %3233 = vmatprep.subr.bf16.mxu0 %v9429_v46  ;;  %v9441_v46 = vld [vmem:[%s12735_s1 + $0x3f4] ss:$8 sps:$4 sm:$0xff]  }
 0x1ff   :  { %3234 = vmatpush1.bf16.msra.mxu0 %v9427_v1  ;;  %v9471_v1 = vld [vmem:[%s12735_s1 + $0x460] ss:$8 sps:$4 sm:$0xff]  }
 0x200   :  { %3235 = vmatprep.subr.bf16.mxu0 %v9432_v62  ;;  %v9473_v62 = vld [vmem:[%s12735_s1 + $0x464] ss:$8 sps:$4 sm:$0xff]  }
 0x202   :  { %2172 = vmatmul.mubr.bf16.gmra.mrb[24].mxu0 %v9962_v43  ;;  %v9438_v43 = vld [vmem:[%s12735_s1 + $0x3e4] ss:$8 sps:$4 sm:$0xff]  }
 0x203   :  { %2181 = vmatprep.mubr.bf16.mxu0 %v12854_v47  ;;  %3236 = vmatpush1.bf16.msra.mxu0 %v9430_v31  ;;  %v9474_v31 = vld [vmem:[%s12735_s1 + $0x1b0] ss:$8 sps:$4 sm:$0xff]  }
 0x204   :  { %3237 = vmatprep.subr.bf16.mxu0 %v9435_v38  ;;  %v9475_v38 = vld [vmem:[%s12735_s1 + $0x1c4] ss:$8 sps:$4 sm:$0xff]  }
 0x207   :  { %3238 = vmatpush1.bf16.msra.mxu0 %v9433_v37  ;;  %v9477_v37 = vld [vmem:[%s12735_s1 + $0x1c0] ss:$8 sps:$4 sm:$0xff]  }
 0x208   :  { %3239 = vmatprep.subr.bf16.mxu0 %v9438_v43  ;;  %v9480_v43 = vld [vmem:[%s12735_s1 + $0x1d0] ss:$8 sps:$4 sm:$0xff]  }
 0x20a   :  { %2182 = vmatmul.mubr.bf16.gmra.mrb[28].mxu0 %v9981_v48  ;;  %v9439_v48 = vld [vmem:[%s12735_s1 + $0x3f0] ss:$8 sps:$4 sm:$0xff]  }
 0x20b   :  { %2191 = vmatprep.mubr.bf16.mxu0 %v12854_v47  ;;  %3240 = vmatpush1.bf16.msra.mxu0 %v9436_v36  ;;  %v9478_v36 = vld [vmem:[%s12735_s1 + $0x1d4] ss:$8 sps:$4 sm:$0xff]  }
 0x20c   :  { %3241 = vmatprep.subr.bf16.mxu0 %v9441_v46  ;;  %v9483_v46 = vld [vmem:[%s12735_s1 + $0x1e0] ss:$8 sps:$4 sm:$0xff]  }
 0x20f   :  { %3242 = vmatpush1.bf16.msra.mxu0 %v9439_v48  ;;  %v9481_v48 = vld [vmem:[%s12735_s1 + $0x1e4] ss:$8 sps:$4 sm:$0xff]  }
 0x212   :  { %2192 = vmatmul.mubr.bf16.gmra.mrb[32].mxu0 %v9997_v52  ;;  %v9444_v52 = vld [vmem:[%s12735_s1 + $0x404] ss:$8 sps:$4 sm:$0xff]  }
 0x213   :  { %2201 = vmatprep.mubr.bf16.mxu0 %v12854_v47  ;;  %3514 = vmatprep.subr.bf16.mxu0 %v9444_v52  ;;  %v9484_v52 = vld [vmem:[%s12735_s1 + $0x1f4] ss:$8 sps:$4 sm:$0xff]  }
 0x21a   :  { %2202 = vmatmul.mubr.bf16.gmra.mrb[36].mxu0 %v10010_v55  ;;  %v9442_v55 = vld [vmem:[%s12735_s1 + $0x400] ss:$8 sps:$4 sm:$0xff]  }
 0x21b   :  { %2211 = vmatprep.mubr.bf16.mxu0 %v12854_v47 }
 0x222   :  { %2212 = vmatmul.mubr.bf16.gmra.mrb[40].mxu0 %v10017_v56  ;;  %v9447_v56 = vld [vmem:[%s12735_s1 + $0x414] ss:$8 sps:$4 sm:$0xff]  }
 0x223   :  { %2221 = vmatprep.mubr.bf16.mxu0 %v12854_v47 }
 0x22a   :  { %2222 = vmatmul.mubr.bf16.gmra.mrb[44].mxu0 %v10030_v59  ;;  %v9445_v59 = vld [vmem:[%s12735_s1 + $0x410] ss:$8 sps:$4 sm:$0xff]  }
 0x22b   :  { %2231 = vmatprep.mubr.bf16.mxu0 %v12854_v47 }
 0x232   :  { %2232 = vmatmul.mubr.bf16.gmra.mrb[48].mxu0 %v10037_v60  ;;  %v9450_v60 = vld [vmem:[%s12735_s1 + $0x424] ss:$8 sps:$4 sm:$0xff]  }
 0x233   :  { %2241 = vmatprep.mubr.bf16.mxu0 %v12854_v47 }
 0x23a   :  { %2242 = vmatmul.mubr.bf16.gmra.mrb[52].mxu0 %v10050_v63  ;;  %v9448_v63 = vld [vmem:[%s12735_s1 + $0x420] ss:$8 sps:$4 sm:$0xff]  }
 0x23b   :  { %2251 = vmatprep.mubr.bf16.mxu0 %v12854_v47 }
 0x242   :  { %2252 = vmatmul.mubr.bf16.gmra.mrb[56].mxu0 %v10057_v0  ;;  %v9453_v0 = vld [vmem:[%s12735_s1 + $0x434] ss:$8 sps:$4 sm:$0xff]  }
 0x243   :  { %2261 = vmatprep.mubr.bf16.mxu0 %v12854_v47 }
 0x24a   :  { %2262 = vmatmul.mubr.bf16.gmra.mrb[60].mxu0 %v10064_v2  ;;  %v9451_v2 = vld [vmem:[%s12735_s1 + $0x430] ss:$8 sps:$4 sm:$0xff]  }
 0x24b   :  { %2271 = vmatprep.mubr.bf16.mxu0 %v12854_v47 }
 0x252   :  { %2272 = vmatmul.mubr.bf16.gmra.mrb[64].mxu0 %v10071_v3  ;;  %v9456_v3 = vld [vmem:[%s12735_s1 + $0x444] ss:$8 sps:$4 sm:$0xff]  }
 0x253   :  { %2281 = vmatprep.mubr.bf16.mxu0 %v12854_v47 }
 0x25a   :  { %2282 = vmatmul.mubr.bf16.gmra.mrb[68].mxu0 %v10078_v4  ;;  %v9454_v4 = vld [vmem:[%s12735_s1 + $0x440] ss:$8 sps:$4 sm:$0xff]  }
 0x25b   :  { %2291 = vmatprep.mubr.bf16.mxu0 %v12854_v47 }
 0x262   :  { %2292 = vmatmul.mubr.bf16.gmra.mrb[72].mxu0 %v10085_v5  ;;  %v9459_v5 = vld [vmem:[%s12735_s1 + $0x454] ss:$8 sps:$4 sm:$0xff]  }
 0x263   :  { %2301 = vmatprep.mubr.bf16.mxu0 %v12854_v47 }
 0x26a   :  { %2302 = vmatmul.mubr.bf16.gmra.mrb[76].mxu0 %v10092_v6  ;;  %v9460_v6 = vld [vmem:[%s12735_s1 + $0x184] ss:$8 sps:$4 sm:$0xff]  }
 0x26b   :  { %2311 = vmatprep.mubr.bf16.mxu0 %v12854_v47  ;;  %914 = vmatprep.subr.bf16.mxu1 %v9460_v6  ;;  %v9501_v6 = vld [vmem:[%s12735_s1 + $0x230] ss:$8 sps:$4 sm:$0xff]  }
 0x272   :  { %2312 = vmatmul.mubr.bf16.gmra.mrb[80].mxu0 %v10099_v7  ;;  %v9462_v7 = vld [vmem:[%s12735_s1 + $0x180] ss:$8 sps:$4 sm:$0xff]  }
 0x273   :  { %2321 = vmatprep.mubr.bf16.mxu0 %v12854_v47  ;;  %915 = vmatpush1.bf16.msra.mxu1 %v9462_v7  ;;  %v9502_v7 = vld [vmem:[%s12735_s1 + $0x244] ss:$8 sps:$4 sm:$0xff]  }
 0x27a   :  { %2322 = vmatmul.mubr.bf16.gmra.mrb[84].mxu0 %v10106_v8  ;;  %v9457_v8 = vld [vmem:[%s12735_s1 + $0x450] ss:$8 sps:$4 sm:$0xff]  }
 0x27b   :  { %2331 = vmatprep.mubr.bf16.mxu0 %v12854_v47 }
 0x282   :  { %2332 = vmatmul.mubr.bf16.gmra.mrb[88].mxu0 %v10113_v9  ;;  %v9463_v9 = vld [vmem:[%s12735_s1 + $0x194] ss:$8 sps:$4 sm:$0xff]  }
 0x283   :  { %2341 = vmatprep.mubr.bf16.mxu0 %v12854_v47  ;;  %916 = vmatprep.subr.bf16.mxu1 %v9463_v9  ;;  %v9508_v9 = vld [vmem:[%s12735_s1 + $0x254] ss:$8 sps:$4 sm:$0xff]  }
 0x28a   :  { %2342 = vmatmul.mubr.bf16.gmra.mrb[92].mxu0 %v10120_v10  ;;  %v9465_v10 = vld [vmem:[%s12735_s1 + $0x190] ss:$8 sps:$4 sm:$0xff]  }
 0x28b   :  { %2351 = vmatprep.mubr.bf16.mxu0 %v12854_v47  ;;  %917 = vmatpush1.bf16.msra.mxu1 %v9465_v10  ;;  %v9510_v10 = vld [vmem:[%s12735_s1 + $0x250] ss:$8 sps:$4 sm:$0xff]  }
 0x292   :  { %2352 = vmatmul.mubr.bf16.gmra.mrb[96].mxu0 %v10127_v11  ;;  %v9466_v11 = vld [vmem:[%s12735_s1 + $0x1a4] ss:$8 sps:$4 sm:$0xff]  }
 0x293   :  { %2361 = vmatprep.mubr.bf16.mxu0 %v12854_v47  ;;  %918 = vmatprep.subr.bf16.mxu1 %v9466_v11  ;;  %v9511_v11 = vld [vmem:[%s12735_s1 + $0x264] ss:$8 sps:$4 sm:$0xff]  }
 0x29a   :  { %2362 = vmatmul.mubr.bf16.gmra.mrb[100].mxu0 %v10134_v12  ;;  %v9468_v12 = vld [vmem:[%s12735_s1 + $0x1a0] ss:$8 sps:$4 sm:$0xff]  }
 0x29b   :  { %2371 = vmatprep.mubr.bf16.mxu0 %v12854_v47  ;;  %919 = vmatpush1.bf16.msra.mxu1 %v9468_v12  ;;  %v9513_v12 = vld [vmem:[%s12735_s1 + $0x260] ss:$8 sps:$4 sm:$0xff]  }
 0x2a2   :  { %2372 = vmatmul.mubr.bf16.gmra.mrb[104].mxu0 %v10141_v13  ;;  %v9469_v13 = vld [vmem:[%s12735_s1 + $0x1b4] ss:$8 sps:$4 sm:$0xff]  }
 0x2a3   :  { %3243 = vmatprep.mubr.bf16.mxu0 %v10174_v22  ;;  %920 = vmatprep.subr.bf16.mxu1 %v9469_v13  ;;  %v9517_v13 = vld [vmem:[%s12735_s1 + $0x274] ss:$8 sps:$4 sm:$0xff]  }
 0x2a4   :  { %921 = vmatpush1.bf16.msra.mxu1 %v9474_v31  ;;  %v9552_v31 = vld [vmem:[%s12737_s3 + $0xd8] sm:$0xff]  }
 0x2a5   :  { %922 = vmatprep.subr.bf16.mxu1 %v9475_v38  ;;  %v9527_v38 = vld [vmem:[%s12736_s0 + $0xb0] ss:$12 sps:$4 sm:$0xff]  }
 0x2a8   :  { %923 = vmatpush1.bf16.msra.mxu1 %v9477_v37  ;;  %v9529_v37 = vld [vmem:[%s12736_s0 + $0xc8] ss:$12 sps:$4 sm:$0xff]  }
 0x2a9   :  { %924 = vmatprep.subr.bf16.mxu1 %v9478_v36  ;;  %v9555_v36 = vld [vmem:[%s12737_s3 + $0xe0] sm:$0xff]  }
 0x2aa   :  { %3244 = vmatmul.mubr.bf16.vlgmr.msra.gmra.mrb[0].mxu0 %v10193_v27 }
 0x2ab   :  { %3515 = vmatpush1.bf16.msra.mxu0 %v9442_v55  ;;  %3253 = vmatprep.mubr.bf16.mxu0 %v10198_v28  ;;  %v9486_v55 = vld [vmem:[%s12735_s1 + $0x1f0] ss:$8 sps:$4 sm:$0xff]  }
 0x2ac   :  { %3516 = vmatprep.subr.bf16.mxu0 %v9447_v56  ;;  %925 = vmatpush1.bf16.msra.mxu1 %v9480_v43  ;;  %v9487_v56 = vld [vmem:[%s12735_s1 + $0x204] ss:$8 sps:$4 sm:$0xff]  }
 0x2ad   :  { %926 = vmatprep.subr.bf16.mxu1 %v9481_v48  ;;  %v9530_v43 = vld [vmem:[%s12736_s0 + $0xe0] ss:$12 sps:$4 sm:$0xff]   ;;  %v9532_v48 = vld [vmem:[%s12736_s0 + $0xf8] ss:$12 sps:$4 sm:$0xff]  }
 0x2af   :  { %3517 = vmatpush1.bf16.msra.mxu0 %v9445_v59  ;;  %v9489_v59 = vld [vmem:[%s12735_s1 + $0x200] ss:$8 sps:$4 sm:$0xff]  }
 0x2b0   :  { %3518 = vmatprep.subr.bf16.mxu0 %v9450_v60  ;;  %927 = vmatpush1.bf16.msra.mxu1 %v9483_v46  ;;  %v9490_v60 = vld [vmem:[%s12735_s1 + $0x214] ss:$8 sps:$4 sm:$0xff]   ;;  %v9558_v46 = vld [vmem:[%s12737_s3 + $0xe8] sm:$0xff]  }
 0x2b1   :  { %928 = vmatprep.subr.bf16.mxu1 %v9484_v52  ;;  %v9534_v52 = vld [vmem:[%s12736_s0 + $0x110] ss:$12 sps:$4 sm:$0xff]  }
 0x2b2   :  { %3254 = vmatmul.mubr.bf16.gmra.mrb[4].mxu0 %v10214_v32 }
 0x2b3   :  { %3263 = vmatprep.mubr.bf16.mxu0 %v10219_v33  ;;  %3519 = vmatpush1.bf16.msra.mxu0 %v9448_v63  ;;  %v9492_v63 = vld [vmem:[%s12735_s1 + $0x210] ss:$8 sps:$4 sm:$0xff]  }
 0x2b4   :  { %3520 = vmatprep.subr.bf16.mxu0 %v9453_v0  ;;  %929 = vmatpush1.bf16.msra.mxu1 %v9486_v55  ;;  %v9493_v0 = vld [vmem:[%s12735_s1 + $0x470] ss:$8 sps:$4 sm:$0xff]  }
 0x2b5   :  { %930 = vmatprep.subr.bf16.mxu1 %v9487_v56  ;;  %v9560_v55 = vld [vmem:[%s12737_s3 + $0xf0] sm:$0xff]  }
 0x2b6   :  { %v9535_v56 = vld [vmem:[%s12736_s0 + $0x128] ss:$12 sps:$4 sm:$0xff]  }
 0x2b7   :  { %3521 = vmatpush1.bf16.msra.mxu0 %v9451_v2  ;;  %v9495_v2 = vld [vmem:[%s12735_s1 + $0x474] ss:$8 sps:$4 sm:$0xff]  }
 0x2b8   :  { %3522 = vmatprep.subr.bf16.mxu0 %v9456_v3  ;;  %931 = vmatpush1.bf16.msra.mxu1 %v9489_v59  ;;  %v9496_v3 = vld [vmem:[%s12735_s1 + $0x224] ss:$8 sps:$4 sm:$0xff]  }
 0x2b9   :  { %932 = vmatprep.subr.bf16.mxu1 %v9490_v60 }
 0x2ba   :  { %3264 = vmatmul.mubr.bf16.gmra.mrb[8].mxu0 %v10226_v34 }
 0x2bb   :  { %3273 = vmatprep.mubr.bf16.mxu0 %v10231_v35  ;;  %3523 = vmatpush1.bf16.msra.mxu0 %v9454_v4  ;;  %v9498_v4 = vld [vmem:[%s12735_s1 + $0x220] ss:$8 sps:$4 sm:$0xff]  }
 0x2bc   :  { %3524 = vmatprep.subr.bf16.mxu0 %v9459_v5  ;;  %933 = vmatpush1.bf16.msra.mxu1 %v9492_v63  ;;  %v9499_v5 = vld [vmem:[%s12735_s1 + $0x234] ss:$8 sps:$4 sm:$0xff]  }
 0x2bd   :  { %934 = vmatprep.subr.bf16.mxu1 %v9496_v3 }
 0x2bf   :  { %3525 = vmatpush1.bf16.msra.mxu0 %v9457_v8  ;;  %v9504_v8 = vld [vmem:[%s12735_s1 + $0x240] ss:$8 sps:$4 sm:$0xff]  }
 0x2c0   :  { %3526 = vmatprep.subr.bf16.mxu0 %v9473_v62  ;;  %935 = vmatpush1.bf16.msra.mxu1 %v9498_v4  ;;  %v9526_v62 = vld [vmem:[%s12736_s0 + $0x98] ss:$12 sps:$4 sm:$0xff]  }
 0x2c1   :  { %936 = vmatprep.subr.bf16.mxu1 %v9499_v5 }
 0x2c2   :  { %3274 = vmatmul.mubr.bf16.gmra.mrb[12].mxu0 %v10244_v39 }
 0x2c3   :  { %3283 = vmatprep.mubr.bf16.mxu0 %v10249_v40  ;;  %3527 = vmatpush1.bf16.msra.mxu0 %v9471_v1  ;;  %v9519_v1 = vld [vmem:[%s12735_s1 + $0x270] ss:$8 sps:$4 sm:$0xff]  }
 0x2c4   :  { %3528 = vmatprep.subr.bf16.mxu0 %v9495_v2  ;;  %937 = vmatpush1.bf16.msra.mxu1 %v9501_v6  ;;  %v9537_v2 = vld [vmem:[%s12736_s0 + $0x140] ss:$12 sps:$4 sm:$0xff]  }
 0x2c5   :  { %938 = vmatprep.subr.bf16.mxu1 %v9502_v7  ;;  %v9538_v7 = vld [vmem:[%s12736_s0 + $0x158] ss:$12 sps:$4 sm:$0xff]  }
 0x2c7   :  { %3529 = vmatpush1.bf16.msra.mxu0 %v9493_v0 }
 0x2c8   :  { %939 = vmatpush1.bf16.msra.mxu1 %v9504_v8 }
 0x2c9   :  { %940 = vmatprep.subr.bf16.mxu1 %v9508_v9  ;;  %v9562_v9 = vld [vmem:[%s12737_s3 + $0xf8] sm:$0xff]  }
 0x2ca   :  { %3284 = vmatmul.mubr.bf16.gmra.mrb[16].mxu0 %v10256_v41 }
 0x2cb   :  { %3293 = vmatprep.mubr.bf16.mxu0 %v10261_v42 }
 0x2cc   :  { %941 = vmatpush1.bf16.msra.mxu1 %v9510_v10 }
 0x2cd   :  { %942 = vmatprep.subr.bf16.mxu1 %v9511_v11 }
 0x2d0   :  { %943 = vmatpush1.bf16.msra.mxu1 %v9513_v12 }
 0x2d1   :  { %944 = vmatprep.subr.bf16.mxu1 %v9517_v13  ;;  %v9540_v13 = vld [vmem:[%s12736_s0 + $0x170] ss:$12 sps:$4 sm:$0xff]  }
 0x2d2   :  { %3294 = vmatmul.mubr.bf16.gmra.mrb[20].mxu0 %v10268_v44 }
 0x2d3   :  { %3303 = vmatprep.mubr.bf16.mxu0 %v10273_v45 }
 0x2d4   :  { %945 = vmatpush1.bf16.msra.mxu1 %v9519_v1 }
 0x2d5   :  { %4474 = vmatprep.subr.bf16.mxu1 %v12854_v47 }
 0x2d7   :  { %947 = vmatmul.mubr.bf16.vlgmr.msra.gmra.mrb[0].mxu1 %v10169_v21  ;;  %v9523_v21 = vld [vmem:[%s12737_s3 + $0x80] sm:$0xff]  }
 0x2d8   :  { %956 = vmatprep.mubr.bf16.mxu1 %v10174_v22  ;;  %4475 = vmatpush1.bf16.msra.mxu1 %v9523_v21  ;;  %v9525_v22 = vld [vmem:[%s12737_s3 + $0x88] sm:$0xff]  }
 0x2d9   :  { %4476 = vmatprep.subr.bf16.mxu1 %v12854_v47 }
 0x2da   :  { %3304 = vmatmul.mubr.bf16.gmra.mrb[24].mxu0 %v10286_v49 }
 0x2db   :  { %3313 = vmatprep.mubr.bf16.mxu0 %v10291_v50 }
 0x2dc   :  { %4477 = vmatpush1.bf16.msra.mxu1 %v9525_v22 }
 0x2dd   :  { %4478 = vmatprep.subr.bf16.mxu1 %v12854_v47 }
 0x2df   :  { %957 = vmatmul.mubr.bf16.gmra.mrb[4].mxu1 %v10193_v27  ;;  %v9528_v27 = vld [vmem:[%s12737_s3 + $0x90] sm:$0xff]  }
 0x2e0   :  { %966 = vmatprep.mubr.bf16.mxu1 %v10198_v28  ;;  %v12855_v28 = vld [vmem:[#allocation4_spill] sm:$0xff]  ;;  %4479 = vmatpush1.bf16.msra.mxu1 %v9528_v27 }
 0x2e1   :  { %4480 = vmatprep.subr.bf16.mxu1 %v12854_v47 }
 0x2e2   :  { %3314 = vmatmul.mubr.bf16.gmra.mrb[28].mxu0 %v10298_v51 }
 0x2e3   :  { %3323 = vmatprep.mubr.bf16.mxu0 %v10303_v53 }
 0x2e7   :  { %967 = vmatmul.mubr.bf16.gmra.mrb[8].mxu1 %v10214_v32  ;;  %v12856_v32 = vld [vmem:[#allocation5_spill] sm:$0xff] }
 0x2e8   :  { %976 = vmatprep.mubr.bf16.mxu1 %v10219_v33  ;;  %v12857_v33 = vld [vmem:[#allocation6_spill] sm:$0xff] }
 0x2ea   :  { %3324 = vmatmul.mubr.bf16.gmra.mrb[32].mxu0 %v10310_v54 }
 0x2eb   :  { %3333 = vmatprep.mubr.bf16.mxu0 %v10315_v57 }
 0x2ef   :  { %977 = vmatmul.mubr.bf16.gmra.mrb[12].mxu1 %v10226_v34  ;;  %v12858_v34 = vld [vmem:[#allocation7_spill] sm:$0xff] }
 0x2f0   :  { %986 = vmatprep.mubr.bf16.mxu1 %v10231_v35  ;;  %v9531_v35 = vld [vmem:[%s12737_s3 + $0x98] sm:$0xff]  }
 0x2f1   :  { %4481 = vmatpush1.bf16.msra.mxu1 %v9531_v35 }
 0x2f2   :  { %3334 = vmatmul.mubr.bf16.gmra.mrb[36].mxu0 %v10322_v58  ;;  %4482 = vmatprep.subr.bf16.mxu1 %v12854_v47 }
 0x2f3   :  { %3343 = vmatprep.mubr.bf16.mxu0 %v10327_v61 }
 0x2f7   :  { %987 = vmatmul.mubr.bf16.gmra.mrb[16].mxu1 %v10244_v39  ;;  %v12859_v39 = vld [vmem:[#allocation8_spill] sm:$0xff] }
 0x2f8   :  { %996 = vmatprep.mubr.bf16.mxu1 %v10249_v40  ;;  %v12860_v40 = vld [vmem:[#allocation9_spill] sm:$0xff] }
 0x2fa   :  { %3344 = vmatmul.mubr.bf16.gmra.mrb[40].mxu0 %v10337_v14 }
 0x2fb   :  { %3353 = vmatprep.mubr.bf16.mxu0 %v10342_v15 }
 0x2ff   :  { %997 = vmatmul.mubr.bf16.gmra.mrb[20].mxu1 %v10256_v41  ;;  %v12861_v41 = vld [vmem:[#allocation10_spill] sm:$0xff] }
 0x300   :  { %1006 = vmatprep.mubr.bf16.mxu1 %v10261_v42  ;;  %v9533_v42 = vld [vmem:[%s12737_s3 + $0xa0] sm:$0xff]  }
 0x301   :  { %4483 = vmatpush1.bf16.msra.mxu1 %v9533_v42 }
 0x302   :  { %3354 = vmatmul.mubr.bf16.gmra.mrb[44].mxu0 %v10349_v16  ;;  %4484 = vmatprep.subr.bf16.mxu1 %v12854_v47 }
 0x303   :  { %3363 = vmatprep.mubr.bf16.mxu0 %v10354_v17 }
 0x307   :  { %1007 = vmatmul.mubr.bf16.gmra.mrb[24].mxu1 %v10268_v44  ;;  %v12862_v44 = vld [vmem:[#allocation11_spill] sm:$0xff] }
 0x308   :  { %1016 = vmatprep.mubr.bf16.mxu1 %v10273_v45  ;;  %v12863_v45 = vld [vmem:[#allocation12_spill] sm:$0xff] }
 0x30a   :  { %3364 = vmatmul.mubr.bf16.gmra.mrb[48].mxu0 %v10361_v18 }
 0x30b   :  { %3373 = vmatprep.mubr.bf16.mxu0 %v10366_v19 }
 0x30f   :  { %1017 = vmatmul.mubr.bf16.gmra.mrb[28].mxu1 %v10286_v49  ;;  %v12864_v49 = vld [vmem:[#allocation13_spill] sm:$0xff] }
 0x310   :  { %1026 = vmatprep.mubr.bf16.mxu1 %v10291_v50  ;;  %v9536_v50 = vld [vmem:[%s12737_s3 + $0xa8] sm:$0xff]  }
 0x311   :  { %4485 = vmatpush1.bf16.msra.mxu1 %v9536_v50 }
 0x312   :  { %3374 = vmatmul.mubr.bf16.gmra.mrb[52].mxu0 %v10373_v20  ;;  %4486 = vmatprep.subr.bf16.mxu1 %v12854_v47 }
 0x313   :  { %3383 = vmatprep.mubr.bf16.mxu0 %v10378_v23 }
 0x317   :  { %1027 = vmatmul.mubr.bf16.gmra.mrb[32].mxu1 %v10298_v51  ;;  %v12865_v51 = vld [vmem:[#allocation14_spill] sm:$0xff] }
 0x318   :  { %1036 = vmatprep.mubr.bf16.mxu1 %v10303_v53  ;;  %v12866_v53 = vld [vmem:[#allocation15_spill] sm:$0xff] }
 0x31a   :  { %3384 = vmatmul.mubr.bf16.gmra.mrb[56].mxu0 %v10385_v24 }
 0x31b   :  { %3393 = vmatprep.mubr.bf16.mxu0 %v10390_v25 }
 0x31f   :  { %1037 = vmatmul.mubr.bf16.gmra.mrb[36].mxu1 %v10310_v54  ;;  %v12867_v54 = vld [vmem:[#allocation16_spill] sm:$0xff] }
 0x320   :  { %1046 = vmatprep.mubr.bf16.mxu1 %v10315_v57  ;;  %v12868_v57 = vld [vmem:[#allocation17_spill] sm:$0xff] }
 0x322   :  { %3394 = vmatmul.mubr.bf16.gmra.mrb[60].mxu0 %v10397_v26 }
 0x323   :  { %3403 = vmatprep.mubr.bf16.mxu0 %v10402_v29 }
 0x327   :  { %1047 = vmatmul.mubr.bf16.gmra.mrb[40].mxu1 %v10322_v58  ;;  %v9539_v58 = vld [vmem:[%s12737_s3 + $0xb0] sm:$0xff]  }
 0x328   :  { %1056 = vmatprep.mubr.bf16.mxu1 %v10327_v61  ;;  %v12869_v61 = vld [vmem:[#allocation18_spill] sm:$0xff]  ;;  %4487 = vmatpush1.bf16.msra.mxu1 %v9539_v58 }
 0x329   :  { %4488 = vmatprep.subr.bf16.mxu1 %v12854_v47 }
 0x32a   :  { %3404 = vmatmul.mubr.bf16.gmra.mrb[64].mxu0 %v10409_v30 }
 0x32b   :  { %3413 = vmatprep.mubr.bf16.mxu0 %v12855_v28 }
 0x32f   :  { %1057 = vmatmul.mubr.bf16.gmra.mrb[44].mxu1 %v10337_v14  ;;  %v10916_v14 = vld [vmem:[%s12736_s0 + $0x28c] ss:$12 sps:$4 sm:$0xff]  }
 0x330   :  { %1066 = vmatprep.mubr.bf16.mxu1 %v10342_v15  ;;  %v12870_v15 = vld [vmem:[#allocation19_spill] sm:$0xff] }
 0x332   :  { %3414 = vmatmul.mubr.bf16.gmra.mrb[68].mxu0 %v12856_v32 }
 0x333   :  { %3423 = vmatprep.mubr.bf16.mxu0 %v12857_v33 }
 0x337   :  { %1067 = vmatmul.mubr.bf16.gmra.mrb[48].mxu1 %v10349_v16  ;;  %v10925_v16 = vld [vmem:[%s12736_s0 + $0x288] ss:$12 sps:$4 sm:$0xff]  }
 0x338   :  { %1076 = vmatprep.mubr.bf16.mxu1 %v10354_v17  ;;  %v9514_v17 = vld [vmem:[%s12736_s0 + $0x2a4] ss:$12 sps:$4 sm:$0xff]  }
 0x33a   :  { %3424 = vmatmul.mubr.bf16.gmra.mrb[72].mxu0 %v12858_v34 }
 0x33b   :  { %3433 = vmatprep.mubr.bf16.mxu0 %v12859_v39 }
 0x33f   :  { %1077 = vmatmul.mubr.bf16.gmra.mrb[52].mxu1 %v10361_v18  ;;  %v9542_v18 = vld [vmem:[%s12737_s3 + $0xb8] sm:$0xff]  }
 0x340   :  { %1086 = vmatprep.mubr.bf16.mxu1 %v10366_v19  ;;  %4489 = vmatpush1.bf16.msra.mxu1 %v9542_v18  ;;  %v9516_v19 = vld [vmem:[%s12736_s0 + $0x2a0] ss:$12 sps:$4 sm:$0xff]  }
 0x341   :  { %4490 = vmatprep.subr.bf16.mxu1 %v12854_v47 }
 0x342   :  { %3434 = vmatmul.mubr.bf16.gmra.mrb[76].mxu0 %v12860_v40 }
 0x343   :  { %3443 = vmatprep.mubr.bf16.mxu0 %v12861_v41 }
 0x347   :  { %1087 = vmatmul.mubr.bf16.gmra.mrb[56].mxu1 %v10373_v20  ;;  %v9544_v20 = vld [vmem:[%s12737_s3 + $0xc0] sm:$0xff]  }
 0x348   :  { %1096 = vmatprep.mubr.bf16.mxu1 %v10378_v23  ;;  %4491 = vmatpush1.bf16.msra.mxu1 %v9544_v20  ;;  %v9520_v23 = vld [vmem:[%s12736_s0 + $0x38] ss:$12 sps:$4 sm:$0xff]   ;;  %v9549_v20 = vld [vmem:[%s12736_s0 + $0x200] ss:$12 sps:$4 sm:$0xff]  }
 0x349   :  { %4492 = vmatprep.subr.bf16.mxu1 %v12854_v47 }
 0x34a   :  { %3444 = vmatmul.mubr.bf16.gmra.mrb[80].mxu0 %v12862_v44 }
 0x34b   :  { %3453 = vmatprep.mubr.bf16.mxu0 %v12863_v45 }
 0x34f   :  { %1097 = vmatmul.mubr.bf16.gmra.mrb[60].mxu1 %v10385_v24  ;;  %v9521_v24 = vld [vmem:[%s12736_s0 + $0x50] ss:$12 sps:$4 sm:$0xff]  }
 0x350   :  { %1106 = vmatprep.mubr.bf16.mxu1 %v10390_v25  ;;  %v9547_v25 = vld [vmem:[%s12737_s3 + $0xc8] sm:$0xff]  }
 0x351   :  { %4493 = vmatpush1.bf16.msra.mxu1 %v9547_v25 }
 0x352   :  { %3454 = vmatmul.mubr.bf16.gmra.mrb[84].mxu0 %v12864_v49  ;;  %4494 = vmatprep.subr.bf16.mxu1 %v12854_v47 }
 0x353   :  { %3463 = vmatprep.mubr.bf16.mxu0 %v12865_v51 }
 0x357   :  { %1107 = vmatmul.mubr.bf16.gmra.mrb[64].mxu1 %v10397_v26  ;;  %v9522_v26 = vld [vmem:[%s12736_s0 + $0x68] ss:$12 sps:$4 sm:$0xff]  }
 0x358   :  { %1116 = vmatprep.mubr.bf16.mxu1 %v10402_v29  ;;  %v9524_v29 = vld [vmem:[%s12736_s0 + $0x80] ss:$12 sps:$4 sm:$0xff]  }
 0x35a   :  { %3464 = vmatmul.mubr.bf16.gmra.mrb[88].mxu0 %v12866_v53 }
 0x35b   :  { %3473 = vmatprep.mubr.bf16.mxu0 %v12867_v54 }
 0x35f   :  { %1117 = vmatmul.mubr.bf16.gmra.mrb[68].mxu1 %v10409_v30  ;;  %v9550_v30 = vld [vmem:[%s12737_s3 + $0xd0] sm:$0xff]  }
 0x360   :  { %1126 = vmatprep.mubr.bf16.mxu1 %v12855_v28  ;;  %4495 = vmatpush1.bf16.msra.mxu1 %v9550_v30  ;;  %v9541_v28 = vld [vmem:[%s12736_s0 + $0x188] ss:$12 sps:$4 sm:$0xff]  }
 0x361   :  { %4496 = vmatprep.subr.bf16.mxu1 %v12854_v47 }
 0x362   :  { %3474 = vmatmul.mubr.bf16.gmra.mrb[92].mxu0 %v12868_v57 }
 0x363   :  { %3483 = vmatprep.mubr.bf16.mxu0 %v12869_v61 }
 0x364   :  { %4497 = vmatpush1.bf16.msra.mxu1 %v9552_v31 }
 0x365   :  { %4498 = vmatprep.subr.bf16.mxu1 %v12854_v47 }
 0x367   :  { %1127 = vmatmul.mubr.bf16.gmra.mrb[72].mxu1 %v12856_v32 }
 0x368   :  { %1136 = vmatprep.mubr.bf16.mxu1 %v12857_v33  ;;  %4499 = vmatpush1.bf16.msra.mxu1 %v9555_v36 }
 0x369   :  { %4500 = vmatprep.subr.bf16.mxu1 %v12854_v47 }
 0x36a   :  { %3484 = vmatmul.mubr.bf16.gmra.mrb[96].mxu0 %v12870_v15 }
 0x36b   :  { %3493 = vmatprep.mubr.bf16.mxu0 %v10916_v14 }
 0x36c   :  { %4501 = vmatpush1.bf16.msra.mxu1 %v9558_v46 }
 0x36d   :  { %4502 = vmatprep.subr.bf16.mxu1 %v12854_v47 }
 0x36f   :  { %1137 = vmatmul.mubr.bf16.gmra.mrb[76].mxu1 %v12858_v34 }
 0x370   :  { %1146 = vmatprep.mubr.bf16.mxu1 %v12859_v39  ;;  %4503 = vmatpush1.bf16.msra.mxu1 %v9560_v55  ;;  %v9543_v39 = vld [vmem:[%s12736_s0 + $0x1a0] ss:$12 sps:$4 sm:$0xff]  }
 0x371   :  { %4504 = vmatprep.subr.bf16.mxu1 %v12854_v47 }
 0x372   :  { %3494 = vmatmul.mubr.bf16.gmra.mrb[100].mxu0 %v10925_v16 }
 0x373   :  { %3503 = vmatprep.mubr.bf16.mxu0 %v9514_v17 }
 0x374   :  { %4505 = vmatpush1.bf16.msra.mxu1 %v9562_v9  ;;  %v9556_v9 = vld [vmem:[%s12736_s0 + $0x260] ss:$12 sps:$4 sm:$0xff]  }
 0x375   :  { %4803 = vmatprep.subr.bf16.mxu1 %v12854_v47 }
 0x377   :  { %1147 = vmatmul.mubr.bf16.gmra.mrb[80].mxu1 %v12860_v40 }
 0x378   :  { %1156 = vmatprep.mubr.bf16.mxu1 %v12861_v41 }
 0x37a   :  { %3504 = vmatmul.mubr.bf16.gmra.mrb[104].mxu0 %v9516_v19 }
 0x37b   :  { %3546 = vmatprep.mubr.bf16.mxu0 %v12854_v47 }
 0x37f   :  { %1157 = vmatmul.mubr.bf16.gmra.mrb[84].mxu1 %v12862_v44 }
 0x380   :  { %1166 = vmatprep.mubr.bf16.mxu1 %v12863_v45  ;;  %v9545_v45 = vld [vmem:[%s12736_s0 + $0x1b8] ss:$12 sps:$4 sm:$0xff]  }
 0x382   :  { %3547 = vmatmul.mubr.bf16.vlgmr.msra.gmra.mrb[0].mxu0 %v9520_v23 }
 0x383   :  { %3556 = vmatprep.mubr.bf16.mxu0 %v12854_v47 }
 0x387   :  { %1167 = vmatmul.mubr.bf16.gmra.mrb[88].mxu1 %v12864_v49 }
 0x388   :  { %1176 = vmatprep.mubr.bf16.mxu1 %v12865_v51 }
 0x38a   :  { %3557 = vmatmul.mubr.bf16.gmra.mrb[4].mxu0 %v9521_v24 }
 0x38b   :  { %3566 = vmatprep.mubr.bf16.mxu0 %v12854_v47 }
 0x38f   :  { %1177 = vmatmul.mubr.bf16.gmra.mrb[92].mxu1 %v12866_v53 }
 0x390   :  { %1186 = vmatprep.mubr.bf16.mxu1 %v12867_v54  ;;  %v9546_v54 = vld [vmem:[%s12736_s0 + $0x1d0] ss:$12 sps:$4 sm:$0xff]  }
 0x392   :  { %3567 = vmatmul.mubr.bf16.gmra.mrb[8].mxu0 %v9522_v26 }
 0x393   :  { %3576 = vmatprep.mubr.bf16.mxu0 %v12854_v47 }
 0x397   :  { %1187 = vmatmul.mubr.bf16.gmra.mrb[96].mxu1 %v12868_v57 }
 0x398   :  { %1196 = vmatprep.mubr.bf16.mxu1 %v12869_v61 }
 0x39a   :  { %3577 = vmatmul.mubr.bf16.gmra.mrb[12].mxu0 %v9524_v29  ;;  %v9551_v29 = vld [vmem:[%s12736_s0 + $0x218] ss:$12 sps:$4 sm:$0xff]  }
 0x39b   :  { %3586 = vmatprep.mubr.bf16.mxu0 %v12854_v47 }
 0x39f   :  { %1197 = vmatmul.mubr.bf16.gmra.mrb[100].mxu1 %v12870_v15  ;;  %v9548_v15 = vld [vmem:[%s12736_s0 + $0x1e8] ss:$12 sps:$4 sm:$0xff]  }
 0x3a0   :  { %1206 = vmatprep.mubr.bf16.mxu1 %v10916_v14 }
 0x3a2   :  { %3587 = vmatmul.mubr.bf16.gmra.mrb[16].mxu0 %v9526_v62 }
 0x3a3   :  { %3596 = vmatprep.mubr.bf16.mxu0 %v12854_v47 }
 0x3a7   :  { %1207 = vmatmul.mubr.bf16.gmra.mrb[104].mxu1 %v10925_v16 }
 0x3aa   :  { %3597 = vmatmul.mubr.bf16.gmra.mrb[20].mxu0 %v9527_v38  ;;  %v11035_v59 = vpop.f32.mrb[0].mxu1 }
 0x3ab   :  { %3606 = vmatprep.mubr.bf16.mxu0 %v12854_v47  ;;  %v11038_v60 = vpop.f32.mrb[1].mxu1 }
 0x3ac   :  { %v11040_v63 = vpop.f32.mrb[2].mxu1 }
 0x3ad   :  { %v11042_v0 = vpop.f32.mrb[3].mxu1 }
 0x3b2   :  { %3607 = vmatmul.mubr.bf16.gmra.mrb[24].mxu0 %v9529_v37  ;;  %v11047_v3 = vpop.f32.mrb[4].mxu1  ;;  %v9553_v37 = vld [vmem:[%s12736_s0 + $0x230] ss:$12 sps:$4 sm:$0xff]  }
 0x3b3   :  { %3616 = vmatprep.mubr.bf16.mxu0 %v12854_v47  ;;  %v11050_v4 = vpop.f32.mrb[5].mxu1 }
 0x3b4   :  { %v11052_v5 = vpop.f32.mrb[6].mxu1 }
 0x3b5   :  { %v11054_v6 = vpop.f32.mrb[7].mxu1 }
 0x3ba   :  { %3617 = vmatmul.mubr.bf16.gmra.mrb[28].mxu0 %v9530_v43  ;;  %v11059_v8 = vpop.f32.mrb[8].mxu1 }
 0x3bb   :  { %3626 = vmatprep.mubr.bf16.mxu0 %v12854_v47  ;;  %v11065_v10 = vpop.f32.mrb[9].mxu1 }
 0x3bc   :  { %v11067_v11 = vpop.f32.mrb[10].mxu1 }
 0x3bd   :  { %v11069_v12 = vpop.f32.mrb[11].mxu1 }
 0x3c2   :  { %3627 = vmatmul.mubr.bf16.gmra.mrb[32].mxu0 %v9532_v48  ;;  %v11075_v1 = vpop.f32.mrb[12].mxu1 }
 0x3c3   :  { %3636 = vmatprep.mubr.bf16.mxu0 %v12854_v47  ;;  %v11078_v21 = vpop.f32.mrb[13].mxu1 }
 0x3c4   :  { %v11080_v22 = vpop.f32.mrb[14].mxu1 }
 0x3c5   :  { %v11082_v27 = vpop.f32.mrb[15].mxu1 }
 0x3ca   :  { %3637 = vmatmul.mubr.bf16.gmra.mrb[36].mxu0 %v9534_v52  ;;  %v11087_v32 = vpop.f32.mrb[16].mxu1  ;;  %v9554_v52 = vld [vmem:[%s12736_s0 + $0x248] ss:$12 sps:$4 sm:$0xff]  }
 0x3cb   :  { %3646 = vmatprep.mubr.bf16.mxu0 %v12854_v47  ;;  %v11090_v33 = vpop.f32.mrb[17].mxu1 }
 0x3cc   :  { %v11092_v34 = vpop.f32.mrb[18].mxu1 }
 0x3cd   :  { %v11094_v35 = vpop.f32.mrb[19].mxu1 }
 0x3d2   :  { %3647 = vmatmul.mubr.bf16.gmra.mrb[40].mxu0 %v9535_v56  ;;  %v11099_v40 = vpop.f32.mrb[20].mxu1 }
 0x3d3   :  { %3656 = vmatprep.mubr.bf16.mxu0 %v12854_v47  ;;  %v11102_v41 = vpop.f32.mrb[21].mxu1 }
 0x3d4   :  { %v11104_v42 = vpop.f32.mrb[22].mxu1 }
 0x3d5   :  { %v11106_v44 = vpop.f32.mrb[23].mxu1 }
 0x3da   :  { %3657 = vmatmul.mubr.bf16.gmra.mrb[44].mxu0 %v9537_v2  ;;  %v11111_v49 = vpop.f32.mrb[24].mxu1 }
 0x3db   :  { %3666 = vmatprep.mubr.bf16.mxu0 %v12854_v47  ;;  %v11114_v50 = vpop.f32.mrb[25].mxu1 }
 0x3dc   :  { %v11116_v51 = vpop.f32.mrb[26].mxu1 }
 0x3dd   :  { %v11118_v53 = vpop.f32.mrb[27].mxu1 }
 0x3e2   :  { %3667 = vmatmul.mubr.bf16.gmra.mrb[48].mxu0 %v9538_v7  ;;  %v11123_v57 = vpop.f32.mrb[28].mxu1 }
 0x3e3   :  { %3676 = vmatprep.mubr.bf16.mxu0 %v12854_v47  ;;  %v11126_v58 = vpop.f32.mrb[29].mxu1 }
 0x3e4   :  { %v11128_v61 = vpop.f32.mrb[30].mxu1 }
 0x3e5   :  { %v11130_v14 = vpop.f32.mrb[31].mxu1 }
 0x3ea   :  { %3677 = vmatmul.mubr.bf16.gmra.mrb[52].mxu0 %v9540_v13  ;;  %v11135_v16 = vpop.f32.mrb[32].mxu1 }
 0x3eb   :  { %3686 = vmatprep.mubr.bf16.mxu0 %v12854_v47  ;;  %v11138_v17 = vpop.f32.mrb[33].mxu1 }
 0x3ec   :  { %v11140_v18 = vpop.f32.mrb[34].mxu1 }
 0x3ed   :  { %v11142_v19 = vpop.f32.mrb[35].mxu1 }
 0x3f2   :  { %3687 = vmatmul.mubr.bf16.gmra.mrb[56].mxu0 %v9541_v28  ;;  %v11147_v23 = vpop.f32.mrb[36].mxu1 }
 0x3f3   :  { %3696 = vmatprep.mubr.bf16.mxu0 %v12854_v47  ;;  %v11150_v24 = vpop.f32.mrb[37].mxu1 }
 0x3f4   :  { %v11152_v25 = vpop.f32.mrb[38].mxu1 }
 0x3f5   :  { %v11154_v26 = vpop.f32.mrb[39].mxu1 }
 0x3fa   :  { %3697 = vmatmul.mubr.bf16.gmra.mrb[60].mxu0 %v9543_v39  ;;  %v11159_v30 = vpop.f32.mrb[40].mxu1 }
 0x3fb   :  { %3706 = vmatprep.mubr.bf16.mxu0 %v12854_v47  ;;  %v11162_v62 = vpop.f32.mrb[41].mxu1 }
 0x3fc   :  { %v11164_v31 = vpop.f32.mrb[42].mxu1 }
 0x3fd   :  { %v11166_v38 = vpop.f32.mrb[43].mxu1 }
 0x402   :  { %3707 = vmatmul.mubr.bf16.gmra.mrb[64].mxu0 %v9545_v45  ;;  %v11171_v36 = vpop.f32.mrb[44].mxu1 }
 0x403   :  { %3716 = vmatprep.mubr.bf16.mxu0 %v12854_v47  ;;  %v11174_v43 = vpop.f32.mrb[45].mxu1 }
 0x404   :  { %v11176_v48 = vpop.f32.mrb[46].mxu1 }
 0x405   :  { %v11178_v46 = vpop.f32.mrb[47].mxu1 }
 0x406   :  { %12871 = vst [vmem:[#allocation4_spill] sm:$0xff] %v11178_v46 }
 0x40a   :  { %3717 = vmatmul.mubr.bf16.gmra.mrb[68].mxu0 %v9546_v54  ;;  %v11183_v55 = vpop.f32.mrb[48].mxu1  ;;  %v9557_v54 = vld [vmem:[%s12736_s0 + $0x278] ss:$12 sps:$4 sm:$0xff]  }
 0x40b   :  { %3726 = vmatprep.mubr.bf16.mxu0 %v12854_v47  ;;  %12872 = vst [vmem:[#allocation5_spill] sm:$0xff] %v11183_v55  ;;  %v11186_v56 = vpop.f32.mrb[49].mxu1 }
 0x40c   :  { %12873 = vst [vmem:[#allocation6_spill] sm:$0xff] %v11186_v56  ;;  %v11188_v2 = vpop.f32.mrb[50].mxu1 }
 0x40d   :  { %12874 = vst [vmem:[#allocation7_spill] sm:$0xff] %v11188_v2  ;;  %v11190_v7 = vpop.f32.mrb[51].mxu1 }
 0x40e   :  { %12875 = vst [vmem:[#allocation8_spill] sm:$0xff] %v11190_v7 }
 0x412   :  { %3727 = vmatmul.mubr.bf16.gmra.mrb[72].mxu0 %v9548_v15  ;;  %v11195_v13 = vpop.f32.mrb[52].mxu1 }
 0x413   :  { %3736 = vmatprep.mubr.bf16.mxu0 %v12854_v47  ;;  %12876 = vst [vmem:[#allocation9_spill] sm:$0xff] %v11195_v13  ;;  %v11198_v28 = vpop.f32.mrb[53].mxu1 }
 0x414   :  { %12877 = vst [vmem:[#allocation10_spill] sm:$0xff] %v11198_v28  ;;  %v11200_v39 = vpop.f32.mrb[54].mxu1 }
 0x415   :  { %12878 = vst [vmem:[#allocation11_spill] sm:$0xff] %v11200_v39  ;;  %v11202_v45 = vpop.f32.mrb[55].mxu1 }
 0x416   :  { %12879 = vst [vmem:[#allocation12_spill] sm:$0xff] %v11202_v45 }
 0x41a   :  { %3737 = vmatmul.mubr.bf16.gmra.mrb[76].mxu0 %v9549_v20  ;;  %v11207_v15 = vpop.f32.mrb[56].mxu1 }
 0x41b   :  { %3746 = vmatprep.mubr.bf16.mxu0 %v12854_v47  ;;  %12880 = vst [vmem:[#allocation13_spill] sm:$0xff] %v11207_v15  ;;  %v11210_v20 = vpop.f32.mrb[57].mxu1 }
 0x41c   :  { %12881 = vst [vmem:[#allocation14_spill] sm:$0xff] %v11210_v20 }
 0x422   :  { %3747 = vmatmul.mubr.bf16.gmra.mrb[80].mxu0 %v9551_v29  ;;  %v11212_v29 = vpop.f32.mrb[58].mxu1 }
 0x423   :  { %3756 = vmatprep.mubr.bf16.mxu0 %v12854_v47  ;;  %12882 = vst [vmem:[#allocation15_spill] sm:$0xff] %v11212_v29 }
 0x42a   :  { %3757 = vmatmul.mubr.bf16.gmra.mrb[84].mxu0 %v9553_v37  ;;  %v11214_v37 = vpop.f32.mrb[59].mxu1 }
 0x42b   :  { %3766 = vmatprep.mubr.bf16.mxu0 %v12854_v47  ;;  %12883 = vst [vmem:[#allocation16_spill] sm:$0xff] %v11214_v37  ;;  %v11219_v45 = vpop.f32.mrb[60].mxu1  ;;  %v9561_v37 = vld [vmem:[%s12736_s0 + $0x2a8] ss:$12 sps:$4 sm:$0xff]  }
 0x42c   :  { %12884 = vst [vmem:[#allocation17_spill] sm:$0xff] %v11219_v45 }
 0x432   :  { %3767 = vmatmul.mubr.bf16.gmra.mrb[88].mxu0 %v9554_v52  ;;  %v9559_v52 = vld [vmem:[%s12736_s0 + $0x290] ss:$12 sps:$4 sm:$0xff]  }
 0x433   :  { %3776 = vmatprep.mubr.bf16.mxu0 %v12854_v47 }
 0x43a   :  { %3777 = vmatmul.mubr.bf16.gmra.mrb[92].mxu0 %v9556_v9  ;;  %v3927_v9 = vlaneseq }
 0x43b   :  { %3786 = vmatprep.mubr.bf16.mxu0 %v12854_v47 }
 0x43c   :  { %v11224_v15 = vshrl.u32 %v3927_v9, 7 }
 0x43e   :  { %12886 = vst [vmem:[#allocation19_spill] sm:$0xff] %v11224_v15  ;;  %v12779_v29 = vsub.s32 0, %v11224_v15  ;;  %v12780_v45 = vsub.s32 1, %v11224_v15 }
 0x442   :  { %3787 = vmatmul.mubr.bf16.gmra.mrb[96].mxu0 %v9557_v54  ;;  %v11222_v54 = vpop.f32.mrb[61].mxu1 }
 0x443   :  { %3796 = vmatprep.mubr.bf16.mxu0 %v12854_v47  ;;  %12885 = vst [vmem:[#allocation18_spill] sm:$0xff] %v11222_v54  ;;  %v11226_v39 = vpop.f32.mrb[62].mxu1 }
 0x444   :  { %12887 = vst [vmem:[#allocation20_spill] sm:$0xff] %v11226_v39  ;;  %v11228_v20 = vpop.f32.mrb[63].mxu1 }
 0x445   :  { %12888 = vst [vmem:[#allocation21_spill] sm:$0xff] %v11228_v20  ;;  %v11238_v54 = vpop.f32.mrb[64].mxu1 }
 0x446   :  { %12889 = vst [vmem:[#allocation22_spill] sm:$0xff] %v11238_v54  ;;  %v11240_v9 = vpop.f32.mrb[65].mxu1 }
 0x447   :  { %12890 = vst [vmem:[#allocation23_spill] sm:$0xff] %v11240_v9  ;;  %v11246_v39 = vpop.f32.mrb[66].mxu1 }
 0x448   :  { %12891 = vst [vmem:[#allocation24_spill] sm:$0xff] %v11246_v39  ;;  %v11252_v7 = vpop.f32.mrb[67].mxu1 }
 0x449   :  { %12892 = vst [vmem:[#allocation25_spill] sm:$0xff] %v11252_v7 }
 0x44a   :  { %3797 = vmatmul.mubr.bf16.gmra.mrb[100].mxu0 %v9559_v52  ;;  %v3925_v52 = vld [vmem:[%s12738_s2] sm:$0x3] }
 0x44b   :  { %3806 = vmatprep.mubr.bf16.mxu0 %v12854_v47  ;;  %v11244_v20 = vrot.slane %v3925_v52, %v12779_v29  ;;  %v11250_v13 = vrot.slane %v3925_v52, %v12780_v45  ;;  %v11261_v45 = vpop.f32.mrb[68].mxu1 }
 0x44c   :  { %12893 = vst [vmem:[#allocation26_spill] sm:$0xff] %v11261_v45 }
 0x452   :  { %3807 = vmatmul.mubr.bf16.gmra.mrb[104].mxu0 %v9561_v37 }
 0x455   :  { %v3548_v28 = vpop.f32.mrb[0].mxu0 }
 0x456   :  { %v8552_v2 = vadd.f32 %v3548_v28, %v11035_v59  ;;  %v3550_v37 = vpop.f32.mrb[1].mxu0  ;;  %v11264_v59 = vpop.f32.mrb[69].mxu1 }
 0x457   :  { %v8553_v54 = vadd.f32 %v3550_v37, %v11038_v60  ;;  %v3552_v56 = vpop.f32.mrb[2].mxu0  ;;  %v11266_v37 = vpop.f32.mrb[70].mxu1 }
 0x458   :  { %v3937_v9 = vadd.f32 %v8552_v2, %v11244_v20  ;;  %v8554_v29 = vadd.f32 %v3552_v56, %v11040_v63  ;;  %v3554_v55 = vpop.f32.mrb[3].mxu0  ;;  %12894 = vst [vmem:[#allocation27_spill] sm:$0xff] %v11266_v37  ;;  %v11268_v56 = vpop.f32.mrb[71].mxu1 }
 0x459   :  { %v3938_v39 = vadd.f32 %v8553_v54, %v11250_v13  ;;  %v8555_v46 = vadd.f32 %v3554_v55, %v11042_v0 }
 0x45a   :  { %v3939_v52 = vadd.f32 %v8554_v29, %v11244_v20  ;;  %v4045_v28 = vmax.f32 %v3937_v9, 0.0 }
 0x45b   :  { %v3940_v15 = vadd.f32 %v8555_v46, %v11250_v13  ;;  %v4046_v2 = vmax.f32 %v3938_v39, 0.0 }
 0x45c   :  { %v4047_v60 = vmax.f32 %v3939_v52, 0.0 }
 0x45d   :  { %v4048_v7 = vmax.f32 %v3940_v15, 0.0  ;;  %v3558_v63 = vpop.f32.mrb[4].mxu0 }
 0x45e   :  { %v11270_v54 = vpack.c.bf16 %v4047_v60, %v4045_v28  ;;  %v8556_v0 = vadd.f32 %v3558_v63, %v11047_v3  ;;  %v3560_v55 = vpop.f32.mrb[5].mxu0  ;;  %v11281_v60 = vpop.f32.mrb[72].mxu1 }
 0x45f   :  { %v8557_v29 = vadd.f32 %v3560_v55, %v11050_v4  ;;  %v3562_v45 = vpop.f32.mrb[6].mxu0  ;;  %v11274_v46 = vpack.c.bf16 %v4048_v7, %v4046_v2  ;;  %v11284_v63 = vpop.f32.mrb[73].mxu1 }
 0x460   :  { %12895 = vst [vmem:[#allocation28_spill] sm:$0xff] %v11270_v54  ;;  %v3941_v9 = vadd.f32 %v8556_v0, %v11244_v20  ;;  %v8558_v52 = vadd.f32 %v3562_v45, %v11052_v5  ;;  %v3564_v37 = vpop.f32.mrb[7].mxu0  ;;  %v11286_v2 = vpop.f32.mrb[74].mxu1 }
 0x461   :  { %12896 = vst [vmem:[#allocation29_spill] sm:$0xff] %v11274_v46  ;;  %v3942_v39 = vadd.f32 %v8557_v29, %v11250_v13  ;;  %v8559_v15 = vadd.f32 %v3564_v37, %v11054_v6  ;;  %v11288_v45 = vpop.f32.mrb[75].mxu1 }
 0x462   :  { %v3943_v28 = vadd.f32 %v8558_v52, %v11244_v20  ;;  %v4049_v4 = vmax.f32 %v3941_v9, 0.0  ;;  %v9563_v9 = vld [vmem:[%s12737_s3] sm:$0xff]  }
 0x463   :  { %v3944_v3 = vadd.f32 %v8559_v15, %v11250_v13  ;;  %v4050_v0 = vmax.f32 %v3942_v39, 0.0 }
 0x464   :  { %v4051_v7 = vmax.f32 %v3943_v28, 0.0 }
 0x465   :  { %v4052_v55 = vmax.f32 %v3944_v3, 0.0  ;;  %v3568_v5 = vpop.f32.mrb[8].mxu0 }
 0x466   :  { %v11290_v29 = vpack.c.bf16 %v4051_v7, %v4049_v4  ;;  %v8560_v6 = vadd.f32 %v3568_v5, %v11059_v8  ;;  %v3570_v37 = vpop.f32.mrb[9].mxu0 }
 0x467   :  { %v8561_v52 = vadd.f32 %v3570_v37, %v11065_v10  ;;  %v3572_v54 = vpop.f32.mrb[10].mxu0  ;;  %v11294_v15 = vpack.c.bf16 %v4052_v55, %v4050_v0  ;;  %v11306_v10 = vpop.f32.mrb[76].mxu1 }
 0x468   :  { %12897 = vst [vmem:[#allocation30_spill] sm:$0xff] %v11290_v29  ;;  %v3945_v39 = vadd.f32 %v8560_v6, %v11244_v20  ;;  %v8562_v28 = vadd.f32 %v3572_v54, %v11067_v11  ;;  %v3574_v3 = vpop.f32.mrb[11].mxu0  ;;  %v9564_v11 = vld [vmem:[%s12737_s3 + $0x8] sm:$0xff]   ;;  %v11312_v54 = vpop.f32.mrb[77].mxu1 }
 0x469   :  { %12898 = vst [vmem:[#allocation31_spill] sm:$0xff] %v11294_v15  ;;  %v3946_v4 = vadd.f32 %v8561_v52, %v11250_v13  ;;  %v8563_v7 = vadd.f32 %v3574_v3, %v11069_v12  ;;  %4506 = vmatprep.mubr.bf16.mxu1 %v11294_v15  ;;  %v11315_v12 = vpop.f32.mrb[78].mxu1 }
 0x46a   :  { %v3947_v8 = vadd.f32 %v8562_v28, %v11244_v20  ;;  %4507 = vmatmul.mubr.bf16.vlgmr.msra.gmra.mrb[108].mxu1 %v11290_v29  ;;  %v4053_v55 = vmax.f32 %v3945_v39, 0.0  ;;  %v11317_v28 = vpop.f32.mrb[79].mxu1  ;;  %v9565_v39 = vld [vmem:[%s12737_s3 + $0x10] sm:$0xff]  }
 0x46b   :  { %v3948_v0 = vadd.f32 %v8563_v7, %v11250_v13  ;;  %4804 = vmatpush1.bf16.msra.mxu1 %v9563_v9  ;;  %v4054_v6 = vmax.f32 %v3946_v4, 0.0 }
 0x46c   :  { %v4055_v5 = vmax.f32 %v3947_v8, 0.0  ;;  %4805 = vmatprep.subr.bf16.mxu1 %v12854_v47 }
 0x46d   :  { %v4056_v37 = vmax.f32 %v3948_v0, 0.0  ;;  %v3578_v52 = vpop.f32.mrb[12].mxu0 }
 0x46e   :  { %v8564_v3 = vadd.f32 %v3578_v52, %v11075_v1  ;;  %v3580_v9 = vpop.f32.mrb[13].mxu0  ;;  %v11320_v7 = vpack.c.bf16 %v4055_v5, %v4053_v55 }
 0x46f   :  { %v8565_v29 = vadd.f32 %v3580_v9, %v11078_v21  ;;  %v3582_v15 = vpop.f32.mrb[14].mxu0  ;;  %v11323_v46 = vpack.c.bf16 %v4056_v37, %v4054_v6  ;;  %4806 = vmatpush1.bf16.msra.mxu1 %v9564_v11  ;;  %v11336_v11 = vpop.f32.mrb[80].mxu1 }
 0x470   :  { %12899 = vst [vmem:[#allocation32_spill] sm:$0xff] %v11320_v7  ;;  %v3949_v4 = vadd.f32 %v8564_v3, %v11244_v20  ;;  %v8566_v8 = vadd.f32 %v3582_v15, %v11080_v22  ;;  %v3584_v0 = vpop.f32.mrb[15].mxu0  ;;  %4807 = vmatprep.subr.bf16.mxu1 %v12854_v47  ;;  %v9566_v22 = vld [vmem:[%s12737_s3 + $0x18] sm:$0xff]   ;;  %v11342_v15 = vpop.f32.mrb[81].mxu1 }
 0x471   :  { %12900 = vst [vmem:[#allocation33_spill] sm:$0xff] %v11323_v46  ;;  %v3950_v1 = vadd.f32 %v8565_v29, %v11250_v13  ;;  %v8567_v55 = vadd.f32 %v3584_v0, %v11082_v27  ;;  %4514 = vmatprep.mubr.bf16.mxu1 %v11323_v46  ;;  %v11345_v27 = vpop.f32.mrb[82].mxu1 }
 0x472   :  { %v3951_v21 = vadd.f32 %v8566_v8, %v11244_v20  ;;  %4515 = vmatmul.mubr.bf16.gmra.mrb[112].mxu1 %v11320_v7  ;;  %v4057_v29 = vmax.f32 %v3949_v4, 0.0  ;;  %v11347_v9 = vpop.f32.mrb[83].mxu1  ;;  %v9567_v4 = vld [vmem:[%s12737_s3 + $0x20] sm:$0xff]  }
 0x473   :  { %v3952_v5 = vadd.f32 %v8567_v55, %v11250_v13  ;;  %4808 = vmatpush1.bf16.msra.mxu1 %v9565_v39  ;;  %v4058_v37 = vmax.f32 %v3950_v1, 0.0 }
 0x474   :  { %v4059_v6 = vmax.f32 %v3951_v21, 0.0  ;;  %4809 = vmatprep.subr.bf16.mxu1 %v12854_v47 }
 0x475   :  { %v4060_v52 = vmax.f32 %v3952_v5, 0.0  ;;  %v3588_v3 = vpop.f32.mrb[16].mxu0 }
 0x476   :  { %v8568_v8 = vadd.f32 %v3588_v3, %v11087_v32  ;;  %v3590_v39 = vpop.f32.mrb[17].mxu0  ;;  %v11350_v0 = vpack.c.bf16 %v4059_v6, %v4057_v29 }
 0x477   :  { %v8569_v55 = vadd.f32 %v3590_v39, %v11090_v33  ;;  %v3592_v7 = vpop.f32.mrb[18].mxu0  ;;  %v11353_v46 = vpack.c.bf16 %v4060_v52, %v4058_v37  ;;  %4810 = vmatpush1.bf16.msra.mxu1 %v9566_v22  ;;  %v11366_v22 = vpop.f32.mrb[84].mxu1 }
 0x478   :  { %12901 = vst [vmem:[#allocation34_spill] sm:$0xff] %v11350_v0  ;;  %v3953_v1 = vadd.f32 %v8568_v8, %v11244_v20  ;;  %v8570_v21 = vadd.f32 %v3592_v7, %v11092_v34  ;;  %v3594_v5 = vpop.f32.mrb[19].mxu0  ;;  %4811 = vmatprep.subr.bf16.mxu1 %v12854_v47  ;;  %v9568_v34 = vld [vmem:[%s12737_s3 + $0x28] sm:$0xff]   ;;  %v11372_v7 = vpop.f32.mrb[85].mxu1 }
 0x479   :  { %12902 = vst [vmem:[#allocation35_spill] sm:$0xff] %v11353_v46  ;;  %v3954_v32 = vadd.f32 %v8569_v55, %v11250_v13  ;;  %v8571_v29 = vadd.f32 %v3594_v5, %v11094_v35  ;;  %4522 = vmatprep.mubr.bf16.mxu1 %v11353_v46  ;;  %v11375_v35 = vpop.f32.mrb[86].mxu1 }
 0x47a   :  { %v3955_v33 = vadd.f32 %v8570_v21, %v11244_v20  ;;  %4523 = vmatmul.mubr.bf16.gmra.mrb[116].mxu1 %v11350_v0  ;;  %v4061_v37 = vmax.f32 %v3953_v1, 0.0  ;;  %v11377_v55 = vpop.f32.mrb[87].mxu1  ;;  %v9569_v1 = vld [vmem:[%s12737_s3 + $0x30] sm:$0xff]  }
 0x47b   :  { %v3956_v6 = vadd.f32 %v8571_v29, %v11250_v13  ;;  %4812 = vmatpush1.bf16.msra.mxu1 %v9567_v4  ;;  %v4062_v3 = vmax.f32 %v3954_v32, 0.0 }
 0x47c   :  { %v4063_v52 = vmax.f32 %v3955_v33, 0.0  ;;  %4813 = vmatprep.subr.bf16.mxu1 %v12854_v47 }
 0x47d   :  { %v4064_v8 = vmax.f32 %v3956_v6, 0.0  ;;  %v3598_v39 = vpop.f32.mrb[20].mxu0 }
 0x47e   :  { %v8572_v21 = vadd.f32 %v3598_v39, %v11099_v40  ;;  %v3600_v4 = vpop.f32.mrb[21].mxu0  ;;  %v11380_v5 = vpack.c.bf16 %v4063_v52, %v4061_v37 }
 0x47f   :  { %v8573_v29 = vadd.f32 %v3600_v4, %v11102_v41  ;;  %v3602_v0 = vpop.f32.mrb[22].mxu0  ;;  %v11383_v46 = vpack.c.bf16 %v4064_v8, %v4062_v3  ;;  %4814 = vmatpush1.bf16.msra.mxu1 %v9568_v34  ;;  %v11396_v34 = vpop.f32.mrb[88].mxu1 }
 0x480   :  { %12903 = vst [vmem:[#allocation36_spill] sm:$0xff] %v11380_v5  ;;  %v3957_v32 = vadd.f32 %v8572_v21, %v11244_v20  ;;  %v8574_v33 = vadd.f32 %v3602_v0, %v11104_v42  ;;  %v3604_v6 = vpop.f32.mrb[23].mxu0  ;;  %4815 = vmatprep.subr.bf16.mxu1 %v12854_v47  ;;  %v9570_v42 = vld [vmem:[%s12737_s3 + $0x38] sm:$0xff]   ;;  %v11402_v0 = vpop.f32.mrb[89].mxu1 }
 0x481   :  { %12904 = vst [vmem:[#allocation37_spill] sm:$0xff] %v11383_v46  ;;  %v3958_v40 = vadd.f32 %v8573_v29, %v11250_v13  ;;  %v8575_v37 = vadd.f32 %v3604_v6, %v11106_v44  ;;  %4530 = vmatprep.mubr.bf16.mxu1 %v11383_v46  ;;  %v11405_v44 = vpop.f32.mrb[90].mxu1 }
 0x482   :  { %v3959_v41 = vadd.f32 %v8574_v33, %v11244_v20  ;;  %4531 = vmatmul.mubr.bf16.gmra.mrb[120].mxu1 %v11380_v5  ;;  %v4065_v3 = vmax.f32 %v3957_v32, 0.0  ;;  %v11407_v29 = vpop.f32.mrb[91].mxu1  ;;  %v9571_v32 = vld [vmem:[%s12737_s3 + $0x40] sm:$0xff]  }
 0x483   :  { %v3960_v52 = vadd.f32 %v8575_v37, %v11250_v13  ;;  %4816 = vmatpush1.bf16.msra.mxu1 %v9569_v1  ;;  %v4066_v39 = vmax.f32 %v3958_v40, 0.0 }
 0x484   :  { %v4067_v8 = vmax.f32 %v3959_v41, 0.0  ;;  %4817 = vmatprep.subr.bf16.mxu1 %v12854_v47 }
 0x485   :  { %v4068_v21 = vmax.f32 %v3960_v52, 0.0  ;;  %v3608_v4 = vpop.f32.mrb[24].mxu0 }
 0x486   :  { %v8576_v33 = vadd.f32 %v3608_v4, %v11111_v49  ;;  %v3610_v1 = vpop.f32.mrb[25].mxu0  ;;  %v11410_v6 = vpack.c.bf16 %v4067_v8, %v4065_v3 }
 0x487   :  { %v8577_v37 = vadd.f32 %v3610_v1, %v11114_v50  ;;  %v3612_v5 = vpop.f32.mrb[26].mxu0  ;;  %v11413_v46 = vpack.c.bf16 %v4068_v21, %v4066_v39  ;;  %4818 = vmatpush1.bf16.msra.mxu1 %v9570_v42  ;;  %v11426_v42 = vpop.f32.mrb[92].mxu1 }
 0x488   :  { %12905 = vst [vmem:[#allocation38_spill] sm:$0xff] %v11410_v6  ;;  %v3961_v40 = vadd.f32 %v8576_v33, %v11244_v20  ;;  %v8578_v41 = vadd.f32 %v3612_v5, %v11116_v51  ;;  %v3614_v52 = vpop.f32.mrb[27].mxu0  ;;  %4819 = vmatprep.subr.bf16.mxu1 %v12854_v47  ;;  %v9572_v51 = vld [vmem:[%s12737_s3 + $0x48] sm:$0xff]   ;;  %v11432_v5 = vpop.f32.mrb[93].mxu1 }
 0x489   :  { %12906 = vst [vmem:[#allocation39_spill] sm:$0xff] %v11413_v46  ;;  %v3962_v49 = vadd.f32 %v8577_v37, %v11250_v13  ;;  %v8579_v3 = vadd.f32 %v3614_v52, %v11118_v53  ;;  %4538 = vmatprep.mubr.bf16.mxu1 %v11413_v46  ;;  %v11435_v53 = vpop.f32.mrb[94].mxu1 }
 0x48a   :  { %v3963_v50 = vadd.f32 %v8578_v41, %v11244_v20  ;;  %4539 = vmatmul.mubr.bf16.gmra.mrb[124].mxu1 %v11410_v6  ;;  %v4069_v39 = vmax.f32 %v3961_v40, 0.0  ;;  %v11437_v37 = vpop.f32.mrb[95].mxu1  ;;  %v9573_v40 = vld [vmem:[%s12737_s3 + $0x50] sm:$0xff]  }
 0x48b   :  { %v3964_v8 = vadd.f32 %v8579_v3, %v11250_v13  ;;  %4820 = vmatpush1.bf16.msra.mxu1 %v9571_v32  ;;  %v4070_v4 = vmax.f32 %v3962_v49, 0.0 }
 0x48c   :  { %v4071_v21 = vmax.f32 %v3963_v50, 0.0  ;;  %4821 = vmatprep.subr.bf16.mxu1 %v12854_v47 }
 0x48d   :  { %v4072_v33 = vmax.f32 %v3964_v8, 0.0  ;;  %v3618_v1 = vpop.f32.mrb[28].mxu0 }
 0x48e   :  { %v8580_v41 = vadd.f32 %v3618_v1, %v11123_v57  ;;  %v3620_v32 = vpop.f32.mrb[29].mxu0  ;;  %v11440_v52 = vpack.c.bf16 %v4071_v21, %v4069_v39 }
 0x48f   :  { %v8581_v3 = vadd.f32 %v3620_v32, %v11126_v58  ;;  %v3622_v6 = vpop.f32.mrb[30].mxu0  ;;  %v11443_v46 = vpack.c.bf16 %v4072_v33, %v4070_v4  ;;  %4822 = vmatpush1.bf16.msra.mxu1 %v9572_v51  ;;  %v11456_v51 = vpop.f32.mrb[96].mxu1 }
 0x490   :  { %12907 = vst [vmem:[#allocation40_spill] sm:$0xff] %v11440_v52  ;;  %v3965_v49 = vadd.f32 %v8580_v41, %v11244_v20  ;;  %v8582_v50 = vadd.f32 %v3622_v6, %v11128_v61  ;;  %v3624_v8 = vpop.f32.mrb[31].mxu0  ;;  %4823 = vmatprep.subr.bf16.mxu1 %v12854_v47  ;;  %v9574_v61 = vld [vmem:[%s12737_s3 + $0x58] sm:$0xff]   ;;  %v11462_v6 = vpop.f32.mrb[97].mxu1 }
 0x491   :  { %12908 = vst [vmem:[#allocation41_spill] sm:$0xff] %v11443_v46  ;;  %v3966_v57 = vadd.f32 %v8581_v3, %v11250_v13  ;;  %v8583_v39 = vadd.f32 %v3624_v8, %v11130_v14  ;;  %4546 = vmatprep.mubr.bf16.mxu1 %v11443_v46  ;;  %v11465_v14 = vpop.f32.mrb[98].mxu1 }
 0x492   :  { %v3967_v58 = vadd.f32 %v8582_v50, %v11244_v20  ;;  %4547 = vmatmul.mubr.bf16.gmra.mrb[128].mxu1 %v11440_v52  ;;  %v4073_v4 = vmax.f32 %v3965_v49, 0.0  ;;  %v11467_v3 = vpop.f32.mrb[99].mxu1  ;;  %v9575_v49 = vld [vmem:[%s12737_s3 + $0x60] sm:$0xff]  }
 0x493   :  { %v3968_v21 = vadd.f32 %v8583_v39, %v11250_v13  ;;  %4824 = vmatpush1.bf16.msra.mxu1 %v9573_v40  ;;  %v4074_v1 = vmax.f32 %v3966_v57, 0.0 }
 0x494   :  { %v4075_v33 = vmax.f32 %v3967_v58, 0.0  ;;  %4825 = vmatprep.subr.bf16.mxu1 %v12854_v47 }
 0x495   :  { %v4076_v41 = vmax.f32 %v3968_v21, 0.0  ;;  %v3628_v32 = vpop.f32.mrb[32].mxu0 }
 0x496   :  { %v8584_v50 = vadd.f32 %v3628_v32, %v11135_v16  ;;  %v3630_v40 = vpop.f32.mrb[33].mxu0  ;;  %v11470_v8 = vpack.c.bf16 %v4075_v33, %v4073_v4 }
 0x497   :  { %v8585_v39 = vadd.f32 %v3630_v40, %v11138_v17  ;;  %v3632_v52 = vpop.f32.mrb[34].mxu0  ;;  %v11473_v46 = vpack.c.bf16 %v4076_v41, %v4074_v1  ;;  %4826 = vmatpush1.bf16.msra.mxu1 %v9574_v61  ;;  %v11486_v61 = vpop.f32.mrb[100].mxu1 }
 0x498   :  { %12909 = vst [vmem:[#allocation42_spill] sm:$0xff] %v11470_v8  ;;  %v3969_v57 = vadd.f32 %v8584_v50, %v11244_v20  ;;  %v8586_v58 = vadd.f32 %v3632_v52, %v11140_v18  ;;  %v3634_v21 = vpop.f32.mrb[35].mxu0  ;;  %4827 = vmatprep.subr.bf16.mxu1 %v12854_v47  ;;  %v9576_v18 = vld [vmem:[%s12737_s3 + $0x68] sm:$0xff]   ;;  %v11492_v52 = vpop.f32.mrb[101].mxu1 }
 0x499   :  { %12910 = vst [vmem:[#allocation43_spill] sm:$0xff] %v11473_v46  ;;  %v3970_v16 = vadd.f32 %v8585_v39, %v11250_v13  ;;  %v8587_v4 = vadd.f32 %v3634_v21, %v11142_v19  ;;  %4554 = vmatprep.mubr.bf16.mxu1 %v11473_v46  ;;  %v11495_v19 = vpop.f32.mrb[102].mxu1 }
 0x49a   :  { %v3971_v17 = vadd.f32 %v8586_v58, %v11244_v20  ;;  %4555 = vmatmul.mubr.bf16.gmra.mrb[132].mxu1 %v11470_v8  ;;  %v4077_v1 = vmax.f32 %v3969_v57, 0.0  ;;  %v11497_v39 = vpop.f32.mrb[103].mxu1  ;;  %v9577_v57 = vld [vmem:[%s12737_s3 + $0x70] sm:$0xff]  }
 0x49b   :  { %v3972_v33 = vadd.f32 %v8587_v4, %v11250_v13  ;;  %4828 = vmatpush1.bf16.msra.mxu1 %v9575_v49  ;;  %v4078_v32 = vmax.f32 %v3970_v16, 0.0 }
 0x49c   :  { %v4079_v41 = vmax.f32 %v3971_v17, 0.0  ;;  %4829 = vmatprep.subr.bf16.mxu1 %v12854_v47 }
 0x49d   :  { %v4080_v50 = vmax.f32 %v3972_v33, 0.0  ;;  %v3638_v40 = vpop.f32.mrb[36].mxu0 }
 0x49e   :  { %v8588_v58 = vadd.f32 %v3638_v40, %v11147_v23  ;;  %v3640_v49 = vpop.f32.mrb[37].mxu0  ;;  %v11500_v21 = vpack.c.bf16 %v4079_v41, %v4077_v1  ;;  %v11518_v40 = vpop.f32.mrb[104].mxu1 }
 0x49f   :  { %v8589_v4 = vadd.f32 %v3640_v49, %v11150_v24  ;;  %v3642_v8 = vpop.f32.mrb[38].mxu0  ;;  %v11503_v46 = vpack.c.bf16 %v4080_v50, %v4078_v32  ;;  %4830 = vmatpush1.bf16.msra.mxu1 %v9576_v18 }
 0x4a0   :  { %v3973_v16 = vadd.f32 %v8588_v58, %v11244_v20  ;;  %v8590_v17 = vadd.f32 %v3642_v8, %v11152_v25  ;;  %v3644_v33 = vpop.f32.mrb[39].mxu0  ;;  %4831 = vmatprep.subr.bf16.mxu1 %v12854_v47 }
 0x4a1   :  { %v3974_v23 = vadd.f32 %v8589_v4, %v11250_v13  ;;  %v8591_v1 = vadd.f32 %v3644_v33, %v11154_v26  ;;  %4562 = vmatprep.mubr.bf16.mxu1 %v11503_v46  ;;  %v11523_v4 = vpop.f32.mrb[105].mxu1 }
 0x4a2   :  { %v3975_v24 = vadd.f32 %v8590_v17, %v11244_v20  ;;  %4563 = vmatmul.mubr.bf16.gmra.mrb[136].mxu1 %v11500_v21  ;;  %v4081_v41 = vmax.f32 %v3973_v16, 0.0  ;;  %v11528_v16 = vpop.f32.mrb[106].mxu1 }
 0x4a3   :  { %v3976_v18 = vadd.f32 %v8591_v1, %v11250_v13  ;;  %4832 = vmatpush1.bf16.msra.mxu1 %v9577_v57  ;;  %v4082_v25 = vmax.f32 %v3974_v23, 0.0 }
 0x4a4   :  { %v4083_v32 = vmax.f32 %v3975_v24, 0.0  ;;  %4833 = vmatprep.subr.bf16.mxu1 %v12854_v47 }
 0x4a5   :  { %v4084_v8 = vmax.f32 %v3976_v18, 0.0  ;;  %v3648_v50 = vpop.f32.mrb[40].mxu0  ;;  %v11532_v18 = vpop.f32.mrb[107].mxu1 }
 0x4a6   :  { %v8592_v26 = vadd.f32 %v3648_v50, %v11159_v30  ;;  %v3650_v58 = vpop.f32.mrb[41].mxu0  ;;  %v11521_v49 = vpack.c.bf16 %v4083_v32, %v4081_v41 }
 0x4a7   :  { %v8593_v17 = vadd.f32 %v3650_v58, %v11162_v62  ;;  %v3652_v33 = vpop.f32.mrb[42].mxu0  ;;  %v11526_v57 = vpack.c.bf16 %v4084_v8, %v4082_v25  ;;  %v9578_v58 = vld [vmem:[%s12737_s3 + $0x78] sm:$0xff]  }
 0x4a8   :  { %12911 = vst [vmem:[#allocation44_spill] sm:$0xff] %v11521_v49  ;;  %v3977_v23 = vadd.f32 %v8592_v26, %v11244_v20  ;;  %v8594_v1 = vadd.f32 %v3652_v33, %v11164_v31  ;;  %v3654_v24 = vpop.f32.mrb[43].mxu0  ;;  %4834 = vmatpush1.bf16.msra.mxu1 %v9578_v58  ;;  %v12916_v58 = vld [vmem:[#allocation5_spill] sm:$0xff] }
 0x4a9   :  { %12912 = vst [vmem:[#allocation45_spill] sm:$0xff] %v11526_v57  ;;  %v3978_v30 = vadd.f32 %v8593_v17, %v11250_v13  ;;  %v8595_v41 = vadd.f32 %v3654_v24, %v11166_v38  ;;  %4570 = vmatprep.mubr.bf16.mxu1 %v11526_v57  ;;  %5215 = vmatprep.subr.bf16.mxu1 %v12854_v47 }
 0x4aa   :  { %v3979_v62 = vadd.f32 %v8594_v1, %v11244_v20  ;;  %4571 = vmatmul.mubr.bf16.gmra.mrb[140].mxu1 %v11521_v49  ;;  %v4085_v25 = vmax.f32 %v3977_v23, 0.0 }
 0x4ab   :  { %v3980_v32 = vadd.f32 %v8595_v41, %v11250_v13  ;;  %v4086_v50 = vmax.f32 %v3978_v30, 0.0 }
 0x4ac   :  { %v4087_v8 = vmax.f32 %v3979_v62, 0.0 }
 0x4ad   :  { %v4088_v26 = vmax.f32 %v3980_v32, 0.0  ;;  %v3658_v31 = vpop.f32.mrb[44].mxu0  ;;  %v12915_v32 = vld [vmem:[#allocation4_spill] sm:$0xff] }
 0x4ae   :  { %v8596_v17 = vadd.f32 %v3658_v31, %v11171_v36  ;;  %v3660_v38 = vpop.f32.mrb[45].mxu0  ;;  %v11544_v33 = vpack.c.bf16 %v4087_v8, %v4085_v25 }
 0x4af   :  { %v8597_v1 = vadd.f32 %v3660_v38, %v11174_v43  ;;  %v3662_v24 = vpop.f32.mrb[46].mxu0  ;;  %v11547_v49 = vpack.c.bf16 %v4088_v26, %v4086_v50 }
 0x4b0   :  { %12913 = vst [vmem:[#allocation46_spill] sm:$0xff] %v11544_v33  ;;  %v3981_v23 = vadd.f32 %v8596_v17, %v11244_v20  ;;  %v8598_v30 = vadd.f32 %v3662_v24, %v11176_v48  ;;  %v3664_v41 = vpop.f32.mrb[47].mxu0 }
 0x4b1   :  { %12914 = vst [vmem:[#allocation47_spill] sm:$0xff] %v11547_v49  ;;  %v3982_v62 = vadd.f32 %v8597_v1, %v11250_v13  ;;  %v8599_v36 = vadd.f32 %v3664_v41, %v12915_v32  ;;  %4578 = vmatprep.mubr.bf16.mxu1 %v11547_v49  ;;  %v12918_v1 = vld [vmem:[#allocation6_spill] sm:$0xff] }
 0x4b2   :  { %v3983_v25 = vadd.f32 %v8598_v30, %v11244_v20  ;;  %4579 = vmatmul.mubr.bf16.gmra.mrb[144].mxu1 %v11544_v33  ;;  %v4089_v8 = vmax.f32 %v3981_v23, 0.0  ;;  %v12920_v33 = vld [vmem:[#allocation7_spill] sm:$0xff] }
 0x4b3   :  { %v3984_v43 = vadd.f32 %v8599_v36, %v11250_v13  ;;  %v4090_v26 = vmax.f32 %v3982_v62, 0.0  ;;  %v12921_v62 = vld [vmem:[#allocation8_spill] sm:$0xff] }
 0x4b4   :  { %v4091_v50 = vmax.f32 %v3983_v25, 0.0 }
 0x4b5   :  { %v4092_v31 = vmax.f32 %v3984_v43, 0.0  ;;  %v3668_v48 = vpop.f32.mrb[48].mxu0 }
 0x4b6   :  { %v8600_v17 = vadd.f32 %v3668_v48, %v12916_v58  ;;  %v3670_v38 = vpop.f32.mrb[49].mxu0  ;;  %v11559_v24 = vpack.c.bf16 %v4091_v50, %v4089_v8 }
 0x4b7   :  { %v8601_v41 = vadd.f32 %v3670_v38, %v12918_v1  ;;  %v3672_v32 = vpop.f32.mrb[50].mxu0  ;;  %v11562_v49 = vpack.c.bf16 %v4092_v31, %v4090_v26 }
 0x4b8   :  { %12917 = vst [vmem:[#allocation4_spill] sm:$0xff] %v11559_v24  ;;  %v3985_v30 = vadd.f32 %v8600_v17, %v11244_v20  ;;  %v8602_v57 = vadd.f32 %v3672_v32, %v12920_v33  ;;  %v3674_v36 = vpop.f32.mrb[51].mxu0  ;;  %v12922_v17 = vld [vmem:[#allocation9_spill] sm:$0xff] }
 0x4b9   :  { %12919 = vst [vmem:[#allocation5_spill] sm:$0xff] %v11562_v49  ;;  %v3986_v23 = vadd.f32 %v8601_v41, %v11250_v13  ;;  %v8603_v25 = vadd.f32 %v3674_v36, %v12921_v62  ;;  %4586 = vmatprep.mubr.bf16.mxu1 %v11562_v49  ;;  %v12924_v41 = vld [vmem:[#allocation10_spill] sm:$0xff] }
 0x4ba   :  { %v3987_v43 = vadd.f32 %v8602_v57, %v11244_v20  ;;  %4587 = vmatmul.mubr.bf16.gmra.mrb[148].mxu1 %v11559_v24  ;;  %v4093_v50 = vmax.f32 %v3985_v30, 0.0  ;;  %v12926_v24 = vld [vmem:[#allocation11_spill] sm:$0xff] }
 0x4bb   :  { %v3988_v8 = vadd.f32 %v8603_v25, %v11250_v13  ;;  %v4094_v31 = vmax.f32 %v3986_v23, 0.0  ;;  %v12927_v23 = vld [vmem:[#allocation12_spill] sm:$0xff] }
 0x4bc   :  { %v4095_v26 = vmax.f32 %v3987_v43, 0.0 }
 0x4bd   :  { %v4096_v48 = vmax.f32 %v3988_v8, 0.0  ;;  %v3678_v58 = vpop.f32.mrb[52].mxu0 }
 0x4be   :  { %v8604_v33 = vadd.f32 %v3678_v58, %v12922_v17  ;;  %v3680_v38 = vpop.f32.mrb[53].mxu0  ;;  %v11573_v1 = vpack.c.bf16 %v4095_v26, %v4093_v50 }
 0x4bf   :  { %v8605_v32 = vadd.f32 %v3680_v38, %v12924_v41  ;;  %v3682_v36 = vpop.f32.mrb[54].mxu0  ;;  %v11576_v62 = vpack.c.bf16 %v4096_v48, %v4094_v31 }
 0x4c0   :  { %12923 = vst [vmem:[#allocation6_spill] sm:$0xff] %v11573_v1  ;;  %v3989_v57 = vadd.f32 %v8604_v33, %v11244_v20  ;;  %v8606_v49 = vadd.f32 %v3682_v36, %v12926_v24  ;;  %v3684_v25 = vpop.f32.mrb[55].mxu0  ;;  %v12928_v33 = vld [vmem:[#allocation13_spill] sm:$0xff] }
 0x4c1   :  { %12925 = vst [vmem:[#allocation7_spill] sm:$0xff] %v11576_v62  ;;  %v3990_v30 = vadd.f32 %v8605_v32, %v11250_v13  ;;  %v8607_v43 = vadd.f32 %v3684_v25, %v12927_v23  ;;  %4594 = vmatprep.mubr.bf16.mxu1 %v11576_v62  ;;  %v12930_v32 = vld [vmem:[#allocation14_spill] sm:$0xff] }
 0x4c2   :  { %v3991_v8 = vadd.f32 %v8606_v49, %v11244_v20  ;;  %4595 = vmatmul.mubr.bf16.gmra.mrb[152].mxu1 %v11573_v1  ;;  %v4097_v26 = vmax.f32 %v3989_v57, 0.0  ;;  %v12932_v1 = vld [vmem:[#allocation15_spill] sm:$0xff] }
 0x4c3   :  { %v3992_v50 = vadd.f32 %v8607_v43, %v11250_v13  ;;  %v4098_v48 = vmax.f32 %v3990_v30, 0.0  ;;  %v12933_v30 = vld [vmem:[#allocation16_spill] sm:$0xff] }
 0x4c4   :  { %v4099_v31 = vmax.f32 %v3991_v8, 0.0 }
 0x4c5   :  { %v4100_v58 = vmax.f32 %v3992_v50, 0.0  ;;  %v3688_v17 = vpop.f32.mrb[56].mxu0 }
 0x4c6   :  { %v8608_v24 = vadd.f32 %v3688_v17, %v12928_v33  ;;  %v3690_v38 = vpop.f32.mrb[57].mxu0  ;;  %v11587_v41 = vpack.c.bf16 %v4099_v31, %v4097_v26 }
 0x4c7   :  { %v8609_v36 = vadd.f32 %v3690_v38, %v12930_v32  ;;  %v3692_v25 = vpop.f32.mrb[58].mxu0  ;;  %v11590_v23 = vpack.c.bf16 %v4100_v58, %v4098_v48 }
 0x4c8   :  { %12929 = vst [vmem:[#allocation8_spill] sm:$0xff] %v11587_v41  ;;  %v3993_v49 = vadd.f32 %v8608_v24, %v11244_v20  ;;  %v8610_v62 = vadd.f32 %v3692_v25, %v12932_v1  ;;  %v3694_v43 = vpop.f32.mrb[59].mxu0  ;;  %v12934_v24 = vld [vmem:[#allocation17_spill] sm:$0xff] }
 0x4c9   :  { %12931 = vst [vmem:[#allocation9_spill] sm:$0xff] %v11590_v23  ;;  %v3994_v57 = vadd.f32 %v8609_v36, %v11250_v13  ;;  %v8611_v8 = vadd.f32 %v3694_v43, %v12933_v30  ;;  %4602 = vmatprep.mubr.bf16.mxu1 %v11590_v23  ;;  %v12936_v36 = vld [vmem:[#allocation18_spill] sm:$0xff] }
 0x4ca   :  { %v3995_v50 = vadd.f32 %v8610_v62, %v11244_v20  ;;  %4603 = vmatmul.mubr.bf16.gmra.mrb[156].mxu1 %v11587_v41  ;;  %v4101_v31 = vmax.f32 %v3993_v49, 0.0  ;;  %v12938_v41 = vld [vmem:[#allocation20_spill] sm:$0xff] }
 0x4cb   :  { %v3996_v26 = vadd.f32 %v8611_v8, %v11250_v13  ;;  %v4102_v58 = vmax.f32 %v3994_v57, 0.0  ;;  %v12939_v57 = vld [vmem:[#allocation21_spill] sm:$0xff] }
 0x4cc   :  { %v4103_v48 = vmax.f32 %v3995_v50, 0.0 }
 0x4cd   :  { %v4104_v17 = vmax.f32 %v3996_v26, 0.0  ;;  %v3698_v33 = vpop.f32.mrb[60].mxu0 }
 0x4ce   :  { %v8612_v1 = vadd.f32 %v3698_v33, %v12934_v24  ;;  %v3700_v38 = vpop.f32.mrb[61].mxu0  ;;  %v11601_v32 = vpack.c.bf16 %v4103_v48, %v4101_v31 }
 0x4cf   :  { %v8613_v25 = vadd.f32 %v3700_v38, %v12936_v36  ;;  %v3702_v43 = vpop.f32.mrb[62].mxu0  ;;  %v11604_v30 = vpack.c.bf16 %v4104_v17, %v4102_v58 }
 0x4d0   :  { %12935 = vst [vmem:[#allocation10_spill] sm:$0xff] %v11601_v32  ;;  %v3997_v62 = vadd.f32 %v8612_v1, %v11244_v20  ;;  %v8614_v23 = vadd.f32 %v3702_v43, %v12938_v41  ;;  %v3704_v8 = vpop.f32.mrb[63].mxu0  ;;  %v12940_v1 = vld [vmem:[#allocation22_spill] sm:$0xff] }
 0x4d1   :  { %12937 = vst [vmem:[#allocation11_spill] sm:$0xff] %v11604_v30  ;;  %v3998_v49 = vadd.f32 %v8613_v25, %v11250_v13  ;;  %v8615_v50 = vadd.f32 %v3704_v8, %v12939_v57  ;;  %4610 = vmatprep.mubr.bf16.mxu1 %v11604_v30  ;;  %v12942_v25 = vld [vmem:[#allocation23_spill] sm:$0xff] }
 0x4d2   :  { %v3999_v26 = vadd.f32 %v8614_v23, %v11244_v20  ;;  %4611 = vmatmul.mubr.bf16.gmra.mrb[160].mxu1 %v11601_v32  ;;  %v4105_v48 = vmax.f32 %v3997_v62, 0.0  ;;  %v12943_v32 = vld [vmem:[#allocation24_spill] sm:$0xff] }
 0x4d3   :  { %v4000_v31 = vadd.f32 %v8615_v50, %v11250_v13  ;;  %v4106_v17 = vmax.f32 %v3998_v49, 0.0  ;;  %v12944_v49 = vld [vmem:[#allocation25_spill] sm:$0xff] }
 0x4d4   :  { %v4107_v58 = vmax.f32 %v3999_v26, 0.0 }
 0x4d5   :  { %v4108_v33 = vmax.f32 %v4000_v31, 0.0  ;;  %v3708_v24 = vpop.f32.mrb[64].mxu0 }
 0x4d6   :  { %v8616_v41 = vadd.f32 %v3708_v24, %v12940_v1  ;;  %v3710_v38 = vpop.f32.mrb[65].mxu0  ;;  %v11615_v36 = vpack.c.bf16 %v4107_v58, %v4105_v48 }
 0x4d7   :  { %v8617_v43 = vadd.f32 %v3710_v38, %v12942_v25  ;;  %v3712_v8 = vpop.f32.mrb[66].mxu0  ;;  %v11618_v57 = vpack.c.bf16 %v4108_v33, %v4106_v17 }
 0x4d8   :  { %12941 = vst [vmem:[#allocation12_spill] sm:$0xff] %v11615_v36  ;;  %v4001_v23 = vadd.f32 %v8616_v41, %v11244_v20  ;;  %v8618_v30 = vadd.f32 %v3712_v8, %v12943_v32  ;;  %v3714_v50 = vpop.f32.mrb[67].mxu0  ;;  %v12945_v41 = vld [vmem:[#allocation26_spill] sm:$0xff] }
 0x4d9   :  { %v4002_v62 = vadd.f32 %v8617_v43, %v11250_v13  ;;  %v8619_v26 = vadd.f32 %v3714_v50, %v12944_v49  ;;  %4618 = vmatprep.mubr.bf16.mxu1 %v11618_v57  ;;  %v12946_v49 = vld [vmem:[#allocation27_spill] sm:$0xff] }
 0x4da   :  { %v4003_v31 = vadd.f32 %v8618_v30, %v11244_v20  ;;  %4619 = vmatmul.mubr.bf16.gmra.mrb[164].mxu1 %v11615_v36  ;;  %v4109_v58 = vmax.f32 %v4001_v23, 0.0 }
 0x4db   :  { %v4004_v48 = vadd.f32 %v8619_v26, %v11250_v13  ;;  %v4110_v33 = vmax.f32 %v4002_v62, 0.0 }
 0x4dc   :  { %v4111_v17 = vmax.f32 %v4003_v31, 0.0 }
 0x4dd   :  { %v4112_v24 = vmax.f32 %v4004_v48, 0.0  ;;  %v3718_v1 = vpop.f32.mrb[68].mxu0 }
 0x4de   :  { %v8620_v32 = vadd.f32 %v3718_v1, %v12945_v41  ;;  %v3720_v38 = vpop.f32.mrb[69].mxu0  ;;  %v11629_v25 = vpack.c.bf16 %v4111_v17, %v4109_v58 }
 0x4df   :  { %v8621_v43 = vadd.f32 %v3720_v38, %v11264_v59  ;;  %v3722_v8 = vpop.f32.mrb[70].mxu0  ;;  %v11632_v50 = vpack.c.bf16 %v4112_v24, %v4110_v33 }
 0x4e0   :  { %v4005_v30 = vadd.f32 %v8620_v32, %v11244_v20  ;;  %v8622_v36 = vadd.f32 %v3722_v8, %v12946_v49  ;;  %v3724_v26 = vpop.f32.mrb[71].mxu0 }
 0x4e1   :  { %v4006_v23 = vadd.f32 %v8621_v43, %v11250_v13  ;;  %v8623_v62 = vadd.f32 %v3724_v26, %v11268_v56  ;;  %4626 = vmatprep.mubr.bf16.mxu1 %v11632_v50 }
 0x4e2   :  { %v4007_v31 = vadd.f32 %v8622_v36, %v11244_v20  ;;  %4627 = vmatmul.mubr.bf16.gmra.mrb[168].mxu1 %v11629_v25  ;;  %v4113_v48 = vmax.f32 %v4005_v30, 0.0 }
 0x4e3   :  { %v4008_v59 = vadd.f32 %v8623_v62, %v11250_v13  ;;  %v4114_v17 = vmax.f32 %v4006_v23, 0.0 }
 0x4e4   :  { %v4115_v58 = vmax.f32 %v4007_v31, 0.0 }
 0x4e5   :  { %v4116_v33 = vmax.f32 %v4008_v59, 0.0  ;;  %v3728_v24 = vpop.f32.mrb[72].mxu0 }
 0x4e6   :  { %v8624_v1 = vadd.f32 %v3728_v24, %v11281_v60  ;;  %v3730_v41 = vpop.f32.mrb[73].mxu0  ;;  %v11643_v32 = vpack.c.bf16 %v4115_v58, %v4113_v48 }
 0x4e7   :  { %v8625_v56 = vadd.f32 %v3730_v41, %v11284_v63  ;;  %v3732_v38 = vpop.f32.mrb[74].mxu0  ;;  %v11646_v43 = vpack.c.bf16 %v4116_v33, %v4114_v17 }
 0x4e8   :  { %v4009_v36 = vadd.f32 %v8624_v1, %v11244_v20  ;;  %v8626_v8 = vadd.f32 %v3732_v38, %v11286_v2  ;;  %v3734_v49 = vpop.f32.mrb[75].mxu0 }
 0x4e9   :  { %v4010_v30 = vadd.f32 %v8625_v56, %v11250_v13  ;;  %v8627_v26 = vadd.f32 %v3734_v49, %v11288_v45  ;;  %4634 = vmatprep.mubr.bf16.mxu1 %v11646_v43 }
 0x4ea   :  { %v4011_v60 = vadd.f32 %v8626_v8, %v11244_v20  ;;  %4635 = vmatmul.mubr.bf16.gmra.mrb[172].mxu1 %v11643_v32  ;;  %v4117_v23 = vmax.f32 %v4009_v36, 0.0 }
 0x4eb   :  { %v4012_v63 = vadd.f32 %v8627_v26, %v11250_v13  ;;  %v4118_v31 = vmax.f32 %v4010_v30, 0.0 }
 0x4ec   :  { %v4119_v62 = vmax.f32 %v4011_v60, 0.0 }
 0x4ed   :  { %v4120_v59 = vmax.f32 %v4012_v63, 0.0  ;;  %v3738_v48 = vpop.f32.mrb[76].mxu0 }
 0x4ee   :  { %v8628_v2 = vadd.f32 %v3738_v48, %v11306_v10  ;;  %v3740_v58 = vpop.f32.mrb[77].mxu0  ;;  %v11657_v17 = vpack.c.bf16 %v4119_v62, %v4117_v23 }
 0x4ef   :  { %v8629_v45 = vadd.f32 %v3740_v58, %v11312_v54  ;;  %v3742_v33 = vpop.f32.mrb[78].mxu0  ;;  %v11660_v24 = vpack.c.bf16 %v4120_v59, %v4118_v31 }
 0x4f0   :  { %v4013_v1 = vadd.f32 %v8628_v2, %v11244_v20  ;;  %v8630_v41 = vadd.f32 %v3742_v33, %v11315_v12  ;;  %v3744_v56 = vpop.f32.mrb[79].mxu0 }
 0x4f1   :  { %v4014_v38 = vadd.f32 %v8629_v45, %v11250_v13  ;;  %v8631_v36 = vadd.f32 %v3744_v56, %v11317_v28  ;;  %4642 = vmatprep.mubr.bf16.mxu1 %v11660_v24 }
 0x4f2   :  { %v4015_v10 = vadd.f32 %v8630_v41, %v11244_v20  ;;  %4643 = vmatmul.mubr.bf16.gmra.mrb[176].mxu1 %v11657_v17  ;;  %v4121_v8 = vmax.f32 %v4013_v1, 0.0 }
 0x4f3   :  { %v4016_v54 = vadd.f32 %v8631_v36, %v11250_v13  ;;  %v4122_v30 = vmax.f32 %v4014_v38, 0.0 }
 0x4f4   :  { %v4123_v49 = vmax.f32 %v4015_v10, 0.0 }
 0x4f5   :  { %v4124_v26 = vmax.f32 %v4016_v54, 0.0  ;;  %v3748_v60 = vpop.f32.mrb[80].mxu0 }
 0x4f6   :  { %v8632_v12 = vadd.f32 %v3748_v60, %v11336_v11  ;;  %v3750_v63 = vpop.f32.mrb[81].mxu0  ;;  %v11671_v23 = vpack.c.bf16 %v4123_v49, %v4121_v8 }
 0x4f7   :  { %v8633_v28 = vadd.f32 %v3750_v63, %v11342_v15  ;;  %v3752_v62 = vpop.f32.mrb[82].mxu0  ;;  %v11674_v31 = vpack.c.bf16 %v4124_v26, %v4122_v30 }
 0x4f8   :  { %v4017_v59 = vadd.f32 %v8632_v12, %v11244_v20  ;;  %v8634_v48 = vadd.f32 %v3752_v62, %v11345_v27  ;;  %v3754_v2 = vpop.f32.mrb[83].mxu0 }
 0x4f9   :  { %v4018_v58 = vadd.f32 %v8633_v28, %v11250_v13  ;;  %v8635_v45 = vadd.f32 %v3754_v2, %v11347_v9  ;;  %4650 = vmatprep.mubr.bf16.mxu1 %v11674_v31 }
 0x4fa   :  { %v4019_v11 = vadd.f32 %v8634_v48, %v11244_v20  ;;  %4651 = vmatmul.mubr.bf16.gmra.mrb[180].mxu1 %v11671_v23  ;;  %v4125_v33 = vmax.f32 %v4017_v59, 0.0 }
 0x4fb   :  { %v4020_v15 = vadd.f32 %v8635_v45, %v11250_v13  ;;  %v4126_v41 = vmax.f32 %v4018_v58, 0.0 }
 0x4fc   :  { %v4127_v1 = vmax.f32 %v4019_v11, 0.0 }
 0x4fd   :  { %v4128_v56 = vmax.f32 %v4020_v15, 0.0  ;;  %v3758_v38 = vpop.f32.mrb[84].mxu0 }
 0x4fe   :  { %v8636_v27 = vadd.f32 %v3758_v38, %v11366_v22  ;;  %v3760_v36 = vpop.f32.mrb[85].mxu0  ;;  %v11685_v10 = vpack.c.bf16 %v4127_v1, %v4125_v33 }
 0x4ff   :  { %v8637_v9 = vadd.f32 %v3760_v36, %v11372_v7  ;;  %v3762_v54 = vpop.f32.mrb[86].mxu0  ;;  %v11688_v8 = vpack.c.bf16 %v4128_v56, %v4126_v41 }
 0x500   :  { %v4021_v49 = vadd.f32 %v8636_v27, %v11244_v20  ;;  %v8638_v30 = vadd.f32 %v3762_v54, %v11375_v35  ;;  %v3764_v26 = vpop.f32.mrb[87].mxu0 }
 0x501   :  { %v4022_v60 = vadd.f32 %v8637_v9, %v11250_v13  ;;  %v8639_v12 = vadd.f32 %v3764_v26, %v11377_v55  ;;  %4658 = vmatprep.mubr.bf16.mxu1 %v11688_v8 }
 0x502   :  { %v4023_v22 = vadd.f32 %v8638_v30, %v11244_v20  ;;  %4659 = vmatmul.mubr.bf16.gmra.mrb[184].mxu1 %v11685_v10  ;;  %v4129_v63 = vmax.f32 %v4021_v49, 0.0 }
 0x503   :  { %v4024_v7 = vadd.f32 %v8639_v12, %v11250_v13  ;;  %v4130_v62 = vmax.f32 %v4022_v60, 0.0 }
 0x504   :  { %v4131_v28 = vmax.f32 %v4023_v22, 0.0 }
 0x505   :  { %v4132_v59 = vmax.f32 %v4024_v7, 0.0  ;;  %v3768_v48 = vpop.f32.mrb[88].mxu0 }
 0x506   :  { %v8640_v35 = vadd.f32 %v3768_v48, %v11396_v34  ;;  %v3770_v2 = vpop.f32.mrb[89].mxu0  ;;  %v11699_v58 = vpack.c.bf16 %v4131_v28, %v4129_v63 }
 0x507   :  { %v8641_v55 = vadd.f32 %v3770_v2, %v11402_v0  ;;  %v3772_v45 = vpop.f32.mrb[90].mxu0  ;;  %v11702_v11 = vpack.c.bf16 %v4132_v59, %v4130_v62 }
 0x508   :  { %v4025_v15 = vadd.f32 %v8640_v35, %v11244_v20  ;;  %v8642_v33 = vadd.f32 %v3772_v45, %v11405_v44  ;;  %v3774_v1 = vpop.f32.mrb[91].mxu0 }
 0x509   :  { %v4026_v41 = vadd.f32 %v8641_v55, %v11250_v13  ;;  %v8643_v56 = vadd.f32 %v3774_v1, %v11407_v29  ;;  %4666 = vmatprep.mubr.bf16.mxu1 %v11702_v11 }
 0x50a   :  { %v4027_v34 = vadd.f32 %v8642_v33, %v11244_v20  ;;  %4667 = vmatmul.mubr.bf16.gmra.mrb[188].mxu1 %v11699_v58  ;;  %v4133_v38 = vmax.f32 %v4025_v15, 0.0 }
 0x50b   :  { %v4028_v0 = vadd.f32 %v8643_v56, %v11250_v13  ;;  %v4134_v36 = vmax.f32 %v4026_v41, 0.0 }
 0x50c   :  { %v4135_v27 = vmax.f32 %v4027_v34, 0.0 }
 0x50d   :  { %v4136_v9 = vmax.f32 %v4028_v0, 0.0  ;;  %v3778_v54 = vpop.f32.mrb[92].mxu0 }
 0x50e   :  { %v8644_v44 = vadd.f32 %v3778_v54, %v11426_v42  ;;  %v3780_v49 = vpop.f32.mrb[93].mxu0  ;;  %v11713_v30 = vpack.c.bf16 %v4135_v27, %v4133_v38 }
 0x50f   :  { %v8645_v29 = vadd.f32 %v3780_v49, %v11432_v5  ;;  %v3782_v26 = vpop.f32.mrb[94].mxu0  ;;  %v11716_v60 = vpack.c.bf16 %v4136_v9, %v4134_v36 }
 0x510   :  { %v4029_v12 = vadd.f32 %v8644_v44, %v11244_v20  ;;  %v8646_v22 = vadd.f32 %v3782_v26, %v11435_v53  ;;  %v3784_v7 = vpop.f32.mrb[95].mxu0 }
 0x511   :  { %v4030_v63 = vadd.f32 %v8645_v29, %v11250_v13  ;;  %v8647_v28 = vadd.f32 %v3784_v7, %v11437_v37  ;;  %4674 = vmatprep.mubr.bf16.mxu1 %v11716_v60 }
 0x512   :  { %v4031_v42 = vadd.f32 %v8646_v22, %v11244_v20  ;;  %4675 = vmatmul.mubr.bf16.gmra.mrb[192].mxu1 %v11713_v30  ;;  %v4137_v62 = vmax.f32 %v4029_v12, 0.0 }
 0x513   :  { %v4032_v5 = vadd.f32 %v8647_v28, %v11250_v13  ;;  %v4138_v48 = vmax.f32 %v4030_v63, 0.0 }
 0x514   :  { %v4139_v59 = vmax.f32 %v4031_v42, 0.0 }
 0x515   :  { %v4140_v35 = vmax.f32 %v4032_v5, 0.0  ;;  %v3788_v2 = vpop.f32.mrb[96].mxu0 }
 0x516   :  { %v8648_v53 = vadd.f32 %v3788_v2, %v11456_v51  ;;  %v3790_v55 = vpop.f32.mrb[97].mxu0  ;;  %v11727_v45 = vpack.c.bf16 %v4139_v59, %v4137_v62 }
 0x517   :  { %v8649_v37 = vadd.f32 %v3790_v55, %v11462_v6  ;;  %v3792_v15 = vpop.f32.mrb[98].mxu0  ;;  %v11730_v33 = vpack.c.bf16 %v4140_v35, %v4138_v48 }
 0x518   :  { %v4033_v1 = vadd.f32 %v8648_v53, %v11244_v20  ;;  %v8650_v41 = vadd.f32 %v3792_v15, %v11465_v14  ;;  %v3794_v56 = vpop.f32.mrb[99].mxu0 }
 0x519   :  { %v4034_v34 = vadd.f32 %v8649_v37, %v11250_v13  ;;  %v8651_v0 = vadd.f32 %v3794_v56, %v11467_v3  ;;  %4682 = vmatprep.mubr.bf16.mxu1 %v11730_v33 }
 0x51a   :  { %v4035_v51 = vadd.f32 %v8650_v41, %v11244_v20  ;;  %4683 = vmatmul.mubr.bf16.gmra.mrb[196].mxu1 %v11727_v45  ;;  %v4141_v38 = vmax.f32 %v4033_v1, 0.0 }
 0x51b   :  { %v4036_v6 = vadd.f32 %v8651_v0, %v11250_v13  ;;  %v4142_v36 = vmax.f32 %v4034_v34, 0.0  ;;  %v12949_v34 = vld [vmem:[#allocation29_spill] sm:$0xff] }
 0x51c   :  { %v4143_v27 = vmax.f32 %v4035_v51, 0.0 }
 0x51d   :  { %v4144_v9 = vmax.f32 %v4036_v6, 0.0  ;;  %v3798_v54 = vpop.f32.mrb[100].mxu0 }
 0x51e   :  { %v8652_v14 = vadd.f32 %v3798_v54, %v11486_v61  ;;  %v3800_v44 = vpop.f32.mrb[101].mxu0  ;;  %v11741_v49 = vpack.c.bf16 %v4143_v27, %v4141_v38  ;;  %v12954_v54 = vld [vmem:[#allocation30_spill] sm:$0xff] }
 0x51f   :  { %v8653_v3 = vadd.f32 %v3800_v44, %v11492_v52  ;;  %v3802_v29 = vpop.f32.mrb[102].mxu0  ;;  %v11744_v26 = vpack.c.bf16 %v4144_v9, %v4142_v36  ;;  %v12952_v36 = vld [vmem:[#allocation28_spill] sm:$0xff]  ;;  %v9581_v9 = vld [vmem:[%s12737_s3 + $0x110] sm:$0xff]   ;;  %v9582_v44 = vld [vmem:[%s12737_s3 + $0x118] sm:$0xff]  }
 0x520   :  { %v4037_v12 = vadd.f32 %v8652_v14, %v11244_v20  ;;  %v8654_v22 = vadd.f32 %v3802_v29, %v11495_v19  ;;  %v3804_v7 = vpop.f32.mrb[103].mxu0  ;;  %v12955_v14 = vld [vmem:[#allocation33_spill] sm:$0xff] }
 0x521   :  { %v4038_v63 = vadd.f32 %v8653_v3, %v11250_v13  ;;  %v8655_v28 = vadd.f32 %v3804_v7, %v11497_v39  ;;  %4690 = vmatprep.mubr.bf16.mxu1 %v11744_v26 }
 0x522   :  { %v4039_v61 = vadd.f32 %v8654_v22, %v11244_v20  ;;  %4691 = vmatmul.mubr.bf16.gmra.mrb[200].mxu1 %v11741_v49  ;;  %v4145_v42 = vmax.f32 %v4037_v12, 0.0  ;;  %v9583_v22 = vld [vmem:[%s12737_s3 + $0x120] sm:$0xff]  }
 0x523   :  { %v4040_v52 = vadd.f32 %v8655_v28, %v11250_v13  ;;  %v4146_v62 = vmax.f32 %v4038_v63, 0.0  ;;  %v12956_v63 = vld [vmem:[#allocation32_spill] sm:$0xff]  ;;  %v12957_v28 = vld [vmem:[#allocation35_spill] sm:$0xff] }
 0x524   :  { %v4147_v5 = vmax.f32 %v4039_v61, 0.0  ;;  %v9584_v61 = vld [vmem:[%s12737_s3 + $0x128] sm:$0xff]  }
 0x525   :  { %v4148_v59 = vmax.f32 %v4040_v52, 0.0  ;;  %v3808_v48 = vpop.f32.mrb[104].mxu0 }
 0x526   :  { %v8656_v19 = vadd.f32 %v3808_v48, %v11518_v40  ;;  %v3810_v35 = vpop.f32.mrb[105].mxu0  ;;  %v11755_v2 = vpack.c.bf16 %v4147_v5, %v4145_v42  ;;  %v12958_v48 = vld [vmem:[#allocation34_spill] sm:$0xff] }
 0x527   :  { %v8657_v39 = vadd.f32 %v3810_v35, %v11523_v4  ;;  %v3812_v53 = vpop.f32.mrb[106].mxu0  ;;  %v11758_v55 = vpack.c.bf16 %v4148_v59, %v4146_v62  ;;  %v9585_v62 = vld [vmem:[%s12737_s3 + $0x130] sm:$0xff]   ;;  %v9586_v35 = vld [vmem:[%s12737_s3 + $0x138] sm:$0xff]  }
 0x528   :  { %12947 = vst [vmem:[#allocation13_spill] sm:$0xff] %v11755_v2  ;;  %v4041_v37 = vadd.f32 %v8656_v19, %v11244_v20  ;;  %v8658_v15 = vadd.f32 %v3812_v53, %v11528_v16  ;;  %v3814_v1 = vpop.f32.mrb[107].mxu0  ;;  %v12959_v19 = vld [vmem:[#allocation37_spill] sm:$0xff] }
 0x529   :  { %12948 = vst [vmem:[#allocation14_spill] sm:$0xff] %v11758_v55  ;;  %v4042_v41 = vadd.f32 %v8657_v39, %v11250_v13  ;;  %v8659_v56 = vadd.f32 %v3814_v1, %v11532_v18  ;;  %4698 = vmatprep.mubr.bf16.mxu1 %v11758_v55  ;;  %v9579_v18 = vld [vmem:[%s12737_s3 + $0x100] sm:$0xff]  }
 0x52a   :  { %v4043_v40 = vadd.f32 %v8658_v15, %v11244_v20  ;;  %4699 = vmatmul.mubr.bf16.gmra.mrb[204].mxu1 %v11755_v2  ;;  %v4149_v0 = vmax.f32 %v4041_v37, 0.0  ;;  %v12953_v20 = vld [vmem:[#allocation31_spill] sm:$0xff]  ;;  %v12978_v2 = vld [vmem:[#allocation4_spill] sm:$0xff] }
 0x52b   :  { %v4044_v4 = vadd.f32 %v8659_v56, %v11250_v13  ;;  %4835 = vmatprep.mubr.bf16.mxu1 %v12949_v34  ;;  %v4150_v6 = vmax.f32 %v4042_v41, 0.0  ;;  %v9580_v13 = vld [vmem:[%s12737_s3 + $0x108] sm:$0xff]   ;;  %v9587_v15 = vld [vmem:[%s12737_s3 + $0x140] sm:$0xff]  }
 0x52c   :  { %v4151_v51 = vmax.f32 %v4043_v40, 0.0  ;;  %v12960_v41 = vld [vmem:[#allocation36_spill] sm:$0xff]  ;;  %v12961_v56 = vld [vmem:[#allocation39_spill] sm:$0xff] }
 0x52d   :  { %v4152_v38 = vmax.f32 %v4044_v4, 0.0  ;;  %v9588_v40 = vld [vmem:[%s12737_s3 + $0x148] sm:$0xff]   ;;  %v12979_v55 = vld [vmem:[#allocation7_spill] sm:$0xff] }
 0x52e   :  { %v11769_v16 = vpack.c.bf16 %v4151_v51, %v4149_v0  ;;  %v9589_v51 = vld [vmem:[%s12737_s3 + $0x150] sm:$0xff]  }
 0x52f   :  { %v11774_v27 = vpack.c.bf16 %v4152_v38, %v4150_v6  ;;  %v12962_v38 = vld [vmem:[#allocation38_spill] sm:$0xff] }
 0x530   :  { %12950 = vst [vmem:[#allocation15_spill] sm:$0xff] %v11769_v16 }
 0x531   :  { %12951 = vst [vmem:[#allocation16_spill] sm:$0xff] %v11774_v27 }
 0x532   :  { %4836 = vmatmul.mubr.bf16.vlgmr.msra.gmra.mrb[208].mxu1 %v12952_v36  ;;  %v9590_v36 = vld [vmem:[%s12737_s3 + $0x158] sm:$0xff]  }
 0x533   :  { %4843 = vmatprep.mubr.bf16.mxu1 %v12953_v20  ;;  %5216 = vmatpush1.bf16.msra.mxu1 %v9579_v18  ;;  %v12963_v18 = vld [vmem:[#allocation41_spill] sm:$0xff] }
 0x534   :  { %5217 = vmatprep.subr.bf16.mxu1 %v12854_v47 }
 0x537   :  { %5218 = vmatpush1.bf16.msra.mxu1 %v9580_v13 }
 0x538   :  { %5219 = vmatprep.subr.bf16.mxu1 %v12854_v47 }
 0x53a   :  { %4844 = vmatmul.mubr.bf16.gmra.mrb[212].mxu1 %v12954_v54  ;;  %v9591_v54 = vld [vmem:[%s12737_s3 + $0x160] sm:$0xff]  }
 0x53b   :  { %4851 = vmatprep.mubr.bf16.mxu1 %v12955_v14  ;;  %5220 = vmatpush1.bf16.msra.mxu1 %v9581_v9 }
 0x53c   :  { %5221 = vmatprep.subr.bf16.mxu1 %v12854_v47 }
 0x53d   :  { %v11792_v3 = vpop.f32.mrb[108].mxu1 }
 0x53e   :  { %v4510_v29 = vpop.f32.mrb[109].mxu1 }
 0x53f   :  { %v11794_v12 = vpop.f32.mrb[110].mxu1  ;;  %5222 = vmatpush1.bf16.msra.mxu1 %v9582_v44  ;;  %v12964_v29 = vld [vmem:[#allocation40_spill] sm:$0xff] }
 0x540   :  { %v4513_v7 = vpop.f32.mrb[111].mxu1  ;;  %5223 = vmatprep.subr.bf16.mxu1 %v12854_v47 }
 0x541   :  { %v9592_v7 = vld [vmem:[%s12737_s3 + $0x168] sm:$0xff]  }
 0x542   :  { %4852 = vmatmul.mubr.bf16.gmra.mrb[216].mxu1 %v12956_v63 }
 0x543   :  { %4859 = vmatprep.mubr.bf16.mxu1 %v12957_v28  ;;  %5224 = vmatpush1.bf16.msra.mxu1 %v9583_v22  ;;  %v12965_v22 = vld [vmem:[#allocation43_spill] sm:$0xff] }
 0x544   :  { %5225 = vmatprep.subr.bf16.mxu1 %v12854_v47 }
 0x545   :  { %v11806_v52 = vpop.f32.mrb[112].mxu1 }
 0x546   :  { %v4518_v42 = vpop.f32.mrb[113].mxu1 }
 0x547   :  { %v11808_v5 = vpop.f32.mrb[114].mxu1  ;;  %5226 = vmatpush1.bf16.msra.mxu1 %v9584_v61 }
 0x548   :  { %v4521_v59 = vpop.f32.mrb[115].mxu1  ;;  %5227 = vmatprep.subr.bf16.mxu1 %v12854_v47 }
 0x549   :  { %v9593_v59 = vld [vmem:[%s12737_s3 + $0x170] sm:$0xff]  }
 0x54a   :  { %4860 = vmatmul.mubr.bf16.gmra.mrb[220].mxu1 %v12958_v48 }
 0x54b   :  { %4867 = vmatprep.mubr.bf16.mxu1 %v12959_v19  ;;  %5228 = vmatpush1.bf16.msra.mxu1 %v9585_v62 }
 0x54c   :  { %5229 = vmatprep.subr.bf16.mxu1 %v12854_v47 }
 0x54d   :  { %v11820_v39 = vpop.f32.mrb[116].mxu1 }
 0x54e   :  { %v4526_v53 = vpop.f32.mrb[117].mxu1 }
 0x54f   :  { %v11822_v37 = vpop.f32.mrb[118].mxu1  ;;  %5230 = vmatpush1.bf16.msra.mxu1 %v9586_v35  ;;  %v12966_v53 = vld [vmem:[#allocation42_spill] sm:$0xff] }
 0x550   :  { %v4529_v1 = vpop.f32.mrb[119].mxu1  ;;  %5231 = vmatprep.subr.bf16.mxu1 %v12854_v47 }
 0x552   :  { %4868 = vmatmul.mubr.bf16.gmra.mrb[224].mxu1 %v12960_v41 }
 0x553   :  { %4875 = vmatprep.mubr.bf16.mxu1 %v12961_v56  ;;  %5232 = vmatpush1.bf16.msra.mxu1 %v9587_v15 }
 0x554   :  { %5233 = vmatprep.subr.bf16.mxu1 %v12854_v47 }
 0x555   :  { %v11834_v4 = vpop.f32.mrb[120].mxu1 }
 0x556   :  { %v4534_v34 = vpop.f32.mrb[121].mxu1 }
 0x557   :  { %v11836_v0 = vpop.f32.mrb[122].mxu1  ;;  %5234 = vmatpush1.bf16.msra.mxu1 %v9588_v40  ;;  %v9594_v34 = vld [vmem:[%s12737_s3 + $0x178] sm:$0xff]  }
 0x558   :  { %v4537_v6 = vpop.f32.mrb[123].mxu1  ;;  %5235 = vmatprep.subr.bf16.mxu1 %v12854_v47 }
 0x559   :  { %v12967_v6 = vld [vmem:[#allocation45_spill] sm:$0xff] }
 0x55a   :  { %4876 = vmatmul.mubr.bf16.gmra.mrb[228].mxu1 %v12962_v38 }
 0x55b   :  { %4883 = vmatprep.mubr.bf16.mxu1 %v12963_v18  ;;  %5236 = vmatpush1.bf16.msra.mxu1 %v9589_v51 }
 0x55c   :  { %5237 = vmatprep.subr.bf16.mxu1 %v12854_v47 }
 0x55d   :  { %v11848_v20 = vpop.f32.mrb[124].mxu1 }
 0x55e   :  { %v4542_v13 = vpop.f32.mrb[125].mxu1 }
 0x55f   :  { %v11850_v9 = vpop.f32.mrb[126].mxu1  ;;  %5238 = vmatpush1.bf16.msra.mxu1 %v9590_v36 }
 0x560   :  { %v4545_v44 = vpop.f32.mrb[127].mxu1  ;;  %5239 = vmatprep.subr.bf16.mxu1 %v12854_v47 }
 0x562   :  { %4884 = vmatmul.mubr.bf16.gmra.mrb[232].mxu1 %v12964_v29 }
 0x563   :  { %4891 = vmatprep.mubr.bf16.mxu1 %v12965_v22  ;;  %5240 = vmatpush1.bf16.msra.mxu1 %v9591_v54 }
 0x564   :  { %5241 = vmatprep.subr.bf16.mxu1 %v12854_v47 }
 0x565   :  { %v11862_v61 = vpop.f32.mrb[128].mxu1 }
 0x566   :  { %v4550_v42 = vpop.f32.mrb[129].mxu1 }
 0x567   :  { %v11864_v62 = vpop.f32.mrb[130].mxu1  ;;  %5242 = vmatpush1.bf16.msra.mxu1 %v9592_v7  ;;  %v12970_v7 = vld [vmem:[#allocation44_spill] sm:$0xff]  ;;  %v12971_v42 = vld [vmem:[#allocation47_spill] sm:$0xff] }
 0x568   :  { %v4553_v35 = vpop.f32.mrb[131].mxu1  ;;  %5243 = vmatprep.subr.bf16.mxu1 %v12854_v47 }
 0x56a   :  { %4892 = vmatmul.mubr.bf16.gmra.mrb[236].mxu1 %v12966_v53 }
 0x56b   :  { %4899 = vmatprep.mubr.bf16.mxu1 %v11503_v46  ;;  %5244 = vmatpush1.bf16.msra.mxu1 %v9593_v59 }
 0x56c   :  { %5245 = vmatprep.subr.bf16.mxu1 %v12854_v47  ;;  %v12975_v47 = vld [vmem:[#allocation5_spill] sm:$0xff] }
 0x56d   :  { %v11873_v15 = vpop.f32.mrb[132].mxu1 }
 0x56e   :  { %v4558_v1 = vpop.f32.mrb[133].mxu1 }
 0x56f   :  { %v11875_v40 = vpop.f32.mrb[134].mxu1  ;;  %5246 = vmatpush1.bf16.msra.mxu1 %v9594_v34 }
 0x570   :  { %v4561_v51 = vpop.f32.mrb[135].mxu1 }
 0x571   :  { %v12974_v51 = vld [vmem:[#allocation46_spill] sm:$0xff] }
 0x572   :  { %4900 = vmatmul.mubr.bf16.gmra.mrb[240].mxu1 %v11500_v21 }
 0x573   :  { %4907 = vmatprep.mubr.bf16.mxu1 %v12967_v6 }
 0x575   :  { %v11882_v36 = vpop.f32.mrb[136].mxu1 }
 0x576   :  { %12968 = vst [vmem:[#allocation17_spill] sm:$0xff] %v11882_v36  ;;  %v4566_v13 = vpop.f32.mrb[137].mxu1  ;;  %v12983_v36 = vld [vmem:[#allocation9_spill] sm:$0xff] }
 0x577   :  { %v11884_v54 = vpop.f32.mrb[138].mxu1 }
 0x578   :  { %12969 = vst [vmem:[#allocation18_spill] sm:$0xff] %v11884_v54  ;;  %v4569_v44 = vpop.f32.mrb[139].mxu1 }
 0x57a   :  { %4908 = vmatmul.mubr.bf16.gmra.mrb[244].mxu1 %v12970_v7 }
 0x57b   :  { %4915 = vmatprep.mubr.bf16.mxu1 %v12971_v42 }
 0x57d   :  { %v11888_v59 = vpop.f32.mrb[140].mxu1 }
 0x57e   :  { %12972 = vst [vmem:[#allocation20_spill] sm:$0xff] %v11888_v59  ;;  %v4574_v35 = vpop.f32.mrb[141].mxu1 }
 0x57f   :  { %v11890_v1 = vpop.f32.mrb[142].mxu1 }
 0x580   :  { %12973 = vst [vmem:[#allocation21_spill] sm:$0xff] %v11890_v1  ;;  %v4577_v34 = vpop.f32.mrb[143].mxu1  ;;  %v12982_v1 = vld [vmem:[#allocation6_spill] sm:$0xff] }
 0x582   :  { %4916 = vmatmul.mubr.bf16.gmra.mrb[248].mxu1 %v12974_v51 }
 0x583   :  { %4923 = vmatprep.mubr.bf16.mxu1 %v12975_v47 }
 0x585   :  { %v11894_v16 = vpop.f32.mrb[144].mxu1 }
 0x586   :  { %12976 = vst [vmem:[#allocation22_spill] sm:$0xff] %v11894_v16  ;;  %v4582_v13 = vpop.f32.mrb[145].mxu1 }
 0x587   :  { %v11896_v27 = vpop.f32.mrb[146].mxu1 }
 0x588   :  { %12977 = vst [vmem:[#allocation23_spill] sm:$0xff] %v11896_v27  ;;  %v4585_v44 = vpop.f32.mrb[147].mxu1  ;;  %v12986_v27 = vld [vmem:[#allocation8_spill] sm:$0xff] }
 0x58a   :  { %4924 = vmatmul.mubr.bf16.gmra.mrb[252].mxu1 %v12978_v2  ;;  %v12987_v2 = vld [vmem:[#allocation11_spill] sm:$0xff] }
 0x58b   :  { %4931 = vmatprep.mubr.bf16.mxu1 %v12979_v55 }
 0x58d   :  { %v11900_v54 = vpop.f32.mrb[148].mxu1 }
 0x58e   :  { %12980 = vst [vmem:[#allocation24_spill] sm:$0xff] %v11900_v54  ;;  %v4590_v35 = vpop.f32.mrb[149].mxu1 }
 0x58f   :  { %v11902_v59 = vpop.f32.mrb[150].mxu1 }
 0x590   :  { %12981 = vst [vmem:[#allocation25_spill] sm:$0xff] %v11902_v59  ;;  %v4593_v34 = vpop.f32.mrb[151].mxu1  ;;  %v12990_v59 = vld [vmem:[#allocation10_spill] sm:$0xff] }
 0x592   :  { %4932 = vmatmul.mubr.bf16.gmra.mrb[0].mxu1 %v12982_v1 }
 0x593   :  { %4939 = vmatprep.mubr.bf16.mxu1 %v12983_v36 }
 0x595   :  { %v11906_v47 = vpop.f32.mrb[152].mxu1 }
 0x596   :  { %12984 = vst [vmem:[#allocation26_spill] sm:$0xff] %v11906_v47  ;;  %v4598_v13 = vpop.f32.mrb[153].mxu1  ;;  %v9597_v47 = vld [vmem:[%s12739_s5 + $0x24] ss:$8 sps:$4 sm:$0xff]  }
 0x597   :  { %v11908_v16 = vpop.f32.mrb[154].mxu1  ;;  %5690 = vmatprep.subr.bf16.mxu1 %v9597_v47 }
 0x598   :  { %12985 = vst [vmem:[#allocation27_spill] sm:$0xff] %v11908_v16  ;;  %v4601_v44 = vpop.f32.mrb[155].mxu1 }
 0x59a   :  { %4940 = vmatmul.mubr.bf16.gmra.mrb[4].mxu1 %v12986_v27 }
 0x59b   :  { %4947 = vmatprep.mubr.bf16.mxu1 %v12987_v2 }
 0x59d   :  { %v11912_v55 = vpop.f32.mrb[156].mxu1 }
 0x59e   :  { %12988 = vst [vmem:[#allocation29_spill] sm:$0xff] %v11912_v55  ;;  %v4606_v35 = vpop.f32.mrb[157].mxu1  ;;  %v12993_v55 = vld [vmem:[#allocation12_spill] sm:$0xff] }
 0x59f   :  { %v11914_v54 = vpop.f32.mrb[158].mxu1 }
 0x5a0   :  { %12989 = vst [vmem:[#allocation28_spill] sm:$0xff] %v11914_v54  ;;  %v4609_v34 = vpop.f32.mrb[159].mxu1 }
 0x5a2   :  { %4948 = vmatmul.mubr.bf16.gmra.mrb[8].mxu1 %v12990_v59 }
 0x5a3   :  { %4955 = vmatprep.mubr.bf16.mxu1 %v11618_v57 }
 0x5a5   :  { %v11921_v13 = vpop.f32.mrb[160].mxu1 }
 0x5a6   :  { %12991 = vst [vmem:[#allocation31_spill] sm:$0xff] %v11921_v13  ;;  %v4614_v44 = vpop.f32.mrb[161].mxu1 }
 0x5a7   :  { %v11923_v16 = vpop.f32.mrb[162].mxu1 }
 0x5a8   :  { %12992 = vst [vmem:[#allocation30_spill] sm:$0xff] %v11923_v16  ;;  %v4617_v2 = vpop.f32.mrb[163].mxu1 }
 0x5aa   :  { %4956 = vmatmul.mubr.bf16.gmra.mrb[12].mxu1 %v12993_v55 }
 0x5ab   :  { %4963 = vmatprep.mubr.bf16.mxu1 %v11632_v50 }
 0x5ad   :  { %v11927_v35 = vpop.f32.mrb[164].mxu1 }
 0x5ae   :  { %12994 = vst [vmem:[#allocation33_spill] sm:$0xff] %v11927_v35  ;;  %v4622_v34 = vpop.f32.mrb[165].mxu1 }
 0x5af   :  { %v11929_v54 = vpop.f32.mrb[166].mxu1 }
 0x5b0   :  { %12995 = vst [vmem:[#allocation32_spill] sm:$0xff] %v11929_v54  ;;  %v4625_v59 = vpop.f32.mrb[167].mxu1 }
 0x5b2   :  { %4964 = vmatmul.mubr.bf16.gmra.mrb[16].mxu1 %v11629_v25 }
 0x5b3   :  { %4971 = vmatprep.mubr.bf16.mxu1 %v11646_v43 }
 0x5b5   :  { %v11933_v47 = vpop.f32.mrb[168].mxu1 }
 0x5b6   :  { %12996 = vst [vmem:[#allocation35_spill] sm:$0xff] %v11933_v47  ;;  %v4630_v44 = vpop.f32.mrb[169].mxu1 }
 0x5b7   :  { %v11935_v13 = vpop.f32.mrb[170].mxu1 }
 0x5b8   :  { %12997 = vst [vmem:[#allocation34_spill] sm:$0xff] %v11935_v13  ;;  %v4633_v2 = vpop.f32.mrb[171].mxu1 }
 0x5ba   :  { %4972 = vmatmul.mubr.bf16.gmra.mrb[20].mxu1 %v11643_v32 }
 0x5bb   :  { %4979 = vmatprep.mubr.bf16.mxu1 %v11660_v24 }
 0x5bd   :  { %v11939_v16 = vpop.f32.mrb[172].mxu1 }
 0x5be   :  { %12998 = vst [vmem:[#allocation37_spill] sm:$0xff] %v11939_v16  ;;  %v4638_v34 = vpop.f32.mrb[173].mxu1 }
 0x5bf   :  { %v11941_v35 = vpop.f32.mrb[174].mxu1 }
 0x5c0   :  { %12999 = vst [vmem:[#allocation36_spill] sm:$0xff] %v11941_v35  ;;  %v4641_v59 = vpop.f32.mrb[175].mxu1 }
 0x5c2   :  { %4980 = vmatmul.mubr.bf16.gmra.mrb[24].mxu1 %v11657_v17 }
 0x5c3   :  { %4987 = vmatprep.mubr.bf16.mxu1 %v11674_v31 }
 0x5c5   :  { %v11945_v54 = vpop.f32.mrb[176].mxu1 }
 0x5c6   :  { %13000 = vst [vmem:[#allocation39_spill] sm:$0xff] %v11945_v54  ;;  %v4646_v44 = vpop.f32.mrb[177].mxu1 }
 0x5c7   :  { %v11947_v47 = vpop.f32.mrb[178].mxu1 }
 0x5c8   :  { %13001 = vst [vmem:[#allocation38_spill] sm:$0xff] %v11947_v47  ;;  %v4649_v2 = vpop.f32.mrb[179].mxu1 }
 0x5ca   :  { %4988 = vmatmul.mubr.bf16.gmra.mrb[28].mxu1 %v11671_v23 }
 0x5cb   :  { %4995 = vmatprep.mubr.bf16.mxu1 %v11688_v8 }
 0x5cd   :  { %v11951_v13 = vpop.f32.mrb[180].mxu1 }
 0x5ce   :  { %13002 = vst [vmem:[#allocation41_spill] sm:$0xff] %v11951_v13  ;;  %v4654_v34 = vpop.f32.mrb[181].mxu1 }
 0x5cf   :  { %v11953_v16 = vpop.f32.mrb[182].mxu1 }
 0x5d0   :  { %13003 = vst [vmem:[#allocation40_spill] sm:$0xff] %v11953_v16  ;;  %v4657_v59 = vpop.f32.mrb[183].mxu1 }
 0x5d2   :  { %4996 = vmatmul.mubr.bf16.gmra.mrb[32].mxu1 %v11685_v10 }
 0x5d3   :  { %5003 = vmatprep.mubr.bf16.mxu1 %v11702_v11 }
 0x5d5   :  { %v11957_v35 = vpop.f32.mrb[184].mxu1 }
 0x5d6   :  { %13004 = vst [vmem:[#allocation43_spill] sm:$0xff] %v11957_v35  ;;  %v4662_v44 = vpop.f32.mrb[185].mxu1 }
 0x5d7   :  { %v11959_v54 = vpop.f32.mrb[186].mxu1 }
 0x5d8   :  { %13005 = vst [vmem:[#allocation42_spill] sm:$0xff] %v11959_v54  ;;  %v4665_v2 = vpop.f32.mrb[187].mxu1 }
 0x5da   :  { %5004 = vmatmul.mubr.bf16.gmra.mrb[36].mxu1 %v11699_v58 }
 0x5db   :  { %5011 = vmatprep.mubr.bf16.mxu1 %v11716_v60 }
 0x5dd   :  { %v11963_v47 = vpop.f32.mrb[188].mxu1 }
 0x5de   :  { %13006 = vst [vmem:[#allocation45_spill] sm:$0xff] %v11963_v47  ;;  %v4670_v34 = vpop.f32.mrb[189].mxu1 }
 0x5df   :  { %v11965_v13 = vpop.f32.mrb[190].mxu1 }
 0x5e0   :  { %13007 = vst [vmem:[#allocation44_spill] sm:$0xff] %v11965_v13  ;;  %v4673_v59 = vpop.f32.mrb[191].mxu1 }
 0x5e2   :  { %5012 = vmatmul.mubr.bf16.gmra.mrb[40].mxu1 %v11713_v30 }
 0x5e3   :  { %5019 = vmatprep.mubr.bf16.mxu1 %v11730_v33 }
 0x5e5   :  { %v11969_v16 = vpop.f32.mrb[192].mxu1 }
 0x5e6   :  { %13008 = vst [vmem:[#allocation47_spill] sm:$0xff] %v11969_v16  ;;  %v4678_v44 = vpop.f32.mrb[193].mxu1 }
 0x5e7   :  { %v11971_v35 = vpop.f32.mrb[194].mxu1 }
 0x5e8   :  { %13009 = vst [vmem:[#allocation46_spill] sm:$0xff] %v11971_v35  ;;  %v4681_v2 = vpop.f32.mrb[195].mxu1 }
 0x5e9   :  { %v9595_v2 = vld [vmem:[%s12739_s5 + $0x20] ss:$8 sps:$4 sm:$0xff]  }
 0x5ea   :  { %5020 = vmatmul.mubr.bf16.gmra.mrb[44].mxu1 %v11727_v45 }
 0x5eb   :  { %5027 = vmatprep.mubr.bf16.mxu1 %v11744_v26 }
 0x5ed   :  { %v11975_v54 = vpop.f32.mrb[196].mxu1 }
 0x5ee   :  { %v4686_v34 = vpop.f32.mrb[197].mxu1 }
 0x5ef   :  { %v11977_v47 = vpop.f32.mrb[198].mxu1 }
 0x5f0   :  { %13010 = vst [vmem:[#allocation6_spill] sm:$0xff] %v11977_v47  ;;  %v4689_v59 = vpop.f32.mrb[199].mxu1 }
 0x5f2   :  { %5028 = vmatmul.mubr.bf16.gmra.mrb[48].mxu1 %v11741_v49 }
 0x5f3   :  { %5247 = vmatprep.mubr.bf16.mxu1 %v12955_v14 }
 0x5f5   :  { %v11981_v13 = vpop.f32.mrb[200].mxu1 }
 0x5f6   :  { %v4694_v44 = vpop.f32.mrb[201].mxu1 }
 0x5f7   :  { %v11983_v16 = vpop.f32.mrb[202].mxu1  ;;  %v9598_v44 = vld [vmem:[%s12739_s5 + $0x30] ss:$8 sps:$4 sm:$0xff]  }
 0x5f8   :  { %v4697_v35 = vpop.f32.mrb[203].mxu1 }
 0x5fa   :  { %5248 = vmatmul.mubr.bf16.vlgmr.msra.gmra.mrb[52].mxu1 %v12956_v63  ;;  %v9600_v63 = vld [vmem:[%s12739_s5 + $0x34] ss:$8 sps:$4 sm:$0xff]  }
 0x5fb   :  { %5255 = vmatprep.mubr.bf16.mxu1 %v12957_v28  ;;  %5691 = vmatpush1.bf16.msra.mxu1 %v9595_v2 }
 0x5fc   :  { %5692 = vmatprep.subr.bf16.mxu1 %v9600_v63 }
 0x5fd   :  { %v11990_v34 = vpop.f32.mrb[204].mxu1 }
 0x5fe   :  { %13011 = vst [vmem:[#allocation9_spill] sm:$0xff] %v11990_v34  ;;  %v4702_v59 = vpop.f32.mrb[205].mxu1 }
 0x5ff   :  { %v11992_v47 = vpop.f32.mrb[206].mxu1  ;;  %5693 = vmatpush1.bf16.msra.mxu1 %v9598_v44 }
 0x600   :  { %13012 = vst [vmem:[#allocation8_spill] sm:$0xff] %v11992_v47  ;;  %v4705_v14 = vpop.f32.mrb[207].mxu1 }
 0x602   :  { %5256 = vmatmul.mubr.bf16.gmra.mrb[56].mxu1 %v12958_v48 }
 0x603   :  { %5263 = vmatprep.mubr.bf16.mxu1 %v12959_v19 }
 0x605   :  { %v4837_v28 = vpop.f32.mrb[208].mxu1 }
 0x606   :  { %v12003_v35 = vadd.f32 %v4837_v28, %v11792_v3  ;;  %v4839_v2 = vpop.f32.mrb[209].mxu1 }
 0x607   :  { %v4840_v59 = vpop.f32.mrb[210].mxu1 }
 0x608   :  { %v12006_v48 = vadd.f32 %v4840_v59, %v11794_v12  ;;  %v4842_v19 = vpop.f32.mrb[211].mxu1 }
 0x60a   :  { %5264 = vmatmul.mubr.bf16.gmra.mrb[60].mxu1 %v12960_v41 }
 0x60b   :  { %5271 = vmatprep.mubr.bf16.mxu1 %v12961_v56 }
 0x60d   :  { %v4845_v14 = vpop.f32.mrb[212].mxu1 }
 0x60e   :  { %v12011_v47 = vadd.f32 %v4845_v14, %v11806_v52  ;;  %v4847_v34 = vpop.f32.mrb[213].mxu1 }
 0x60f   :  { %v4848_v63 = vpop.f32.mrb[214].mxu1 }
 0x610   :  { %v12014_v3 = vadd.f32 %v4848_v63, %v11808_v5  ;;  %v4850_v28 = vpop.f32.mrb[215].mxu1 }
 0x612   :  { %5272 = vmatmul.mubr.bf16.gmra.mrb[64].mxu1 %v12962_v38 }
 0x613   :  { %5279 = vmatprep.mubr.bf16.mxu1 %v12963_v18 }
 0x615   :  { %v4853_v12 = vpop.f32.mrb[216].mxu1 }
 0x616   :  { %v12019_v44 = vadd.f32 %v4853_v12, %v11820_v39  ;;  %v4855_v41 = vpop.f32.mrb[217].mxu1 }
 0x617   :  { %v4856_v56 = vpop.f32.mrb[218].mxu1 }
 0x618   :  { %v12022_v2 = vadd.f32 %v4856_v56, %v11822_v37  ;;  %v4858_v52 = vpop.f32.mrb[219].mxu1  ;;  %v13013_v56 = vld [vmem:[#allocation5_spill] sm:$0xff] }
 0x619   :  { %v13014_v52 = vld [vmem:[#allocation17_spill] sm:$0xff] }
 0x61a   :  { %5280 = vmatmul.mubr.bf16.gmra.mrb[68].mxu1 %v12964_v29 }
 0x61b   :  { %5287 = vmatprep.mubr.bf16.mxu1 %v12965_v22 }
 0x61d   :  { %v4861_v5 = vpop.f32.mrb[220].mxu1 }
 0x61e   :  { %v12027_v34 = vadd.f32 %v4861_v5, %v11834_v4  ;;  %v4863_v38 = vpop.f32.mrb[221].mxu1 }
 0x61f   :  { %v4864_v18 = vpop.f32.mrb[222].mxu1  ;;  %v13015_v38 = vld [vmem:[#allocation18_spill] sm:$0xff] }
 0x620   :  { %v12030_v59 = vadd.f32 %v4864_v18, %v11836_v0  ;;  %v4866_v39 = vpop.f32.mrb[223].mxu1 }
 0x621   :  { %v13016_v39 = vld [vmem:[#allocation4_spill] sm:$0xff] }
 0x622   :  { %5288 = vmatmul.mubr.bf16.gmra.mrb[72].mxu1 %v12966_v53 }
 0x623   :  { %5295 = vmatprep.mubr.bf16.mxu1 %v11503_v46 }
 0x625   :  { %v4869_v37 = vpop.f32.mrb[224].mxu1 }
 0x626   :  { %v12035_v19 = vadd.f32 %v4869_v37, %v11848_v20  ;;  %v4871_v29 = vpop.f32.mrb[225].mxu1  ;;  %v13017_v37 = vld [vmem:[#allocation7_spill] sm:$0xff] }
 0x627   :  { %v4872_v22 = vpop.f32.mrb[226].mxu1  ;;  %v13018_v29 = vld [vmem:[#allocation20_spill] sm:$0xff] }
 0x628   :  { %v12038_v14 = vadd.f32 %v4872_v22, %v11850_v9  ;;  %v4874_v4 = vpop.f32.mrb[227].mxu1 }
 0x62a   :  { %5296 = vmatmul.mubr.bf16.gmra.mrb[76].mxu1 %v11500_v21 }
 0x62b   :  { %5303 = vmatprep.mubr.bf16.mxu1 %v12967_v6 }
 0x62d   :  { %v4877_v0 = vpop.f32.mrb[228].mxu1 }
 0x62e   :  { %v12043_v63 = vadd.f32 %v4877_v0, %v11862_v61  ;;  %v4879_v53 = vpop.f32.mrb[229].mxu1  ;;  %v13019_v0 = vld [vmem:[#allocation21_spill] sm:$0xff] }
 0x62f   :  { %v4880_v46 = vpop.f32.mrb[230].mxu1 }
 0x630   :  { %v12046_v28 = vadd.f32 %v4880_v46, %v11864_v62  ;;  %v4882_v20 = vpop.f32.mrb[231].mxu1 }
 0x632   :  { %5304 = vmatmul.mubr.bf16.gmra.mrb[80].mxu1 %v12970_v7 }
 0x633   :  { %5311 = vmatprep.mubr.bf16.mxu1 %v12971_v42 }
 0x635   :  { %v4885_v9 = vpop.f32.mrb[232].mxu1 }
 0x636   :  { %v12051_v12 = vadd.f32 %v4885_v9, %v11873_v15  ;;  %v4887_v21 = vpop.f32.mrb[233].mxu1  ;;  %v13020_v9 = vld [vmem:[#allocation22_spill] sm:$0xff] }
 0x637   :  { %v4888_v6 = vpop.f32.mrb[234].mxu1 }
 0x638   :  { %v12054_v41 = vadd.f32 %v4888_v6, %v11875_v40  ;;  %v4890_v61 = vpop.f32.mrb[235].mxu1 }
 0x63a   :  { %5312 = vmatmul.mubr.bf16.gmra.mrb[84].mxu1 %v12974_v51 }
 0x63b   :  { %5319 = vmatprep.mubr.bf16.mxu1 %v13013_v56  ;;  %v13021_v56 = vld [vmem:[#allocation23_spill] sm:$0xff] }
 0x63d   :  { %v4893_v62 = vpop.f32.mrb[236].mxu1 }
 0x63e   :  { %v12059_v5 = vadd.f32 %v4893_v62, %v13014_v52  ;;  %v4895_v7 = vpop.f32.mrb[237].mxu1 }
 0x63f   :  { %v4896_v42 = vpop.f32.mrb[238].mxu1  ;;  %v13022_v7 = vld [vmem:[#allocation11_spill] sm:$0xff] }
 0x640   :  { %v12062_v18 = vadd.f32 %v4896_v42, %v13015_v38  ;;  %v4898_v15 = vpop.f32.mrb[239].mxu1  ;;  %v13023_v38 = vld [vmem:[#allocation24_spill] sm:$0xff] }
 0x642   :  { %5320 = vmatmul.mubr.bf16.gmra.mrb[88].mxu1 %v13016_v39  ;;  %v13024_v39 = vld [vmem:[#allocation25_spill] sm:$0xff] }
 0x643   :  { %5327 = vmatprep.mubr.bf16.mxu1 %v13017_v37 }
 0x645   :  { %v4901_v40 = vpop.f32.mrb[240].mxu1 }
 0x646   :  { %v12067_v22 = vadd.f32 %v4901_v40, %v13018_v29  ;;  %v4903_v51 = vpop.f32.mrb[241].mxu1  ;;  %v13025_v29 = vld [vmem:[#allocation10_spill] sm:$0xff] }
 0x647   :  { %v4904_v4 = vpop.f32.mrb[242].mxu1 }
 0x648   :  { %v12070_v53 = vadd.f32 %v4904_v4, %v13019_v0  ;;  %v4906_v46 = vpop.f32.mrb[243].mxu1  ;;  %v13026_v4 = vld [vmem:[#allocation26_spill] sm:$0xff] }
 0x64a   :  { %5328 = vmatmul.mubr.bf16.gmra.mrb[92].mxu1 %v12982_v1 }
 0x64b   :  { %5335 = vmatprep.mubr.bf16.mxu1 %v12983_v36 }
 0x64d   :  { %v4909_v20 = vpop.f32.mrb[244].mxu1 }
 0x64e   :  { %v12075_v21 = vadd.f32 %v4909_v20, %v13020_v9  ;;  %v4911_v6 = vpop.f32.mrb[245].mxu1  ;;  %v13027_v20 = vld [vmem:[#allocation27_spill] sm:$0xff] }
 0x64f   :  { %v4912_v61 = vpop.f32.mrb[246].mxu1 }
 0x650   :  { %v12078_v62 = vadd.f32 %v4912_v61, %v13021_v56  ;;  %v4914_v52 = vpop.f32.mrb[247].mxu1  ;;  %v13028_v56 = vld [vmem:[#allocation29_spill] sm:$0xff] }
 0x652   :  { %5336 = vmatmul.mubr.bf16.gmra.mrb[96].mxu1 %v12986_v27 }
 0x653   :  { %5343 = vmatprep.mubr.bf16.mxu1 %v13022_v7 }
 0x655   :  { %v4917_v42 = vpop.f32.mrb[248].mxu1 }
 0x656   :  { %v12083_v15 = vadd.f32 %v4917_v42, %v13023_v38  ;;  %v4919_v1 = vpop.f32.mrb[249].mxu1  ;;  %v13029_v42 = vld [vmem:[#allocation28_spill] sm:$0xff] }
 0x657   :  { %v4920_v36 = vpop.f32.mrb[250].mxu1 }
 0x658   :  { %v12086_v37 = vadd.f32 %v4920_v36, %v13024_v39  ;;  %v4922_v40 = vpop.f32.mrb[251].mxu1  ;;  %v9603_v36 = vld [vmem:[%s12739_s5 + $0x4] ss:$8 sps:$4 sm:$0xff]  }
 0x659   :  { %5756 = vmatprep.subr.bf16.mxu1 %v9603_v36  ;;  %v13035_v36 = vld [vmem:[#allocation34_spill] sm:$0xff] }
 0x65a   :  { %5344 = vmatmul.mubr.bf16.gmra.mrb[100].mxu1 %v13025_v29 }
 0x65b   :  { %5351 = vmatprep.mubr.bf16.mxu1 %v11618_v57 }
 0x65d   :  { %v4925_v51 = vpop.f32.mrb[252].mxu1 }
 0x65e   :  { %v12091_v0 = vadd.f32 %v4925_v51, %v13026_v4  ;;  %v4927_v27 = vpop.f32.mrb[253].mxu1  ;;  %v13031_v51 = vld [vmem:[#allocation30_spill] sm:$0xff] }
 0x65f   :  { %v4928_v46 = vpop.f32.mrb[254].mxu1 }
 0x660   :  { %v12094_v9 = vadd.f32 %v4928_v46, %v13027_v20  ;;  %v4930_v6 = vpop.f32.mrb[255].mxu1  ;;  %v13032_v46 = vld [vmem:[#allocation33_spill] sm:$0xff] }
 0x662   :  { %5352 = vmatmul.mubr.bf16.gmra.mrb[104].mxu1 %v12993_v55  ;;  %v13030_v55 = vld [vmem:[#allocation31_spill] sm:$0xff] }
 0x663   :  { %5359 = vmatprep.mubr.bf16.mxu1 %v11632_v50 }
 0x665   :  { %v4933_v61 = vpop.f32.mrb[0].mxu1 }
 0x666   :  { %v12099_v52 = vadd.f32 %v4933_v61, %v13028_v56  ;;  %v4935_v7 = vpop.f32.mrb[1].mxu1  ;;  %v13033_v61 = vld [vmem:[#allocation32_spill] sm:$0xff] }
 0x667   :  { %v4936_v57 = vpop.f32.mrb[2].mxu1 }
 0x668   :  { %v12102_v38 = vadd.f32 %v4936_v57, %v13029_v42  ;;  %v4938_v1 = vpop.f32.mrb[3].mxu1  ;;  %v13034_v42 = vld [vmem:[#allocation35_spill] sm:$0xff] }
 0x66a   :  { %5360 = vmatmul.mubr.bf16.gmra.mrb[108].mxu1 %v11629_v25 }
 0x66b   :  { %5367 = vmatprep.mubr.bf16.mxu1 %v11646_v43 }
 0x66d   :  { %v4941_v50 = vpop.f32.mrb[4].mxu1 }
 0x66e   :  { %v12110_v39 = vadd.f32 %v4941_v50, %v13030_v55  ;;  %v4943_v40 = vpop.f32.mrb[5].mxu1 }
 0x66f   :  { %v4944_v29 = vpop.f32.mrb[6].mxu1 }
 0x670   :  { %v12113_v4 = vadd.f32 %v4944_v29, %v13031_v51  ;;  %v4946_v27 = vpop.f32.mrb[7].mxu1  ;;  %v13036_v29 = vld [vmem:[#allocation37_spill] sm:$0xff] }
 0x671   :  { %v13037_v27 = vld [vmem:[#allocation36_spill] sm:$0xff] }
 0x672   :  { %5368 = vmatmul.mubr.bf16.gmra.mrb[112].mxu1 %v11643_v32 }
 0x673   :  { %5375 = vmatprep.mubr.bf16.mxu1 %v11660_v24 }
 0x675   :  { %v4949_v25 = vpop.f32.mrb[8].mxu1 }
 0x676   :  { %v12118_v20 = vadd.f32 %v4949_v25, %v13032_v46  ;;  %v4951_v43 = vpop.f32.mrb[9].mxu1 }
 0x677   :  { %v4952_v6 = vpop.f32.mrb[10].mxu1 }
 0x678   :  { %v12121_v56 = vadd.f32 %v4952_v6, %v13033_v61  ;;  %v4954_v7 = vpop.f32.mrb[11].mxu1  ;;  %v13038_v6 = vld [vmem:[#allocation39_spill] sm:$0xff] }
 0x679   :  { %v13039_v7 = vld [vmem:[#allocation38_spill] sm:$0xff] }
 0x67a   :  { %5376 = vmatmul.mubr.bf16.gmra.mrb[116].mxu1 %v11657_v17 }
 0x67b   :  { %5383 = vmatprep.mubr.bf16.mxu1 %v11674_v31 }
 0x67d   :  { %v4957_v57 = vpop.f32.mrb[12].mxu1 }
 0x67e   :  { %v12126_v1 = vadd.f32 %v4957_v57, %v13034_v42  ;;  %v4959_v32 = vpop.f32.mrb[13].mxu1 }
 0x67f   :  { %v4960_v24 = vpop.f32.mrb[14].mxu1 }
 0x680   :  { %v12129_v50 = vadd.f32 %v4960_v24, %v13035_v36  ;;  %v4962_v55 = vpop.f32.mrb[15].mxu1  ;;  %v13040_v24 = vld [vmem:[#allocation41_spill] sm:$0xff] }
 0x681   :  { %v13041_v55 = vld [vmem:[#allocation40_spill] sm:$0xff] }
 0x682   :  { %5384 = vmatmul.mubr.bf16.gmra.mrb[120].mxu1 %v11671_v23 }
 0x683   :  { %5391 = vmatprep.mubr.bf16.mxu1 %v11688_v8 }
 0x685   :  { %v4965_v40 = vpop.f32.mrb[16].mxu1 }
 0x686   :  { %v12134_v51 = vadd.f32 %v4965_v40, %v13036_v29  ;;  %v4967_v17 = vpop.f32.mrb[17].mxu1 }
 0x687   :  { %v4968_v31 = vpop.f32.mrb[18].mxu1 }
 0x688   :  { %v12137_v25 = vadd.f32 %v4968_v31, %v13037_v27  ;;  %v4970_v46 = vpop.f32.mrb[19].mxu1  ;;  %v13042_v31 = vld [vmem:[#allocation43_spill] sm:$0xff] }
 0x689   :  { %v13043_v46 = vld [vmem:[#allocation42_spill] sm:$0xff] }
 0x68a   :  { %5392 = vmatmul.mubr.bf16.gmra.mrb[124].mxu1 %v11685_v10 }
 0x68b   :  { %5399 = vmatprep.mubr.bf16.mxu1 %v11702_v11 }
 0x68d   :  { %v4973_v43 = vpop.f32.mrb[20].mxu1 }
 0x68e   :  { %v12142_v61 = vadd.f32 %v4973_v43, %v13038_v6  ;;  %v4975_v23 = vpop.f32.mrb[21].mxu1 }
 0x68f   :  { %v4976_v8 = vpop.f32.mrb[22].mxu1 }
 0x690   :  { %v12145_v57 = vadd.f32 %v4976_v8, %v13039_v7  ;;  %v4978_v42 = vpop.f32.mrb[23].mxu1  ;;  %v13044_v8 = vld [vmem:[#allocation45_spill] sm:$0xff] }
 0x691   :  { %v13045_v42 = vld [vmem:[#allocation44_spill] sm:$0xff] }
 0x692   :  { %5400 = vmatmul.mubr.bf16.gmra.mrb[128].mxu1 %v11699_v58 }
 0x693   :  { %5407 = vmatprep.mubr.bf16.mxu1 %v11716_v60 }
 0x695   :  { %v4981_v32 = vpop.f32.mrb[24].mxu1 }
 0x696   :  { %v12150_v36 = vadd.f32 %v4981_v32, %v13040_v24  ;;  %v4983_v10 = vpop.f32.mrb[25].mxu1 }
 0x697   :  { %v4984_v11 = vpop.f32.mrb[26].mxu1  ;;  %v13046_v10 = vld [vmem:[#allocation14_spill] sm:$0xff] }
 0x698   :  { %v12153_v40 = vadd.f32 %v4984_v11, %v13041_v55  ;;  %v4986_v29 = vpop.f32.mrb[27].mxu1  ;;  %v13047_v55 = vld [vmem:[#allocation47_spill] sm:$0xff] }
 0x69a   :  { %5408 = vmatmul.mubr.bf16.gmra.mrb[132].mxu1 %v11713_v30 }
 0x69b   :  { %5415 = vmatprep.mubr.bf16.mxu1 %v11730_v33 }
 0x69d   :  { %v4989_v17 = vpop.f32.mrb[28].mxu1 }
 0x69e   :  { %v12158_v27 = vadd.f32 %v4989_v17, %v13042_v31  ;;  %v4991_v58 = vpop.f32.mrb[29].mxu1  ;;  %v13048_v17 = vld [vmem:[#allocation46_spill] sm:$0xff] }
 0x69f   :  { %v4992_v60 = vpop.f32.mrb[30].mxu1 }
 0x6a0   :  { %v12161_v43 = vadd.f32 %v4992_v60, %v13043_v46  ;;  %v4994_v6 = vpop.f32.mrb[31].mxu1  ;;  %v13049_v60 = vld [vmem:[#allocation13_spill] sm:$0xff]  ;;  %v13050_v46 = vld [vmem:[#allocation16_spill] sm:$0xff] }
 0x6a2   :  { %5416 = vmatmul.mubr.bf16.gmra.mrb[136].mxu1 %v11727_v45 }
 0x6a3   :  { %5423 = vmatprep.mubr.bf16.mxu1 %v11744_v26 }
 0x6a5   :  { %v4997_v23 = vpop.f32.mrb[32].mxu1 }
 0x6a6   :  { %v12166_v7 = vadd.f32 %v4997_v23, %v13044_v8  ;;  %v4999_v30 = vpop.f32.mrb[33].mxu1 }
 0x6a7   :  { %v5000_v33 = vpop.f32.mrb[34].mxu1  ;;  %v13051_v30 = vld [vmem:[#allocation6_spill] sm:$0xff] }
 0x6a8   :  { %v12169_v32 = vadd.f32 %v5000_v33, %v13045_v42  ;;  %v5002_v24 = vpop.f32.mrb[35].mxu1 }
 0x6a9   :  { %v13052_v24 = vld [vmem:[#allocation15_spill] sm:$0xff] }
 0x6aa   :  { %5424 = vmatmul.mubr.bf16.gmra.mrb[140].mxu1 %v11741_v49 }
 0x6ab   :  { %5431 = vmatprep.mubr.bf16.mxu1 %v13046_v10  ;;  %v13053_v10 = vmov 0  }
 0x6ad   :  { %v5005_v11 = vpop.f32.mrb[36].mxu1 }
 0x6ae   :  { %v12174_v29 = vadd.f32 %v5005_v11, %v13047_v55  ;;  %v5007_v45 = vpop.f32.mrb[37].mxu1 }
 0x6af   :  { %v5008_v26 = vpop.f32.mrb[38].mxu1 }
 0x6b0   :  { %v12177_v31 = vadd.f32 %v5008_v26, %v13048_v17  ;;  %v5010_v58 = vpop.f32.mrb[39].mxu1 }
 0x6b2   :  { %5432 = vmatmul.mubr.bf16.gmra.mrb[144].mxu1 %v13049_v60  ;;  %v13055_v60 = vld [vmem:[#allocation9_spill] sm:$0xff] }
 0x6b3   :  { %5439 = vmatprep.mubr.bf16.mxu1 %v13050_v46 }
 0x6b5   :  { %v5013_v6 = vpop.f32.mrb[40].mxu1 }
 0x6b6   :  { %v12182_v23 = vadd.f32 %v5013_v6, %v11975_v54  ;;  %v5015_v49 = vpop.f32.mrb[41].mxu1 }
 0x6b7   :  { %v5016_v8 = vpop.f32.mrb[42].mxu1 }
 0x6b8   :  { %v12185_v33 = vadd.f32 %v5016_v8, %v13051_v30  ;;  %v5018_v42 = vpop.f32.mrb[43].mxu1  ;;  %v13057_v8 = vld [vmem:[#allocation8_spill] sm:$0xff] }
 0x6ba   :  { %5440 = vmatmul.mubr.bf16.gmra.mrb[148].mxu1 %v13052_v24 }
 0x6bb   :  { %5722 = vmatprep.mubr.bf16.mxu1 %v13053_v10 }
 0x6bd   :  { %v5021_v11 = vpop.f32.mrb[44].mxu1 }
 0x6be   :  { %v12190_v55 = vadd.f32 %v5021_v11, %v11981_v13  ;;  %v5023_v45 = vpop.f32.mrb[45].mxu1  ;;  %v12204_v13 = vld [vmem:[%s12740_s4] ss:$0 sm:$0xff] }
 0x6bf   :  { %v5024_v26 = vpop.f32.mrb[46].mxu1 }
 0x6c0   :  { %v12193_v17 = vadd.f32 %v5024_v26, %v11983_v16  ;;  %v5026_v54 = vpop.f32.mrb[47].mxu1 }
 0x6c2   :  { %13054 = vst [vmem:[#allocation12_spill] sm:$0xff] %v12193_v17 }
 0x6c5   :  { %v5029_v58 = vpop.f32.mrb[48].mxu1 }
 0x6c6   :  { %v12196_v46 = vadd.f32 %v5029_v58, %v13055_v60  ;;  %v5031_v6 = vpop.f32.mrb[49].mxu1 }
 0x6c7   :  { %v5032_v49 = vpop.f32.mrb[50].mxu1 }
 0x6c8   :  { %13056 = vst [vmem:[#allocation5_spill] sm:$0xff] %v12196_v46  ;;  %v12199_v30 = vadd.f32 %v5032_v49, %v13057_v8  ;;  %v5034_v42 = vpop.f32.mrb[51].mxu1 }
 0x6ca   :  { %13058 = vst [vmem:[#allocation17_spill] sm:$0xff] %v12199_v30 }
 0x6cd   :  { %v5249_v24 = vpop.f32.mrb[52].mxu1 }
 0x6ce   :  { %v5448_v16 = vadd.f32 %v5249_v24, %v12003_v35  ;;  %v5251_v11 = vpop.f32.mrb[53].mxu1 }
 0x6cf   :  { %v5252_v45 = vpop.f32.mrb[54].mxu1 }
 0x6d0   :  { %v5505_v26 = vadd.f32 %v12204_v13, %v5448_v16  ;;  %v5449_v54 = vadd.f32 %v5252_v45, %v12006_v48  ;;  %v5254_v58 = vpop.f32.mrb[55].mxu1 }
 0x6d2   :  { %v5506_v60 = vadd.f32 %v12204_v13, %v5449_v54  ;;  %v5555_v6 = vmax.f32 %v5505_v26, 0.0 }
 0x6d4   :  { %v5556_v49 = vmax.f32 %v5506_v60, 0.0 }
 0x6d5   :  { %v5257_v8 = vpop.f32.mrb[56].mxu1 }
 0x6d6   :  { %v5605_v42 = vpack.c.bf16 %v5556_v49, %v5555_v6  ;;  %v5450_v30 = vadd.f32 %v5257_v8, %v12011_v47  ;;  %v5259_v46 = vpop.f32.mrb[57].mxu1 }
 0x6d7   :  { %v5260_v17 = vpop.f32.mrb[58].mxu1 }
 0x6d8   :  { %5631 = vst.msk [vmem:[#allocation3] sm:$0xff] %vm5630_vm0, %v5605_v42  ;;  %v5507_v35 = vadd.f32 %v12204_v13, %v5450_v30  ;;  %v5451_v24 = vadd.f32 %v5260_v17, %v12014_v3  ;;  %v5262_v16 = vpop.f32.mrb[59].mxu1  ;;  %v9601_v42 = vld [vmem:[%s12739_s5] ss:$8 sps:$4 sm:$0xff]  }
 0x6d9   :  { %v9606_v16 = vld [vmem:[%s12739_s5 + $0x14] ss:$8 sps:$4 sm:$0xff]  }
 0x6da   :  { %v5508_v48 = vadd.f32 %v12204_v13, %v5451_v24  ;;  %v5557_v11 = vmax.f32 %v5507_v35, 0.0 }
 0x6dc   :  { %v5558_v45 = vmax.f32 %v5508_v48, 0.0 }
 0x6dd   :  { %v5265_v26 = vpop.f32.mrb[60].mxu1 }
 0x6de   :  { %v5606_v54 = vpack.c.bf16 %v5558_v45, %v5557_v11  ;;  %v5452_v58 = vadd.f32 %v5265_v26, %v12019_v44  ;;  %v5267_v60 = vpop.f32.mrb[61].mxu1 }
 0x6df   :  { %v5268_v6 = vpop.f32.mrb[62].mxu1 }
 0x6e0   :  { %5632 = vst.msk [vmem:[#allocation3 + $0x8] sm:$0xff] %vm5630_vm0, %v5606_v54  ;;  %v5509_v47 = vadd.f32 %v12204_v13, %v5452_v58  ;;  %v5453_v46 = vadd.f32 %v5268_v6, %v12022_v2  ;;  %v5270_v30 = vpop.f32.mrb[63].mxu1  ;;  %v9609_v58 = vld [vmem:[%s12739_s5 + $0x44] ss:$8 sps:$4 sm:$0xff]  }
 0x6e2   :  { %v5510_v3 = vadd.f32 %v12204_v13, %v5453_v46  ;;  %v5559_v17 = vmax.f32 %v5509_v47, 0.0 }
 0x6e4   :  { %v5560_v49 = vmax.f32 %v5510_v3, 0.0 }
 0x6e5   :  { %v5273_v8 = vpop.f32.mrb[64].mxu1 }
 0x6e6   :  { %v5607_v35 = vpack.c.bf16 %v5560_v49, %v5559_v17  ;;  %v5454_v44 = vadd.f32 %v5273_v8, %v12027_v34  ;;  %v5275_v24 = vpop.f32.mrb[65].mxu1  ;;  %v9604_v34 = vld [vmem:[%s12739_s5 + $0x10] ss:$8 sps:$4 sm:$0xff]  }
 0x6e7   :  { %v5276_v48 = vpop.f32.mrb[66].mxu1  ;;  %v5661_v2 = vld [vmem:[#allocation3 + $0x8] sm:$0xff] }
 0x6e8   :  { %5633 = vst.msk [vmem:[#allocation3 + $0x10] sm:$0xff] %vm5630_vm0, %v5607_v35  ;;  %v5511_v11 = vadd.f32 %v12204_v13, %v5454_v44  ;;  %v5455_v45 = vadd.f32 %v5276_v48, %v12030_v59  ;;  %v5278_v26 = vpop.f32.mrb[67].mxu1  ;;  %8300 = vmatmul.mubr.msk.bf16.vlgmr.msra.gmra.mrb[152].mxu1 %vm5630_vm0, %v5661_v2  ;;  %v5656_v44 = vld [vmem:[#allocation3] sm:$0xff] }
 0x6e9   :  { %5757 = vmatpush1.bf16.msra.mxu1 %v9601_v42  ;;  %5788 = vmatprep.mubr.bf16.mxu1 %v13053_v10  ;;  %v9607_v42 = vld [vmem:[%s12739_s5 + $0x40] ss:$8 sps:$4 sm:$0xff]   ;;  %v9615_v26 = vld [vmem:[%s12739_s5 + $0x64] ss:$8 sps:$4 sm:$0xff]  }
 0x6ea   :  { %v5512_v54 = vadd.f32 %v12204_v13, %v5455_v45  ;;  %5758 = vmatprep.subr.bf16.mxu1 %v9606_v16  ;;  %v5561_v60 = vmax.f32 %v5511_v11, 0.0 }
 0x6ec   :  { %v5562_v6 = vmax.f32 %v5512_v54, 0.0 }
 0x6ed   :  { %v5281_v59 = vpop.f32.mrb[68].mxu1  ;;  %5759 = vmatpush1.bf16.msra.mxu1 %v9604_v34 }
 0x6ee   :  { %v5608_v47 = vpack.c.bf16 %v5562_v6, %v5561_v60  ;;  %v5456_v46 = vadd.f32 %v5281_v59, %v12035_v19  ;;  %v5283_v30 = vpop.f32.mrb[69].mxu1  ;;  %5828 = vmatprep.subr.bf16.mxu1 %v9609_v58  ;;  %v9612_v19 = vld [vmem:[%s12739_s5 + $0x54] ss:$8 sps:$4 sm:$0xff]  }
 0x6ef   :  { %v5284_v3 = vpop.f32.mrb[70].mxu1 }
 0x6f0   :  { %5634 = vst.msk [vmem:[#allocation3 + $0x18] sm:$0xff] %vm5630_vm0, %v5608_v47  ;;  %v5513_v17 = vadd.f32 %v12204_v13, %v5456_v46  ;;  %v5457_v49 = vadd.f32 %v5284_v3, %v12038_v14  ;;  %v5286_v8 = vpop.f32.mrb[71].mxu1  ;;  %v9610_v14 = vld [vmem:[%s12739_s5 + $0x50] ss:$8 sps:$4 sm:$0xff]   ;;  %v9613_v46 = vld [vmem:[%s12739_s5 + $0x60] ss:$8 sps:$4 sm:$0xff]  }
 0x6f1   :  { %v5799_v8 = vld [vmem:[#allocation3 + $0x10] sm:$0xff] }
 0x6f2   :  { %v5514_v35 = vadd.f32 %v12204_v13, %v5457_v49  ;;  %v5563_v24 = vmax.f32 %v5513_v17, 0.0 }
 0x6f4   :  { %v5564_v16 = vmax.f32 %v5514_v35, 0.0  ;;  %8305 = vmatmul.mubr.msk.bf16.vlgmr.msra.gmra.mrb[152].mxu1 %vm5630_vm0, %v5656_v44 }
 0x6f5   :  { %v5289_v48 = vpop.f32.mrb[72].mxu1  ;;  %5829 = vmatpush1.bf16.msra.mxu1 %v9607_v42  ;;  %5860 = vmatprep.mubr.bf16.mxu1 %v13053_v10 }
 0x6f6   :  { %v5609_v2 = vpack.c.bf16 %v5564_v16, %v5563_v24  ;;  %v5458_v11 = vadd.f32 %v5289_v48, %v12043_v63  ;;  %v5291_v45 = vpop.f32.mrb[73].mxu1  ;;  %5830 = vmatprep.subr.bf16.mxu1 %v9612_v19  ;;  %v9621_v24 = vld [vmem:[%s12739_s5 + $0x84] ss:$8 sps:$4 sm:$0xff]  }
 0x6f7   :  { %v5292_v34 = vpop.f32.mrb[74].mxu1 }
 0x6f8   :  { %5635 = vst.msk [vmem:[#allocation3 + $0x20] sm:$0xff] %vm5630_vm0, %v5609_v2  ;;  %v5515_v54 = vadd.f32 %v12204_v13, %v5458_v11  ;;  %v5459_v58 = vadd.f32 %v5292_v34, %v12046_v28  ;;  %v5294_v60 = vpop.f32.mrb[75].mxu1  ;;  %v9618_v28 = vld [vmem:[%s12739_s5 + $0x74] ss:$8 sps:$4 sm:$0xff]  }
 0x6f9   :  { %5831 = vmatpush1.bf16.msra.mxu1 %v9610_v14 }
 0x6fa   :  { %v5516_v6 = vadd.f32 %v12204_v13, %v5459_v58  ;;  %5904 = vmatprep.subr.bf16.mxu1 %v9615_v26  ;;  %v5565_v59 = vmax.f32 %v5515_v54, 0.0  ;;  %v9619_v58 = vld [vmem:[%s12739_s5 + $0x80] ss:$8 sps:$4 sm:$0xff]  }
 0x6fc   :  { %v5566_v63 = vmax.f32 %v5516_v6, 0.0  ;;  %v5875_v6 = vld [vmem:[#allocation3 + $0x18] sm:$0xff] }
 0x6fd   :  { %v5297_v47 = vpop.f32.mrb[76].mxu1 }
 0x6fe   :  { %v5610_v30 = vpack.c.bf16 %v5566_v63, %v5565_v59  ;;  %v5460_v3 = vadd.f32 %v5297_v47, %v12051_v12  ;;  %v5299_v17 = vpop.f32.mrb[77].mxu1  ;;  %v9616_v12 = vld [vmem:[%s12739_s5 + $0x70] ss:$8 sps:$4 sm:$0xff]  }
 0x6ff   :  { %v5300_v49 = vpop.f32.mrb[78].mxu1  ;;  %v9627_v17 = vld [vmem:[%s12739_s5 + $0xa4] ss:$8 sps:$4 sm:$0xff]  }
 0x700   :  { %5636 = vst.msk [vmem:[#allocation3 + $0x28] sm:$0xff] %vm5630_vm0, %v5610_v30  ;;  %v5517_v42 = vadd.f32 %v12204_v13, %v5460_v3  ;;  %v5461_v35 = vadd.f32 %v5300_v49, %v12054_v41  ;;  %v5302_v19 = vpop.f32.mrb[79].mxu1  ;;  %8314 = vmatmul.mubr.msk.bf16.vlgmr.msra.gmra.mrb[152].mxu1 %vm5630_vm0, %v5799_v8 }
 0x701   :  { %5905 = vmatpush1.bf16.msra.mxu1 %v9613_v46  ;;  %5936 = vmatprep.mubr.bf16.mxu1 %v13053_v10 }
 0x702   :  { %v5518_v44 = vadd.f32 %v12204_v13, %v5461_v35  ;;  %5906 = vmatprep.subr.bf16.mxu1 %v9618_v28  ;;  %v5567_v16 = vmax.f32 %v5517_v42, 0.0 }
 0x704   :  { %v5568_v48 = vmax.f32 %v5518_v44, 0.0  ;;  %v9625_v44 = vld [vmem:[%s12739_s5 + $0xa0] ss:$8 sps:$4 sm:$0xff]  }
 0x705   :  { %v5305_v41 = vpop.f32.mrb[80].mxu1  ;;  %5907 = vmatpush1.bf16.msra.mxu1 %v9616_v12 }
 0x706   :  { %v5611_v14 = vpack.c.bf16 %v5568_v48, %v5567_v16  ;;  %v5462_v2 = vadd.f32 %v5305_v41, %v12059_v5  ;;  %v5307_v11 = vpop.f32.mrb[81].mxu1  ;;  %5980 = vmatprep.subr.bf16.mxu1 %v9621_v24  ;;  %v9624_v5 = vld [vmem:[%s12739_s5 + $0x94] ss:$8 sps:$4 sm:$0xff]  }
 0x707   :  { %v5308_v45 = vpop.f32.mrb[82].mxu1 }
 0x708   :  { %5637 = vst.msk [vmem:[#allocation3 + $0x30] sm:$0xff] %vm5630_vm0, %v5611_v14  ;;  %v5519_v26 = vadd.f32 %v12204_v13, %v5462_v2  ;;  %v5463_v34 = vadd.f32 %v5308_v45, %v12062_v18  ;;  %v5310_v54 = vpop.f32.mrb[83].mxu1  ;;  %v9622_v18 = vld [vmem:[%s12739_s5 + $0x90] ss:$8 sps:$4 sm:$0xff]   ;;  %v5951_v14 = vld [vmem:[#allocation3 + $0x20] sm:$0xff] }
 0x70a   :  { %v5520_v60 = vadd.f32 %v12204_v13, %v5463_v34  ;;  %v5569_v59 = vmax.f32 %v5519_v26, 0.0  ;;  %v9633_v34 = vld [vmem:[%s12739_s5 + $0xc4] ss:$8 sps:$4 sm:$0xff]  }
 0x70c   :  { %v5570_v63 = vmax.f32 %v5520_v60, 0.0  ;;  %8323 = vmatmul.mubr.msk.bf16.vlgmr.msra.gmra.mrb[152].mxu1 %vm5630_vm0, %v5875_v6 }
 0x70d   :  { %v5313_v47 = vpop.f32.mrb[84].mxu1  ;;  %5981 = vmatpush1.bf16.msra.mxu1 %v9619_v58  ;;  %6012 = vmatprep.mubr.bf16.mxu1 %v13053_v10 }
 0x70e   :  { %v5612_v46 = vpack.c.bf16 %v5570_v63, %v5569_v59  ;;  %v5464_v30 = vadd.f32 %v5313_v47, %v12067_v22  ;;  %v5315_v3 = vpop.f32.mrb[85].mxu1  ;;  %5982 = vmatprep.subr.bf16.mxu1 %v9624_v5 }
 0x70f   :  { %v5316_v28 = vpop.f32.mrb[86].mxu1  ;;  %v6027_v3 = vld [vmem:[#allocation3 + $0x28] sm:$0xff] }
 0x710   :  { %5638 = vst.msk [vmem:[#allocation3 + $0x38] sm:$0xff] %vm5630_vm0, %v5612_v46  ;;  %v5521_v49 = vadd.f32 %v12204_v13, %v5464_v30  ;;  %v5465_v8 = vadd.f32 %v5316_v28, %v12070_v53  ;;  %v5318_v42 = vpop.f32.mrb[87].mxu1  ;;  %v9630_v53 = vld [vmem:[%s12739_s5 + $0xb4] ss:$8 sps:$4 sm:$0xff]   ;;  %v9631_v46 = vld [vmem:[%s12739_s5 + $0xc0] ss:$8 sps:$4 sm:$0xff]  }
 0x711   :  { %5983 = vmatpush1.bf16.msra.mxu1 %v9622_v18 }
 0x712   :  { %v5522_v35 = vadd.f32 %v12204_v13, %v5465_v8  ;;  %6056 = vmatprep.subr.bf16.mxu1 %v9627_v17  ;;  %v5571_v19 = vmax.f32 %v5521_v49, 0.0 }
 0x714   :  { %v5572_v22 = vmax.f32 %v5522_v35, 0.0 }
 0x715   :  { %v5321_v12 = vpop.f32.mrb[88].mxu1 }
 0x716   :  { %v5613_v24 = vpack.c.bf16 %v5572_v22, %v5571_v19  ;;  %v5466_v16 = vadd.f32 %v5321_v12, %v12075_v21  ;;  %v5323_v48 = vpop.f32.mrb[89].mxu1  ;;  %v9628_v21 = vld [vmem:[%s12739_s5 + $0xb0] ss:$8 sps:$4 sm:$0xff]   ;;  %v9639_v19 = vld [vmem:[%s12739_s5 + $0xe4] ss:$8 sps:$4 sm:$0xff]  }
 0x717   :  { %v5324_v41 = vpop.f32.mrb[90].mxu1 }
 0x718   :  { %5639 = vst.msk [vmem:[#allocation3 + $0x40] sm:$0xff] %vm5630_vm0, %v5613_v24  ;;  %v5523_v2 = vadd.f32 %v12204_v13, %v5466_v16  ;;  %v5467_v11 = vadd.f32 %v5324_v41, %v12078_v62  ;;  %v5326_v45 = vpop.f32.mrb[91].mxu1  ;;  %8332 = vmatmul.mubr.msk.bf16.vlgmr.msra.gmra.mrb[152].mxu1 %vm5630_vm0, %v5951_v14  ;;  %v9637_v41 = vld [vmem:[%s12739_s5 + $0xe0] ss:$8 sps:$4 sm:$0xff]  }
 0x719   :  { %6057 = vmatpush1.bf16.msra.mxu1 %v9625_v44  ;;  %6088 = vmatprep.mubr.bf16.mxu1 %v13053_v10 }
 0x71a   :  { %v5524_v26 = vadd.f32 %v12204_v13, %v5467_v11  ;;  %6058 = vmatprep.subr.bf16.mxu1 %v9630_v53  ;;  %v5573_v54 = vmax.f32 %v5523_v2, 0.0 }
 0x71c   :  { %v5574_v58 = vmax.f32 %v5524_v26, 0.0 }
 0x71d   :  { %v5329_v62 = vpop.f32.mrb[92].mxu1  ;;  %6059 = vmatpush1.bf16.msra.mxu1 %v9628_v21  ;;  %v6103_v21 = vld [vmem:[#allocation3 + $0x30] sm:$0xff] }
 0x71e   :  { %v5614_v60 = vpack.c.bf16 %v5574_v58, %v5573_v54  ;;  %v5468_v5 = vadd.f32 %v5329_v62, %v12083_v15  ;;  %v5331_v6 = vpop.f32.mrb[93].mxu1  ;;  %6132 = vmatprep.subr.bf16.mxu1 %v9633_v34  ;;  %v9636_v15 = vld [vmem:[%s12739_s5 + $0xd4] ss:$8 sps:$4 sm:$0xff]   ;;  %v9645_v62 = vld [vmem:[%s12739_s5 + $0x104] ss:$8 sps:$4 sm:$0xff]  }
 0x71f   :  { %v5332_v59 = vpop.f32.mrb[94].mxu1 }
 0x720   :  { %5640 = vst.msk [vmem:[#allocation3 + $0x48] sm:$0xff] %vm5630_vm0, %v5614_v60  ;;  %v5525_v63 = vadd.f32 %v12204_v13, %v5468_v5  ;;  %v5469_v47 = vadd.f32 %v5332_v59, %v12086_v37  ;;  %v5334_v18 = vpop.f32.mrb[95].mxu1  ;;  %v9634_v37 = vld [vmem:[%s12739_s5 + $0xd0] ss:$8 sps:$4 sm:$0xff]  }
 0x722   :  { %v5526_v30 = vadd.f32 %v12204_v13, %v5469_v47  ;;  %v5575_v17 = vmax.f32 %v5525_v63, 0.0 }
 0x724   :  { %v5576_v28 = vmax.f32 %v5526_v30, 0.0  ;;  %8341 = vmatmul.mubr.msk.bf16.vlgmr.msra.gmra.mrb[152].mxu1 %vm5630_vm0, %v6027_v3 }
 0x725   :  { %v5337_v49 = vpop.f32.mrb[96].mxu1  ;;  %6133 = vmatpush1.bf16.msra.mxu1 %v9631_v46  ;;  %6164 = vmatprep.mubr.bf16.mxu1 %v13053_v10 }
 0x726   :  { %v5615_v8 = vpack.c.bf16 %v5576_v28, %v5575_v17  ;;  %v5470_v42 = vadd.f32 %v5337_v49, %v12091_v0  ;;  %v5339_v35 = vpop.f32.mrb[97].mxu1  ;;  %6134 = vmatprep.subr.bf16.mxu1 %v9636_v15  ;;  %v9643_v15 = vld [vmem:[%s12739_s5 + $0x100] ss:$8 sps:$4 sm:$0xff]   ;;  %v6179_v17 = vld [vmem:[#allocation3 + $0x38] sm:$0xff] }
 0x727   :  { %v5340_v22 = vpop.f32.mrb[98].mxu1 }
 0x728   :  { %5641 = vst.msk [vmem:[#allocation3 + $0x50] sm:$0xff] %vm5630_vm0, %v5615_v8  ;;  %v5527_v12 = vadd.f32 %v12204_v13, %v5470_v42  ;;  %v5471_v44 = vadd.f32 %v5340_v22, %v12094_v9  ;;  %v5342_v24 = vpop.f32.mrb[99].mxu1  ;;  %v9642_v9 = vld [vmem:[%s12739_s5 + $0xf4] ss:$8 sps:$4 sm:$0xff]  }
 0x729   :  { %6135 = vmatpush1.bf16.msra.mxu1 %v9634_v37 }
 0x72a   :  { %v5528_v16 = vadd.f32 %v12204_v13, %v5471_v44  ;;  %6208 = vmatprep.subr.bf16.mxu1 %v9639_v19  ;;  %v5577_v48 = vmax.f32 %v5527_v12, 0.0  ;;  %v9651_v19 = vld [vmem:[%s12739_s5 + $0x124] ss:$8 sps:$4 sm:$0xff]  }
 0x72c   :  { %v5578_v0 = vmax.f32 %v5528_v16, 0.0 }
 0x72d   :  { %v5345_v53 = vpop.f32.mrb[100].mxu1 }
 0x72e   :  { %v5616_v14 = vpack.c.bf16 %v5578_v0, %v5577_v48  ;;  %v5472_v2 = vadd.f32 %v5345_v53, %v12099_v52  ;;  %v5347_v11 = vpop.f32.mrb[101].mxu1  ;;  %v9640_v52 = vld [vmem:[%s12739_s5 + $0xf0] ss:$8 sps:$4 sm:$0xff]   ;;  %v9649_v53 = vld [vmem:[%s12739_s5 + $0x120] ss:$8 sps:$4 sm:$0xff]  }
 0x72f   :  { %v5348_v45 = vpop.f32.mrb[102].mxu1 }
 0x730   :  { %5642 = vst.msk [vmem:[#allocation3 + $0x58] sm:$0xff] %vm5630_vm0, %v5616_v14  ;;  %v5529_v26 = vadd.f32 %v12204_v13, %v5472_v2  ;;  %v5473_v34 = vadd.f32 %v5348_v45, %v12102_v38  ;;  %v5350_v54 = vpop.f32.mrb[103].mxu1  ;;  %8350 = vmatmul.mubr.msk.bf16.vlgmr.msra.gmra.mrb[152].mxu1 %vm5630_vm0, %v6103_v21 }
 0x731   :  { %6209 = vmatpush1.bf16.msra.mxu1 %v9637_v41  ;;  %6240 = vmatprep.mubr.bf16.mxu1 %v13053_v10  ;;  %v9657_v54 = vld [vmem:[%s12739_s5 + $0x144] ss:$8 sps:$4 sm:$0xff]  }
 0x732   :  { %v5530_v58 = vadd.f32 %v12204_v13, %v5473_v34  ;;  %6210 = vmatprep.subr.bf16.mxu1 %v9642_v9  ;;  %v5579_v60 = vmax.f32 %v5529_v26, 0.0  ;;  %v6255_v9 = vld [vmem:[#allocation3 + $0x40] sm:$0xff] }
 0x734   :  { %v5580_v5 = vmax.f32 %v5530_v58, 0.0 }
 0x735   :  { %v5353_v38 = vpop.f32.mrb[104].mxu1  ;;  %6211 = vmatpush1.bf16.msra.mxu1 %v9640_v52 }
 0x736   :  { %v5617_v6 = vpack.c.bf16 %v5580_v5, %v5579_v60  ;;  %v5474_v59 = vadd.f32 %v5353_v38, %v12110_v39  ;;  %v5355_v63 = vpop.f32.mrb[105].mxu1  ;;  %6284 = vmatprep.subr.bf16.mxu1 %v9645_v62  ;;  %v9648_v39 = vld [vmem:[%s12739_s5 + $0x114] ss:$8 sps:$4 sm:$0xff]  }
 0x737   :  { %v5356_v47 = vpop.f32.mrb[106].mxu1 }
 0x738   :  { %5643 = vst.msk [vmem:[#allocation3 + $0x60] sm:$0xff] %vm5630_vm0, %v5617_v6  ;;  %v5531_v18 = vadd.f32 %v12204_v13, %v5474_v59  ;;  %v5475_v46 = vadd.f32 %v5356_v47, %v12113_v4  ;;  %v5358_v30 = vpop.f32.mrb[107].mxu1  ;;  %v9646_v4 = vld [vmem:[%s12739_s5 + $0x110] ss:$8 sps:$4 sm:$0xff]   ;;  %v9655_v47 = vld [vmem:[%s12739_s5 + $0x140] ss:$8 sps:$4 sm:$0xff]  }
 0x73a   :  { %v5532_v3 = vadd.f32 %v12204_v13, %v5475_v46  ;;  %v5581_v28 = vmax.f32 %v5531_v18, 0.0  ;;  %v6331_v46 = vld [vmem:[#allocation3 + $0x48] sm:$0xff] }
 0x73c   :  { %v5582_v49 = vmax.f32 %v5532_v3, 0.0  ;;  %8359 = vmatmul.mubr.msk.bf16.vlgmr.msra.gmra.mrb[152].mxu1 %vm5630_vm0, %v6179_v17 }
 0x73d   :  { %v5361_v37 = vpop.f32.mrb[108].mxu1  ;;  %6285 = vmatpush1.bf16.msra.mxu1 %v9643_v15  ;;  %6316 = vmatprep.mubr.bf16.mxu1 %v13053_v10 }
 0x73e   :  { %v5618_v8 = vpack.c.bf16 %v5582_v49, %v5581_v28  ;;  %v5476_v42 = vadd.f32 %v5361_v37, %v12118_v20  ;;  %v5363_v35 = vpop.f32.mrb[109].mxu1  ;;  %6286 = vmatprep.subr.bf16.mxu1 %v9648_v39  ;;  %v9663_v49 = vld [vmem:[%s12739_s5 + $0x164] ss:$8 sps:$4 sm:$0xff]  }
 0x73f   :  { %v5364_v22 = vpop.f32.mrb[110].mxu1 }
 0x740   :  { %5644 = vst.msk [vmem:[#allocation3 + $0x68] sm:$0xff] %vm5630_vm0, %v5618_v8  ;;  %v5533_v12 = vadd.f32 %v12204_v13, %v5476_v42  ;;  %v5477_v44 = vadd.f32 %v5364_v22, %v12121_v56  ;;  %v5366_v24 = vpop.f32.mrb[111].mxu1  ;;  %v9654_v56 = vld [vmem:[%s12739_s5 + $0x134] ss:$8 sps:$4 sm:$0xff]  }
 0x741   :  { %6287 = vmatpush1.bf16.msra.mxu1 %v9646_v4 }
 0x742   :  { %v5534_v16 = vadd.f32 %v12204_v13, %v5477_v44  ;;  %6360 = vmatprep.subr.bf16.mxu1 %v9651_v19  ;;  %v5583_v48 = vmax.f32 %v5533_v12, 0.0  ;;  %v9661_v12 = vld [vmem:[%s12739_s5 + $0x160] ss:$8 sps:$4 sm:$0xff]  }
 0x744   :  { %v5584_v20 = vmax.f32 %v5534_v16, 0.0 }
 0x745   :  { %v5369_v0 = vpop.f32.mrb[112].mxu1 }
 0x746   :  { %v5619_v41 = vpack.c.bf16 %v5584_v20, %v5583_v48  ;;  %v5478_v14 = vadd.f32 %v5369_v0, %v12126_v1  ;;  %v5371_v2 = vpop.f32.mrb[113].mxu1  ;;  %v9652_v1 = vld [vmem:[%s12739_s5 + $0x130] ss:$8 sps:$4 sm:$0xff]  }
 0x747   :  { %v5372_v11 = vpop.f32.mrb[114].mxu1  ;;  %v6407_v20 = vld [vmem:[#allocation3 + $0x50] sm:$0xff]  ;;  %v9669_v2 = vld [vmem:[%s12739_s5 + $0x184] ss:$8 sps:$4 sm:$0xff]  }
 0x748   :  { %5645 = vst.msk [vmem:[#allocation3 + $0x70] sm:$0xff] %vm5630_vm0, %v5619_v41  ;;  %v5535_v45 = vadd.f32 %v12204_v13, %v5478_v14  ;;  %v5479_v21 = vadd.f32 %v5372_v11, %v12129_v50  ;;  %v5374_v26 = vpop.f32.mrb[115].mxu1  ;;  %8368 = vmatmul.mubr.msk.bf16.vlgmr.msra.gmra.mrb[152].mxu1 %vm5630_vm0, %v6255_v9 }
 0x749   :  { %6361 = vmatpush1.bf16.msra.mxu1 %v9649_v53  ;;  %6392 = vmatprep.mubr.bf16.mxu1 %v13053_v10 }
 0x74a   :  { %v5536_v34 = vadd.f32 %v12204_v13, %v5479_v21  ;;  %6362 = vmatprep.subr.bf16.mxu1 %v9654_v56  ;;  %v5585_v52 = vmax.f32 %v5535_v45, 0.0 }
 0x74c   :  { %v5586_v58 = vmax.f32 %v5536_v34, 0.0 }
 0x74d   :  { %v5377_v50 = vpop.f32.mrb[116].mxu1  ;;  %6363 = vmatpush1.bf16.msra.mxu1 %v9652_v1 }
 0x74e   :  { %v5620_v62 = vpack.c.bf16 %v5586_v58, %v5585_v52  ;;  %v5480_v60 = vadd.f32 %v5377_v50, %v12134_v51  ;;  %v5379_v5 = vpop.f32.mrb[117].mxu1  ;;  %6436 = vmatprep.subr.bf16.mxu1 %v9657_v54  ;;  %v9660_v51 = vld [vmem:[%s12739_s5 + $0x154] ss:$8 sps:$4 sm:$0xff]   ;;  %v9667_v52 = vld [vmem:[%s12739_s5 + $0x180] ss:$8 sps:$4 sm:$0xff]  }
 0x74f   :  { %v5380_v38 = vpop.f32.mrb[118].mxu1  ;;  %v6483_v50 = vld [vmem:[#allocation3 + $0x58] sm:$0xff] }
 0x750   :  { %5646 = vst.msk [vmem:[#allocation3 + $0x78] sm:$0xff] %vm5630_vm0, %v5620_v62  ;;  %v5537_v6 = vadd.f32 %v12204_v13, %v5480_v60  ;;  %v5481_v59 = vadd.f32 %v5380_v38, %v12137_v25  ;;  %v5382_v63 = vpop.f32.mrb[119].mxu1  ;;  %v9658_v25 = vld [vmem:[%s12739_s5 + $0x150] ss:$8 sps:$4 sm:$0xff]  }
 0x751   :  { %v9675_v63 = vld [vmem:[%s12739_s5 + $0x1a4] ss:$8 sps:$4 sm:$0xff]  }
 0x752   :  { %v5538_v18 = vadd.f32 %v12204_v13, %v5481_v59  ;;  %v5587_v30 = vmax.f32 %v5537_v6, 0.0 }
 0x754   :  { %v5588_v15 = vmax.f32 %v5538_v18, 0.0  ;;  %8377 = vmatmul.mubr.msk.bf16.vlgmr.msra.gmra.mrb[152].mxu1 %vm5630_vm0, %v6331_v46 }
 0x755   :  { %v5385_v3 = vpop.f32.mrb[120].mxu1  ;;  %6437 = vmatpush1.bf16.msra.mxu1 %v9655_v47  ;;  %6468 = vmatprep.mubr.bf16.mxu1 %v13053_v10 }
 0x756   :  { %v5621_v39 = vpack.c.bf16 %v5588_v15, %v5587_v30  ;;  %v5482_v17 = vadd.f32 %v5385_v3, %v12142_v61  ;;  %v5387_v28 = vpop.f32.mrb[121].mxu1  ;;  %6438 = vmatprep.subr.bf16.mxu1 %v9660_v51 }
 0x757   :  { %v5388_v37 = vpop.f32.mrb[122].mxu1 }
 0x758   :  { %5647 = vst.msk [vmem:[#allocation3 + $0x80] sm:$0xff] %vm5630_vm0, %v5621_v39  ;;  %v5539_v4 = vadd.f32 %v12204_v13, %v5482_v17  ;;  %v5483_v8 = vadd.f32 %v5388_v37, %v12145_v57  ;;  %v5390_v42 = vpop.f32.mrb[123].mxu1  ;;  %v9666_v57 = vld [vmem:[%s12739_s5 + $0x174] ss:$8 sps:$4 sm:$0xff]   ;;  %v6559_v37 = vld [vmem:[#allocation3 + $0x60] sm:$0xff] }
 0x759   :  { %6439 = vmatpush1.bf16.msra.mxu1 %v9658_v25  ;;  %v9673_v25 = vld [vmem:[%s12739_s5 + $0x1a0] ss:$8 sps:$4 sm:$0xff]  }
 0x75a   :  { %v5540_v35 = vadd.f32 %v12204_v13, %v5483_v8  ;;  %6512 = vmatprep.subr.bf16.mxu1 %v9663_v49  ;;  %v5589_v19 = vmax.f32 %v5539_v4, 0.0 }
 0x75c   :  { %v5590_v61 = vmax.f32 %v5540_v35, 0.0 }
 0x75d   :  { %v5393_v22 = vpop.f32.mrb[124].mxu1 }
 0x75e   :  { %v5622_v44 = vpack.c.bf16 %v5590_v61, %v5589_v19  ;;  %v5484_v24 = vadd.f32 %v5393_v22, %v12150_v36  ;;  %v5395_v16 = vpop.f32.mrb[125].mxu1  ;;  %v9664_v36 = vld [vmem:[%s12739_s5 + $0x170] ss:$8 sps:$4 sm:$0xff]   ;;  %v9681_v19 = vld [vmem:[%s12739_s5 + $0x1c4] ss:$8 sps:$4 sm:$0xff]  }
 0x75f   :  { %v5396_v48 = vpop.f32.mrb[126].mxu1 }
 0x760   :  { %5648 = vst.msk [vmem:[#allocation3 + $0x88] sm:$0xff] %vm5630_vm0, %v5622_v44  ;;  %v5541_v0 = vadd.f32 %v12204_v13, %v5484_v24  ;;  %v5485_v53 = vadd.f32 %v5396_v48, %v12153_v40  ;;  %v5398_v41 = vpop.f32.mrb[127].mxu1  ;;  %8386 = vmatmul.mubr.msk.bf16.vlgmr.msra.gmra.mrb[152].mxu1 %vm5630_vm0, %v6407_v20 }
 0x761   :  { %6513 = vmatpush1.bf16.msra.mxu1 %v9661_v12  ;;  %6544 = vmatprep.mubr.bf16.mxu1 %v13053_v10  ;;  %v6635_v41 = vld [vmem:[#allocation3 + $0x68] sm:$0xff] }
 0x762   :  { %v5542_v14 = vadd.f32 %v12204_v13, %v5485_v53  ;;  %6514 = vmatprep.subr.bf16.mxu1 %v9666_v57  ;;  %v5591_v56 = vmax.f32 %v5541_v0, 0.0  ;;  %v9679_v0 = vld [vmem:[%s12739_s5 + $0x1c0] ss:$8 sps:$4 sm:$0xff]  }
 0x764   :  { %v5592_v11 = vmax.f32 %v5542_v14, 0.0 }
 0x765   :  { %v5401_v40 = vpop.f32.mrb[128].mxu1  ;;  %6515 = vmatpush1.bf16.msra.mxu1 %v9664_v36 }
 0x766   :  { %v5623_v9 = vpack.c.bf16 %v5592_v11, %v5591_v56  ;;  %v5486_v45 = vadd.f32 %v5401_v40, %v12158_v27  ;;  %v5403_v21 = vpop.f32.mrb[129].mxu1  ;;  %6588 = vmatprep.subr.bf16.mxu1 %v9669_v2  ;;  %v9672_v27 = vld [vmem:[%s12739_s5 + $0x194] ss:$8 sps:$4 sm:$0xff]  }
 0x767   :  { %v5404_v26 = vpop.f32.mrb[130].mxu1 }
 0x768   :  { %5649 = vst.msk [vmem:[#allocation3 + $0x90] sm:$0xff] %vm5630_vm0, %v5623_v9  ;;  %v5543_v1 = vadd.f32 %v12204_v13, %v5486_v45  ;;  %v5487_v34 = vadd.f32 %v5404_v26, %v12161_v43  ;;  %v5406_v54 = vpop.f32.mrb[131].mxu1  ;;  %v9670_v43 = vld [vmem:[%s12739_s5 + $0x190] ss:$8 sps:$4 sm:$0xff]   ;;  %v9687_v9 = vld [vmem:[%s12739_s5 + $0x1e4] ss:$8 sps:$4 sm:$0xff]  }
 0x769   :  { %v13059_v26 = vld [vmem:[#allocation12_spill] sm:$0xff] }
 0x76a   :  { %v5544_v58 = vadd.f32 %v12204_v13, %v5487_v34  ;;  %v5593_v62 = vmax.f32 %v5543_v1, 0.0 }
 0x76c   :  { %v5594_v60 = vmax.f32 %v5544_v58, 0.0  ;;  %8395 = vmatmul.mubr.msk.bf16.vlgmr.msra.gmra.mrb[152].mxu1 %vm5630_vm0, %v6483_v50 }
 0x76d   :  { %v5409_v5 = vpop.f32.mrb[132].mxu1  ;;  %6589 = vmatpush1.bf16.msra.mxu1 %v9667_v52  ;;  %6620 = vmatprep.mubr.bf16.mxu1 %v13053_v10 }
 0x76e   :  { %v5624_v38 = vpack.c.bf16 %v5594_v60, %v5593_v62  ;;  %v5488_v6 = vadd.f32 %v5409_v5, %v12166_v7  ;;  %v5411_v59 = vpop.f32.mrb[133].mxu1  ;;  %6590 = vmatprep.subr.bf16.mxu1 %v9672_v27  ;;  %v9690_v27 = vld [vmem:[%s12739_s5 + $0x1f4] ss:$8 sps:$4 sm:$0xff]  }
 0x76f   :  { %v5412_v47 = vpop.f32.mrb[134].mxu1  ;;  %v13060_v60 = vld [vmem:[#allocation5_spill] sm:$0xff] }
 0x770   :  { %5650 = vst.msk [vmem:[#allocation3 + $0x98] sm:$0xff] %vm5630_vm0, %v5624_v38  ;;  %v5545_v18 = vadd.f32 %v12204_v13, %v5488_v6  ;;  %v5489_v51 = vadd.f32 %v5412_v47, %v12169_v32  ;;  %v5414_v46 = vpop.f32.mrb[135].mxu1  ;;  %v9678_v32 = vld [vmem:[%s12739_s5 + $0x1b4] ss:$8 sps:$4 sm:$0xff]  }
 0x771   :  { %6591 = vmatpush1.bf16.msra.mxu1 %v9670_v43  ;;  %v6711_v6 = vld [vmem:[#allocation3 + $0x70] sm:$0xff] }
 0x772   :  { %v5546_v30 = vadd.f32 %v12204_v13, %v5489_v51  ;;  %6664 = vmatprep.subr.bf16.mxu1 %v9675_v63  ;;  %v5595_v15 = vmax.f32 %v5545_v18, 0.0  ;;  %v13061_v63 = vld [vmem:[#allocation17_spill] sm:$0xff] }
 0x773   :  { %v9688_v51 = vld [vmem:[%s12739_s5 + $0x1f0] ss:$8 sps:$4 sm:$0xff]  }
 0x774   :  { %v5596_v7 = vmax.f32 %v5546_v30, 0.0  ;;  %v9693_v30 = vld [vmem:[%s12739_s5 + $0x204] ss:$8 sps:$4 sm:$0xff]  }
 0x775   :  { %v5417_v3 = vpop.f32.mrb[136].mxu1 }
 0x776   :  { %v5625_v39 = vpack.c.bf16 %v5596_v7, %v5595_v15  ;;  %v5490_v17 = vadd.f32 %v5417_v3, %v12174_v29  ;;  %v5419_v28 = vpop.f32.mrb[137].mxu1  ;;  %v9676_v29 = vld [vmem:[%s12739_s5 + $0x1b0] ss:$8 sps:$4 sm:$0xff]  }
 0x777   :  { %v5420_v49 = vpop.f32.mrb[138].mxu1  ;;  %v9699_v28 = vld [vmem:[%s12739_s5 + $0x224] ss:$8 sps:$4 sm:$0xff]  }
 0x778   :  { %5651 = vst.msk [vmem:[#allocation3 + $0xa0] sm:$0xff] %vm5630_vm0, %v5625_v39  ;;  %v5547_v4 = vadd.f32 %v12204_v13, %v5490_v17  ;;  %v5491_v8 = vadd.f32 %v5420_v49, %v12177_v31  ;;  %v5422_v42 = vpop.f32.mrb[139].mxu1  ;;  %8404 = vmatmul.mubr.msk.bf16.vlgmr.msra.gmra.mrb[152].mxu1 %vm5630_vm0, %v6559_v37  ;;  %v6787_v39 = vld [vmem:[#allocation3 + $0x78] sm:$0xff]  ;;  %v6863_v37 = vld [vmem:[#allocation3 + $0x80] sm:$0xff] }
 0x779   :  { %6665 = vmatpush1.bf16.msra.mxu1 %v9673_v25  ;;  %6696 = vmatprep.mubr.bf16.mxu1 %v13053_v10  ;;  %v9691_v25 = vld [vmem:[%s12739_s5 + $0x200] ss:$8 sps:$4 sm:$0xff]   ;;  %v9694_v17 = vld [vmem:[%s12739_s5 + $0x210] ss:$8 sps:$4 sm:$0xff]   ;;  %v9702_v49 = vld [vmem:[%s12739_s5 + $0x234] ss:$8 sps:$4 sm:$0xff]  }
 0x77a   :  { %v5548_v35 = vadd.f32 %v12204_v13, %v5491_v8  ;;  %6666 = vmatprep.subr.bf16.mxu1 %v9678_v32  ;;  %v5597_v61 = vmax.f32 %v5547_v4, 0.0  ;;  %v9697_v32 = vld [vmem:[%s12739_s5 + $0x220] ss:$8 sps:$4 sm:$0xff]   ;;  %v9700_v4 = vld [vmem:[%s12739_s5 + $0x230] ss:$8 sps:$4 sm:$0xff]  }
 0x77b   :  { %v9705_v8 = vld [vmem:[%s12739_s5 + $0x244] ss:$8 sps:$4 sm:$0xff]   ;;  %v9703_v42 = vld [vmem:[%s12739_s5 + $0x240] ss:$8 sps:$4 sm:$0xff]  }
 0x77c   :  { %v5598_v22 = vmax.f32 %v5548_v35, 0.0  ;;  %v6939_v35 = vld [vmem:[#allocation3 + $0x88] sm:$0xff] }
 0x77d   :  { %v5425_v31 = vpop.f32.mrb[140].mxu1  ;;  %6667 = vmatpush1.bf16.msra.mxu1 %v9676_v29  ;;  %v9708_v29 = vld [vmem:[%s12739_s5 + $0x254] ss:$8 sps:$4 sm:$0xff]  }
 0x77e   :  { %v5626_v12 = vpack.c.bf16 %v5598_v22, %v5597_v61  ;;  %v5492_v44 = vadd.f32 %v5425_v31, %v12182_v23  ;;  %v5427_v24 = vpop.f32.mrb[141].mxu1  ;;  %6740 = vmatprep.subr.bf16.mxu1 %v9681_v19  ;;  %v9684_v23 = vld [vmem:[%s12739_s5 + $0x1d4] ss:$8 sps:$4 sm:$0xff]   ;;  %v9706_v19 = vld [vmem:[%s12739_s5 + $0x250] ss:$8 sps:$4 sm:$0xff]  }
 0x77f   :  { %v5428_v16 = vpop.f32.mrb[142].mxu1  ;;  %v9711_v61 = vld [vmem:[%s12739_s5 + $0x264] ss:$8 sps:$4 sm:$0xff]   ;;  %v9709_v22 = vld [vmem:[%s12739_s5 + $0x260] ss:$8 sps:$4 sm:$0xff]  }
 0x780   :  { %5652 = vst.msk [vmem:[#allocation3 + $0xa8] sm:$0xff] %vm5630_vm0, %v5626_v12  ;;  %v5549_v57 = vadd.f32 %v12204_v13, %v5492_v44  ;;  %v5493_v48 = vadd.f32 %v5428_v16, %v12185_v33  ;;  %v5430_v20 = vpop.f32.mrb[143].mxu1  ;;  %v9682_v33 = vld [vmem:[%s12739_s5 + $0x1d0] ss:$8 sps:$4 sm:$0xff]   ;;  %v9714_v31 = vld [vmem:[%s12739_s5 + $0x274] ss:$8 sps:$4 sm:$0xff]  }
 0x781   :  { %v7015_v12 = vld [vmem:[#allocation3 + $0x90] sm:$0xff]  ;;  %v9717_v24 = vld [vmem:[%s12739_s5 + $0x284] ss:$8 sps:$4 sm:$0xff]   ;;  %v9715_v16 = vld [vmem:[%s12739_s5 + $0x280] ss:$8 sps:$4 sm:$0xff]  }
 0x782   :  { %v5550_v53 = vadd.f32 %v12204_v13, %v5493_v48  ;;  %v5599_v36 = vmax.f32 %v5549_v57, 0.0  ;;  %v9712_v44 = vld [vmem:[%s12739_s5 + $0x270] ss:$8 sps:$4 sm:$0xff]   ;;  %v9720_v57 = vld [vmem:[%s12739_s5 + $0x294] ss:$8 sps:$4 sm:$0xff]  }
 0x783   :  { %v7091_v48 = vld [vmem:[#allocation3 + $0x98] sm:$0xff] }
 0x784   :  { %v5600_v14 = vmax.f32 %v5550_v53, 0.0  ;;  %8413 = vmatmul.mubr.msk.bf16.vlgmr.msra.gmra.mrb[152].mxu1 %vm5630_vm0, %v6635_v41  ;;  %v9718_v20 = vld [vmem:[%s12739_s5 + $0x290] ss:$8 sps:$4 sm:$0xff]   ;;  %v9721_v53 = vld [vmem:[%s12739_s5 + $0x2a0] ss:$8 sps:$4 sm:$0xff]  }
 0x785   :  { %v5433_v2 = vpop.f32.mrb[144].mxu1  ;;  %6741 = vmatpush1.bf16.msra.mxu1 %v9679_v0  ;;  %6772 = vmatprep.mubr.bf16.mxu1 %v13053_v10  ;;  %v9723_v0 = vld [vmem:[%s12739_s5 + $0x2a4] ss:$8 sps:$4 sm:$0xff]  }
 0x786   :  { %v5627_v56 = vpack.c.bf16 %v5600_v14, %v5599_v36  ;;  %v5494_v11 = vadd.f32 %v5433_v2, %v12190_v55  ;;  %v5435_v40 = vpop.f32.mrb[145].mxu1  ;;  %6742 = vmatprep.subr.bf16.mxu1 %v9684_v23  ;;  %v9685_v55 = vld [vmem:[%s12739_s5 + $0x1e0] ss:$8 sps:$4 sm:$0xff]   ;;  %v9726_v23 = vld [vmem:[%s12739_s5 + $0x2b4] ss:$8 sps:$4 sm:$0xff]  }
 0x787   :  { %v5436_v45 = vpop.f32.mrb[146].mxu1  ;;  %v7167_v41 = vld [vmem:[#allocation3 + $0xa0] sm:$0xff]  ;;  %v9724_v36 = vld [vmem:[%s12739_s5 + $0x2b0] ss:$8 sps:$4 sm:$0xff]  }
 0x788   :  { %5653 = vst.msk [vmem:[#allocation3 + $0xb0] sm:$0xff] %vm5630_vm0, %v5627_v56  ;;  %v5551_v21 = vadd.f32 %v12204_v13, %v5494_v11  ;;  %v5495_v1 = vadd.f32 %v5436_v45, %v13059_v26  ;;  %v5438_v34 = vpop.f32.mrb[147].mxu1  ;;  %v9729_v14 = vld [vmem:[%s12739_s5 + $0x2c4] ss:$8 sps:$4 sm:$0xff]   ;;  %v9727_v2 = vld [vmem:[%s12739_s5 + $0x2c0] ss:$8 sps:$4 sm:$0xff]  }
 0x789   :  { %6743 = vmatpush1.bf16.msra.mxu1 %v9682_v33  ;;  %v9732_v33 = vld [vmem:[%s12739_s5 + $0x2d4] ss:$8 sps:$4 sm:$0xff]   ;;  %v7243_v56 = vld [vmem:[#allocation3 + $0xa8] sm:$0xff]  ;;  %v9730_v11 = vld [vmem:[%s12739_s5 + $0x2d0] ss:$8 sps:$4 sm:$0xff]  }
 0x78a   :  { %v5552_v54 = vadd.f32 %v12204_v13, %v5495_v1  ;;  %6816 = vmatprep.subr.bf16.mxu1 %v9687_v9  ;;  %v5601_v52 = vmax.f32 %v5551_v21, 0.0  ;;  %v9735_v40 = vld [vmem:[%s12739_s5 + $0x2e4] ss:$8 sps:$4 sm:$0xff]   ;;  %v9733_v9 = vld [vmem:[%s12739_s5 + $0x2e0] ss:$8 sps:$4 sm:$0xff]  }
 0x78b   :  { %v9738_v45 = vld [vmem:[%s12739_s5 + $0x2f4] ss:$8 sps:$4 sm:$0xff]   ;;  %v9736_v26 = vld [vmem:[%s12739_s5 + $0x2f0] ss:$8 sps:$4 sm:$0xff]   ;;  %v9741_v1 = vld [vmem:[%s12739_s5 + $0x304] ss:$8 sps:$4 sm:$0xff]  }
 0x78c   :  { %v5602_v58 = vmax.f32 %v5552_v54, 0.0  ;;  %v9739_v34 = vld [vmem:[%s12739_s5 + $0x300] ss:$8 sps:$4 sm:$0xff]   ;;  %v9744_v54 = vld [vmem:[%s12739_s5 + $0x314] ss:$8 sps:$4 sm:$0xff]  }
 0x78d   :  { %v5441_v50 = vpop.f32.mrb[148].mxu1 }
 0x78e   :  { %v5628_v62 = vpack.c.bf16 %v5602_v58, %v5601_v52  ;;  %v5496_v5 = vadd.f32 %v5441_v50, %v13060_v60  ;;  %v5443_v43 = vpop.f32.mrb[149].mxu1  ;;  %v9742_v52 = vld [vmem:[%s12739_s5 + $0x310] ss:$8 sps:$4 sm:$0xff]   ;;  %v9745_v58 = vld [vmem:[%s12741_s7 + $0x40] sm:$0xff]   ;;  %v9747_v50 = vld [vmem:[%s12741_s7 + $0x48] sm:$0xff]  }
 0x78f   :  { %v5444_v38 = vpop.f32.mrb[150].mxu1  ;;  %v7319_v21 = vld [vmem:[#allocation3 + $0xb0] sm:$0xff]  ;;  %v9751_v43 = vld [vmem:[%s12741_s7 + $0x58] sm:$0xff]  }
 0x790   :  { %5654 = vst.msk [vmem:[#allocation3 + $0xb8] sm:$0xff] %vm5630_vm0, %v5628_v62  ;;  %v5553_v59 = vadd.f32 %v12204_v13, %v5496_v5  ;;  %v5497_v47 = vadd.f32 %v5444_v38, %v13061_v63  ;;  %v5446_v18 = vpop.f32.mrb[151].mxu1  ;;  %8422 = vmatmul.mubr.msk.bf16.vlgmr.msra.gmra.mrb[152].mxu1 %vm5630_vm0, %v6711_v6  ;;  %v9749_v60 = vld [vmem:[%s12741_s7 + $0x50] sm:$0xff]   ;;  %v9752_v38 = vld [vmem:[%s12741_s7 + $0x18] sm:$0xff]   ;;  %v9753_v6 = vld [vmem:[%s12741_s7 + $0x60] sm:$0xff]  }
 0x791   :  { %6817 = vmatpush1.bf16.msra.mxu1 %v9685_v55  ;;  %6848 = vmatprep.mubr.bf16.mxu1 %v13053_v10  ;;  %v9750_v5 = vld [vmem:[%s12741_s7 + $0x10] sm:$0xff]   ;;  %v9755_v63 = vld [vmem:[%s12741_s7 + $0x68] sm:$0xff]  }
 0x792   :  { %v5554_v46 = vadd.f32 %v12204_v13, %v5497_v47  ;;  %6818 = vmatprep.subr.bf16.mxu1 %v9690_v27  ;;  %v5603_v15 = vmax.f32 %v5553_v59, 0.0  ;;  %v9696_v13 = vld [vmem:[%s12739_s5 + $0x214] ss:$8 sps:$4 sm:$0xff]   ;;  %v9746_v27 = vld [vmem:[%s12741_s7] sm:$0xff]   ;;  %v9756_v47 = vld [vmem:[%s12741_s7 + $0x28] sm:$0xff]  }
 0x793   :  { %v9754_v59 = vld [vmem:[%s12741_s7 + $0x20] sm:$0xff]   ;;  %v9757_v18 = vld [vmem:[%s12741_s7 + $0x70] sm:$0xff]  }
 0x794   :  { %v5604_v7 = vmax.f32 %v5554_v46, 0.0  ;;  %v9759_v46 = vld [vmem:[%s12741_s7 + $0x78] sm:$0xff]  }
 0x795   :  { %6819 = vmatpush1.bf16.msra.mxu1 %v9688_v51  ;;  %v9758_v51 = vld [vmem:[%s12741_s7 + $0x30] sm:$0xff]  }
 0x796   :  { %v5629_v3 = vpack.c.bf16 %v5604_v7, %v5603_v15  ;;  %6892 = vmatprep.subr.bf16.mxu1 %v9693_v30  ;;  %v9760_v30 = vld [vmem:[%s12741_s7 + $0x38] sm:$0xff]   ;;  %v7547_v15 = vld [vmem:[%s12742_s6] sm:$0x3] }
 0x797   :  { %v7395_v55 = vld [vmem:[#allocation3 + $0xb8] sm:$0xff]  ;;  %v13062_v7 = vld [vmem:[#allocation19_spill] sm:$0xff] }
 0x798   :  { %5655 = vst.msk [vmem:[#allocation3 + $0xc0] sm:$0xff] %vm5630_vm0, %v5629_v3  ;;  %v13063_v3 = vsub.s32 0, %v13062_v7 }
 0x79c   :  { %8431 = vmatmul.mubr.msk.bf16.vlgmr.msra.gmra.mrb[152].mxu1 %vm5630_vm0, %v6787_v39 }
 0x79d   :  { %6893 = vmatpush1.bf16.msra.mxu1 %v9691_v25  ;;  %6924 = vmatprep.mubr.bf16.mxu1 %v13053_v10  ;;  %v7552_v25 = vrot.slane %v7547_v15, %v13063_v3 }
 0x79e   :  { %6894 = vmatprep.subr.bf16.mxu1 %v9696_v13  ;;  %v13064_v13 = vsub.s32 1, %v13062_v7 }
 0x79f   :  { %v7471_v62 = vld [vmem:[#allocation3 + $0xc0] sm:$0xff] }
 0x7a0   :  { %v7556_v39 = vrot.slane %v7547_v15, %v13064_v13 }
 0x7a1   :  { %6895 = vmatpush1.bf16.msra.mxu1 %v9694_v17 }
 0x7a2   :  { %6968 = vmatprep.subr.bf16.mxu1 %v9699_v28 }
 0x7a8   :  { %8440 = vmatmul.mubr.msk.bf16.vlgmr.msra.gmra.mrb[152].mxu1 %vm5630_vm0, %v6863_v37 }
 0x7a9   :  { %6969 = vmatpush1.bf16.msra.mxu1 %v9697_v32  ;;  %7000 = vmatprep.mubr.bf16.mxu1 %v13053_v10 }
 0x7aa   :  { %6970 = vmatprep.subr.bf16.mxu1 %v9702_v49 }
 0x7ad   :  { %6971 = vmatpush1.bf16.msra.mxu1 %v9700_v4 }
 0x7ae   :  { %7044 = vmatprep.subr.bf16.mxu1 %v9705_v8 }
 0x7b4   :  { %8449 = vmatmul.mubr.msk.bf16.vlgmr.msra.gmra.mrb[152].mxu1 %vm5630_vm0, %v6939_v35 }
 0x7b5   :  { %7045 = vmatpush1.bf16.msra.mxu1 %v9703_v42  ;;  %7076 = vmatprep.mubr.bf16.mxu1 %v13053_v10 }
 0x7b6   :  { %7046 = vmatprep.subr.bf16.mxu1 %v9708_v29 }
 0x7b9   :  { %7047 = vmatpush1.bf16.msra.mxu1 %v9706_v19 }
 0x7ba   :  { %7120 = vmatprep.subr.bf16.mxu1 %v9711_v61 }
 0x7c0   :  { %8458 = vmatmul.mubr.msk.bf16.vlgmr.msra.gmra.mrb[152].mxu1 %vm5630_vm0, %v7015_v12 }
 0x7c1   :  { %7121 = vmatpush1.bf16.msra.mxu1 %v9709_v22  ;;  %7152 = vmatprep.mubr.bf16.mxu1 %v13053_v10 }
 0x7c2   :  { %7122 = vmatprep.subr.bf16.mxu1 %v9714_v31 }
 0x7c5   :  { %7123 = vmatpush1.bf16.msra.mxu1 %v9712_v44 }
 0x7c6   :  { %7196 = vmatprep.subr.bf16.mxu1 %v9717_v24  ;;  %v8513_v24 = vld [vmem:[%s12743_s8] ss:$0 sm:$0xff] }
 0x7cc   :  { %8467 = vmatmul.mubr.msk.bf16.vlgmr.msra.gmra.mrb[152].mxu1 %vm5630_vm0, %v7091_v48 }
 0x7cd   :  { %7197 = vmatpush1.bf16.msra.mxu1 %v9715_v16  ;;  %7228 = vmatprep.mubr.bf16.mxu1 %v13053_v10 }
 0x7ce   :  { %7198 = vmatprep.subr.bf16.mxu1 %v9720_v57 }
 0x7d1   :  { %7199 = vmatpush1.bf16.msra.mxu1 %v9718_v20 }
 0x7d2   :  { %7272 = vmatprep.subr.bf16.mxu1 %v9723_v0 }
 0x7d8   :  { %8476 = vmatmul.mubr.msk.bf16.vlgmr.msra.gmra.mrb[152].mxu1 %vm5630_vm0, %v7167_v41 }
 0x7d9   :  { %7273 = vmatpush1.bf16.msra.mxu1 %v9721_v53  ;;  %7304 = vmatprep.mubr.bf16.mxu1 %v13053_v10 }
 0x7da   :  { %7274 = vmatprep.subr.bf16.mxu1 %v9726_v23 }
 0x7dd   :  { %7275 = vmatpush1.bf16.msra.mxu1 %v9724_v36 }
 0x7de   :  { %7348 = vmatprep.subr.bf16.mxu1 %v9729_v14 }
 0x7e4   :  { %8485 = vmatmul.mubr.msk.bf16.vlgmr.msra.gmra.mrb[152].mxu1 %vm5630_vm0, %v7243_v56 }
 0x7e5   :  { %7349 = vmatpush1.bf16.msra.mxu1 %v9727_v2  ;;  %7380 = vmatprep.mubr.bf16.mxu1 %v13053_v10 }
 0x7e6   :  { %7350 = vmatprep.subr.bf16.mxu1 %v9732_v33 }
 0x7e9   :  { %7351 = vmatpush1.bf16.msra.mxu1 %v9730_v11 }
 0x7ea   :  { %7424 = vmatprep.subr.bf16.mxu1 %v9735_v40 }
 0x7f0   :  { %8494 = vmatmul.mubr.msk.bf16.vlgmr.msra.gmra.mrb[152].mxu1 %vm5630_vm0, %v7319_v21 }
 0x7f1   :  { %7425 = vmatpush1.bf16.msra.mxu1 %v9733_v9  ;;  %7456 = vmatprep.mubr.bf16.mxu1 %v13053_v10 }
 0x7f2   :  { %7426 = vmatprep.subr.bf16.mxu1 %v9738_v45 }
 0x7f5   :  { %7427 = vmatpush1.bf16.msra.mxu1 %v9736_v26 }
 0x7f6   :  { %7500 = vmatprep.subr.bf16.mxu1 %v9741_v1 }
 0x7fc   :  { %8503 = vmatmul.mubr.msk.bf16.vlgmr.msra.gmra.mrb[152].mxu1 %vm5630_vm0, %v7395_v55 }
 0x7fd   :  { %7501 = vmatpush1.bf16.msra.mxu1 %v9739_v34  ;;  %7532 = vmatprep.mubr.bf16.mxu1 %v13053_v10  ;;  %v9748_v10 = vld [vmem:[%s12741_s7 + $0x8] sm:$0xff]  }
 0x7fe   :  { %7502 = vmatprep.subr.bf16.mxu1 %v9744_v54 }
 0x801   :  { %7503 = vmatpush1.bf16.msra.mxu1 %v9742_v52 }
 0x802   :  { %8530 = vmatprep.subr.bf16.mxu1 %v9745_v58 }
 0x808   :  { %8512 = vmatmul.mubr.msk.bf16.vlgmr.msra.gmra.mrb[152].mxu1 %vm5630_vm0, %v7471_v62 }
 0x809   :  { %8531 = vmatpush3.bf16.msra.mxu1 %v9746_v27 }
 0x80a   :  { %8532 = vmatprep.subr.bf16.mxu1 %v9747_v50 }
 0x80d   :  { %8533 = vmatpush3.bf16.msra.mxu1 %v9748_v10 }
 0x80e   :  { %8534 = vmatprep.subr.bf16.mxu1 %v9749_v60 }
 0x811   :  { %8535 = vmatpush3.bf16.msra.mxu1 %v9750_v5 }
 0x812   :  { %8536 = vmatprep.subr.bf16.mxu1 %v9751_v43 }
 0x815   :  { %8537 = vmatpush3.bf16.msra.mxu1 %v9752_v38 }
 0x816   :  { %8538 = vmatprep.subr.bf16.mxu1 %v9753_v6 }
 0x819   :  { %8539 = vmatpush3.bf16.msra.mxu1 %v9754_v59 }
 0x81a   :  { %8540 = vmatprep.subr.bf16.mxu1 %v9755_v63 }
 0x81d   :  { %8541 = vmatpush3.bf16.msra.mxu1 %v9756_v47 }
 0x81e   :  { %8542 = vmatprep.subr.bf16.mxu1 %v9757_v18 }
 0x821   :  { %8543 = vmatpush3.bf16.msra.mxu1 %v9758_v51 }
 0x822   :  { %8544 = vmatprep.subr.bf16.mxu1 %v9759_v46 }
 0x825   :  { %8545 = vmatpush3.bf16.msra.mxu1 %v9760_v30 }
 0x8db   :  { %v7534_v17 = vpop.f32.mrb[152].mxu1 }
 0x8dc   :  { %v7559_v28 = vadd.f32 %v7552_v25, %v7534_v17  ;;  %v7536_v32 = vpop.f32.mrb[153].mxu1 }
 0x8dd   :  { %v7560_v49 = vadd.f32 %v7556_v39, %v7536_v32  ;;  %v7538_v37 = vpop.f32.mrb[154].mxu1 }
 0x8de   :  { %v7561_v4 = vadd.f32 %v7552_v25, %v7538_v37  ;;  %v7540_v8 = vpop.f32.mrb[155].mxu1  ;;  %v7563_v29 = vmax.f32 %v7559_v28, 0.0 }
 0x8df   :  { %v7562_v42 = vadd.f32 %v7556_v39, %v7540_v8  ;;  %v7564_v19 = vmax.f32 %v7560_v49, 0.0 }
 0x8e0   :  { %v7565_v35 = vmax.f32 %v7561_v4, 0.0 }
 0x8e1   :  { %v7566_v61 = vmax.f32 %v7562_v42, 0.0 }
 0x8e2   :  { %v7567_v22 = vpack.c.bf16 %v7565_v35, %v7563_v29 }
 0x8e3   :  { %v7568_v31 = vpack.c.bf16 %v7566_v61, %v7564_v19 }
 0x8e5   :  { %7736 = vmatprep.mubr.bf16.mxu1 %v7568_v31 }
 0x8e6   :  { %7737 = vmatmul.mubr.bf16.vlgmr.msra.gmra.mrb[156].mxu1 %v7567_v22 }
 0x9b9   :  { %v8546_v12 = vpop.f32.mrb[156].mxu1 }
 0x9ba   :  { %v8547_v44 = vpop.f32.mrb[157].mxu1 }
 0x9bb   :  { %v8548_v16 = vadd.f32 %v8547_v44, %v8546_v12  ;;  %v8549_v57 = vpop.f32.mrb[158].mxu1 }
 0x9bc   :  { %v8550_v48 = vpop.f32.mrb[159].mxu1 }
 0x9bd   :  { %v8551_v20 = vadd.f32 %v8550_v48, %v8549_v57  ;;  %v7739_v0 = vadd.f32 %v8548_v16, %v8513_v24 }
 0x9bf   :  { %v7746_v53 = vsel %vm7745_vm1, %v7739_v0, -inf  ;;  %v7742_v23 = vadd.f32 %v8551_v20, %v8513_v24 }
 0x9c0   :  { %7747 = vmax.xlane.f32.xlu0 %v7746_v53 }
 0x9c1   :  { %v7749_v41 = vsel %vm7745_vm1, %v7742_v23, -inf }
 0x9c4   :  { %7750 = vmax.xlane.f32.xlu0 %v7749_v41 }
 0xa4d   :  { %v7748_v36 = vpop.xlane.xlu0 %7747 }
 0xa4e   :  { %v7752_v14 = vsub.f32 %v7739_v0, %v7748_v36 }
 0xa50   :  { %v7754_v2 = vmul.f32 1.442695, %v7752_v14 }
 0xa51   :  { %v7751_v33 = vpop.xlane.xlu0 %7750 }
 0xa52   :  { %9761 = vpow2.f32 %v7754_v2  ;;  %v7753_v56 = vsub.f32 %v7742_v23, %v7751_v33 }
 0xa54   :  { %v7756_v11 = vmul.f32 1.442695, %v7753_v56 }
 0xa56   :  { %9763 = vpow2.f32 %v7756_v11 }
 0xa5c   :  { %v9762_v40 = vpop.eup %9761 }
 0xa5d   :  { %v7758_v9 = vsel %vm7745_vm1, %v9762_v40, 0.0 }
 0xa5e   :  { %7759 = vadd.xlane.f32.xlu1 %v7758_v9 }
 0xa60   :  { %v9764_v45 = vpop.eup %9763 }
 0xa61   :  { %v7761_v21 = vsel %vm7745_vm1, %v9764_v45, 0.0 }
 0xa62   :  { %7762 = vadd.xlane.f32.xlu1 %v7761_v21 }
 0xaeb   :  { %v7760_v26 = vpop.xlane.xlu1 %7759 }
 0xaec   :  { %9765 = vrcp.f32 %v7760_v26 }
 0xaef   :  { %v7763_v1 = vpop.xlane.xlu1 %7762 }
 0xaf0   :  { %9767 = vrcp.f32 %v7763_v1 }
 0xaf6   :  { %v9766_v34 = vpop.eup %9765 }
 0xaf7   :  { %v7766_v54 = vmul.f32 %v9766_v34, %v9762_v40 }
 0xaf9   :  { %7768 = vst.msk [vmem:[%s12744_s9] sm:$0xff] %vm7745_vm1, %v7766_v54 }
 0xafa   :  { %v9768_v55 = vpop.eup %9767 }
 0xafb   :  { %v7767_v52 = vmul.f32 %v9768_v55, %v9764_v45 }
 0xafd   :  { %7769 = vst.msk [vmem:[%s12744_s9 + $0x8] sm:$0xff] %vm7745_vm1, %v7767_v52 }

</bundles_post_ra>
